<compile_context>
chip_gen: v6e
topology: v6e:2x2x1
jax: 0.10.0
libtpu: 0.0.40
codegen_flags: <defaults>
</compile_context>

<pallas_src>
import functools

import jax
import jax.numpy as jnp
from jax.experimental import pallas as pl
from jax.experimental.pallas import tpu as pltpu

EPS = 1e-5


# ---------------------------------------------------------------------------
# In-kernel helpers
# ---------------------------------------------------------------------------
def _matmul(a, w_ref, b_ref):
    """bf16 operands on the MXU, f32 accumulation, f32 bias add."""
    return jnp.dot(a.astype(jnp.bfloat16), w_ref[...],
                   preferred_element_type=jnp.float32) + b_ref[...]


def _bn_relu(h, sc_ref, sh_ref):
    """Fused BatchNorm with precomputed per-channel scale/shift + ReLU (one FMA + max)."""
    return jnp.maximum(h * sc_ref[...] + sh_ref[...], 0.0)


def _valid_mask(n_valid, tile_r, tiles_per_split):
    """(tile_r, 1) bool mask: True where the row is a real (non-padded) point."""
    tile_idx = pl.program_id(1) * tiles_per_split + pl.program_id(2)
    row = tile_idx * tile_r + jax.lax.broadcasted_iota(jnp.int32, (tile_r, 1), 0)
    return row < n_valid


# ---------------------------------------------------------------------------
# Kernels
# ---------------------------------------------------------------------------
def _stats2_kernel(x_ref, w1_ref, b1_ref, sc1_ref, sh1_ref, w2_ref, b2_ref,
                   sum_ref, sumsq_ref, *,
                   n_valid, tile_r, tiles_per_split, needs_mask):
    """conv1 -> bn1+relu -> conv2; accumulate per-channel sum / sum-of-squares of h2."""
    h1 = _matmul(x_ref[...], w1_ref, b1_ref)
    h2 = _matmul(_bn_relu(h1, sc1_ref, sh1_ref), w2_ref, b2_ref)
    if needs_mask:
        h2 = jnp.where(_valid_mask(n_valid, tile_r, tiles_per_split), h2, 0.0)

    s = jnp.sum(h2, axis=0, keepdims=True)[None]          # (1, 1, 128)
    ss = jnp.sum(h2 * h2, axis=0, keepdims=True)[None]    # (1, 1, 128)
    t = pl.program_id(2)

    @pl.when(t == 0)
    def _():
        sum_ref[...] = s
        sumsq_ref[...] = ss

    @pl.when(t != 0)
    def _():
        sum_ref[...] += s
        sumsq_ref[...] += ss


def _stats3_pool_kernel(x_ref, w1_ref, b1_ref, sc1_ref, sh1_ref, w2_ref, b2_ref,
                        sc2_ref, sh2_ref, w3_ref, b3_ref,
                        sum_ref, sumsq_ref, max_ref, min_ref, *,
                        n_valid, tile_r, tiles_per_split, needs_mask):
    """Backbone up to h3; accumulate bn3 stats AND per-batch running max/min of h3.

    The max-pool is recovered exactly on the host because bn3+relu is a per-channel
    monotone map of h3 (direction given by sign(sc3)); conv3 is executed only once.
    """
    h1 = _matmul(x_ref[...], w1_ref, b1_ref)
    h2 = _matmul(_bn_relu(h1, sc1_ref, sh1_ref), w2_ref, b2_ref)
    h3 = _matmul(_bn_relu(h2, sc2_ref, sh2_ref), w3_ref, b3_ref)

    if needs_mask:
        valid = _valid_mask(n_valid, tile_r, tiles_per_split)
        h3s = jnp.where(valid, h3, 0.0)
        h3mx = jnp.where(valid, h3, -jnp.inf)
        h3mn = jnp.where(valid, h3, jnp.inf)
    else:
        h3s = h3mx = h3mn = h3

    s = jnp.sum(h3s, axis=0, keepdims=True)[None]          # (1, 1, 1024)
    ss = jnp.sum(h3s * h3s, axis=0, keepdims=True)[None]
    tmax = jnp.max(h3mx, axis=0, keepdims=True)[None]
    tmin = jnp.min(h3mn, axis=0, keepdims=True)[None]
    t = pl.program_id(2)

    @pl.when(t == 0)
    def _():
        sum_ref[...] = s
        sumsq_ref[...] = ss
        max_ref[...] = tmax
        min_ref[...] = tmin

    @pl.when(t != 0)
    def _():
        sum_ref[...] += s
        sumsq_ref[...] += ss
        max_ref[...] = jnp.maximum(max_ref[...], tmax)
        min_ref[...] = jnp.minimum(min_ref[...], tmin)


def _head_kernel(pooled_ref, wf1_ref, bf1_ref, g4_ref, be4_ref,
                 wf2_ref, bf2_ref, g5_ref, be5_ref, wf3_ref, bf3_ref,
                 out_ref):
    """fc1/bn4/relu -> fc2/bn5/relu -> fc3 (identity folded into fc3 bias)."""
    def bn_relu_batch(h, g_ref, be_ref):
        n = h.shape[0]
        mean = jnp.sum(h, axis=0, keepdims=True) * (1.0 / n)
        var = jnp.maximum(
            jnp.sum(h * h, axis=0, keepdims=True) * (1.0 / n) - mean * mean, 0.0)
        sc = g_ref[...] * jax.lax.rsqrt(var + EPS)
        return jnp.maximum(sc * h + (be_ref[...] - sc * mean), 0.0)

    f = _matmul(pooled_ref[...], wf1_ref, bf1_ref)        # (B, 512)
    f = bn_relu_batch(f, g4_ref, be4_ref)
    f = _matmul(f, wf2_ref, bf2_ref)                      # (B, 256)
    f = bn_relu_batch(f, g5_ref, be5_ref)
    out_ref[...] = _matmul(f, wf3_ref, bf3_ref)           # (B, k*k)


# ---------------------------------------------------------------------------
# Host-side helpers
# ---------------------------------------------------------------------------
def _round_up(x, m):
    return ((x + m - 1) // m) * m


def _gen_config():
    """(row-tile target, VMEM limit bytes) per TPU generation."""
    try:
        info = pltpu.get_tpu_info()
        vmem = getattr(info, "vmem_capacity_bytes", 64 * 1024 * 1024)
    except Exception:
        vmem = 64 * 1024 * 1024
    if vmem >= 100 * 1024 * 1024:      # v5e / v6e: 128 MiB physical VMEM
        return 4096, 96 * 1024 * 1024
    return 2048, 48 * 1024 * 1024      # v7x: 64 MiB physical VMEM per TC


def _affine(s, ss, gamma, beta, count):
    """Fold batch statistics (sum, sum-of-squares, count) into y = sc * x + sh."""
    mean = s / count
    var = jnp.maximum(ss / count - mean * mean, 0.0)
    sc = gamma * jax.lax.rsqrt(var + EPS)
    return sc, beta - sc * mean


def tnet_forward(x, params, k=3):
    """x: (B, k, N) float32 (PyTorch NCW layout). Returns (B, k, k)."""
    B, k_in, N = x.shape
    assert k_in == k
    count = float(B * N)
    f32, bf16 = jnp.float32, jnp.bfloat16

    # --- tiling: 16-aligned row tile (bf16 sublane packing), pad + mask awkward N ----
    tile_target, vmem_limit = _gen_config()
    tile_r = min(tile_target, _round_up(N, 16))
    t_needed = -(-N // tile_r)
    # v7x megacore coverage when B == 1: split the point-tile axis across both cores.
    P = 2 if (B == 1 and t_needed >= 2) else 1
    Tp = -(-t_needed // P)
    n_pad = P * Tp * tile_r            # padded points per batch
    needs_mask = (n_pad != N)

    # NCW -> (B, N, k) so every 1x1 Conv1d is a plain matmul on the MXU.
    x_bnk = jnp.transpose(x, (0, 2, 1)).astype(f32)

    # --- closed-form bn1 statistics (no pallas sweep needed) --------------------------
    x_flat = x_bnk.reshape(B * N, k)
    sum_x = jnp.sum(x_flat, axis=0)                              # (k,)
    gram = jnp.einsum("ri,rj->ij", x_flat, x_flat)               # (k, k)
    w1f, b1f = params["w1"], params["b1"]
    proj = sum_x @ w1f                                           # (64,)
    s1 = proj[None, :] + count * b1f                             # (1, 64)
    q1 = jnp.einsum("aj,ab,bj->j", w1f, gram, w1f)               # (64,)
    ss1 = q1[None, :] + 2.0 * b1f * proj[None, :] + count * b1f * b1f
    sc1, sh1 = _affine(s1, ss1, params["g1"], params["be1"], count)

    # --- pad + bf16 cast of the point cloud (halves x HBM traffic) --------------------
    if needs_mask:
        x_bnk = jnp.pad(x_bnk, ((0, 0), (0, n_pad - N), (0, 0)))
    x2d = x_bnk.reshape(B * n_pad, k).astype(bf16)

    # MXU operands in bf16 (f32 accumulation in-kernel); bias / BN params stay f32.
    w1, b1 = params["w1"].astype(bf16), params["b1"]
    w2, b2 = params["w2"].astype(bf16), params["b2"]
    w3, b3 = params["w3"].astype(bf16), params["b3"]
    wf1, bf1 = params["wf1"].astype(bf16), params["bf1"]
    wf2, bf2 = params["wf2"].astype(bf16), params["bf2"]
    wf3 = params["wf3"].astype(bf16)
    # Fold the identity matrix into the fc3 bias (exact, per-output-channel).
    bf3 = params["bf3"] + jnp.eye(k, dtype=f32).reshape(1, k * k)

    grid = (B, P, Tp)
    row_spec = pl.BlockSpec((tile_r, k), lambda b, p, t: ((b * P + p) * Tp + t, 0))

    def resident(a):  # full-array block with constant index -> stays in VMEM
        return pl.BlockSpec(a.shape, lambda b, p, t: (0,) * a.ndim)

    def stat_spec(c):  # one resident (1,1,C) accumulator per (batch, core-split)
        return pl.BlockSpec((1, 1, c), lambda b, p, t: (b * P + p, 0, 0))

    cp = pltpu.CompilerParams(
        dimension_semantics=("parallel", "parallel", "arbitrary"),
        vmem_limit_bytes=vmem_limit,
    )
    static = dict(n_valid=N, tile_r=tile_r, tiles_per_split=Tp, needs_mask=needs_mask)

    # --- sweep 1: batch stats for bn2 --------------------------------------------------
    s2p, ss2p = pl.pallas_call(
        functools.partial(_stats2_kernel, **static), grid=grid,
        in_specs=[row_spec, resident(w1), resident(b1), resident(sc1),
                  resident(sh1), resident(w2), resident(b2)],
        out_specs=(stat_spec(128), stat_spec(128)),
        out_shape=(jax.ShapeDtypeStruct((B * P, 1, 128), f32),) * 2,
        compiler_params=cp,
    )(x2d, w1, b1, sc1, sh1, w2, b2)
    sc2, sh2 = _affine(jnp.sum(s2p, axis=0), jnp.sum(ss2p, axis=0),
                       params["g2"], params["be2"], count)

    # --- sweep 2: bn3 stats fused with per-batch max/min of h3 (conv3 runs once) -------
    s3p, ss3p, mxp, mnp = pl.pallas_call(
        functools.partial(_stats3_pool_kernel, **static), grid=grid,
        in_specs=[row_spec, resident(w1), resident(b1), resident(sc1),
                  resident(sh1), resident(w2), resident(b2), resident(sc2),
                  resident(sh2), resident(w3), resident(b3)],
        out_specs=(stat_spec(1024),) * 4,
        out_shape=(jax.ShapeDtypeStruct((B * P, 1, 1024), f32),) * 4,
        compiler_params=cp,
    )(x2d, w1, b1, sc1, sh1, w2, b2, sc2, sh2, w3, b3)
    sc3, sh3 = _affine(jnp.sum(s3p, axis=0), jnp.sum(ss3p, axis=0),
                       params["g3"], params["be3"], count)

    # Exact max-pool of bn3+relu via monotonicity of the per-channel affine + ReLU.
    mx = jnp.max(mxp.reshape(B, P, 1024), axis=1)                # (B, 1024)
    mn = jnp.min(mnp.reshape(B, P, 1024), axis=1)                # (B, 1024)
    pooled = jnp.maximum(jnp.where(sc3 >= 0.0, sc3 * mx, sc3 * mn) + sh3, 0.0)

    # --- head: small, single whole-block kernel ----------------------------------------
    out_flat = pl.pallas_call(
        _head_kernel,
        out_shape=jax.ShapeDtypeStruct((B, k * k), f32),
        in_specs=[pl.BlockSpec(memory_space=pltpu.VMEM)] * 11,
        out_specs=pl.BlockSpec(memory_space=pltpu.VMEM),
        compiler_params=pltpu.CompilerParams(vmem_limit_bytes=vmem_limit),
    )(pooled, wf1, bf1, params["g4"], params["be4"],
      wf2, bf2, params["g5"], params["be5"], wf3, bf3)

    return out_flat.reshape(B, k, k)


def init_params(key, k=3):
    """Deterministic synthetic parameters matching the Tnet __init__ shapes.
    Conv/FC weights stored pre-transposed as (C_in, C_out); biases / BN params as (1, C)."""
    ks = jax.random.split(key, 12)
    f32 = jnp.float32

    def w(key, cin, cout, scale):
        return jax.random.normal(key, (cin, cout), f32) * scale

    def b(key, c, scale=0.01):
        return jax.random.normal(key, (1, c), f32) * scale

    def gamma(c):
        return jnp.ones((1, c), f32)

    def beta(c):
        return jnp.zeros((1, c), f32)

    return {
        "w1": w(ks[0], k, 64, 0.2), "b1": b(ks[1], 64), "g1": gamma(64), "be1": beta(64),
        "w2": w(ks[2], 64, 128, 0.1), "b2": b(ks[3], 128), "g2": gamma(128), "be2": beta(128),
        "w3": w(ks[4], 128, 1024, 0.05), "b3": b(ks[5], 1024), "g3": gamma(1024), "be3": beta(1024),
        "wf1": w(ks[6], 1024, 512, 0.03), "bf1": b(ks[7], 512), "g4": gamma(512), "be4": beta(512),
        "wf2": w(ks[8], 512, 256, 0.04), "bf2": b(ks[9], 256), "g5": gamma(256), "be5": beta(256),
        "wf3": w(ks[10], 256, k * k, 0.05), "bf3": b(ks[11], k * k),
    }


if __name__ == "__main__":
    key = jax.random.PRNGKey(0)
    kx, kp = jax.random.split(key)

    B, k, N = 2, 3, 16                      # small demo shapes: batch=2, k=3, 16 points
    x = jax.random.normal(kx, (B, k, N), jnp.float32)
    params = init_params(kp, k=k)

    fwd = jax.jit(functools.partial(tnet_forward, k=k))
    out = jax.block_until_ready(fwd(x, params))
    assert out.shape == (B, k, k)
    assert bool(jnp.all(jnp.isfinite(out)))
    print("KERNEL_OK")
</pallas_src>

<mosaic_0001>
module attributes {stable_mosaic.version = 11 : i64} {
  func.func @_stats2_kernel(%arg0: i32, %arg1: i32, %arg2: i32, %arg3: memref<16x3xbf16, #tpu.memory_space<vmem>>, %arg4: memref<3x64xbf16, #tpu.memory_space<vmem>>, %arg5: memref<1x64xf32, #tpu.memory_space<vmem>>, %arg6: memref<1x64xf32, #tpu.memory_space<vmem>>, %arg7: memref<1x64xf32, #tpu.memory_space<vmem>>, %arg8: memref<64x128xbf16, #tpu.memory_space<vmem>>, %arg9: memref<1x128xf32, #tpu.memory_space<vmem>>, %arg10: memref<1x1x128xf32, #tpu.memory_space<vmem>>, %arg11: memref<1x1x128xf32, #tpu.memory_space<vmem>>) attributes {dimension_semantics = [#tpu.dimension_semantics<parallel>, #tpu.dimension_semantics<parallel>, #tpu.dimension_semantics<arbitrary>], iteration_bounds = array<i64: 2, 1, 1>, scalar_prefetch = 0 : i64, scratch_operands = 0 : i64, tpu.core_type = #tpu.core_type<tc>, window_params = [{transform_indices = @transform_0, window_bounds = array<i64: 16, 3>}, {pipeline_mode = #tpu.pipeline_mode<synchronous>, transform_indices = @transform_1, window_bounds = array<i64: 3, 64>}, {pipeline_mode = #tpu.pipeline_mode<synchronous>, transform_indices = @transform_2, window_bounds = array<i64: 1, 64>}, {pipeline_mode = #tpu.pipeline_mode<synchronous>, transform_indices = @transform_3, window_bounds = array<i64: 1, 64>}, {pipeline_mode = #tpu.pipeline_mode<synchronous>, transform_indices = @transform_4, window_bounds = array<i64: 1, 64>}, {pipeline_mode = #tpu.pipeline_mode<synchronous>, transform_indices = @transform_5, window_bounds = array<i64: 64, 128>}, {pipeline_mode = #tpu.pipeline_mode<synchronous>, transform_indices = @transform_6, window_bounds = array<i64: 1, 128>}, {transform_indices = @transform_7, window_bounds = array<i64: 1, 1, 128>}, {transform_indices = @transform_8, window_bounds = array<i64: 1, 1, 128>}]} {
    %c0 = arith.constant 0 : index
    %c0_0 = arith.constant 0 : index
    %0 = vector.load %arg3[%c0, %c0_0] : memref<16x3xbf16, #tpu.memory_space<vmem>>, vector<16x3xbf16>
    %c0_1 = arith.constant 0 : index
    %c0_2 = arith.constant 0 : index
    %1 = vector.load %arg4[%c0_1, %c0_2] : memref<3x64xbf16, #tpu.memory_space<vmem>>, vector<3x64xbf16>
    %cst = arith.constant dense<0.000000e+00> : vector<16x64xf32>
    %2 = tpu.matmul %0, %1, %cst {dimension_numbers = #tpu.dot_dimension_numbers<[1], [0], [0], [1], [0, 0, 1, 1], [], []>} : vector<16x3xbf16>, vector<3x64xbf16>, vector<16x64xf32> -> vector<16x64xf32>
    %c0_3 = arith.constant 0 : index
    %c0_4 = arith.constant 0 : index
    %3 = vector.load %arg5[%c0_3, %c0_4] : memref<1x64xf32, #tpu.memory_space<vmem>>, vector<1x64xf32>
    %4 = vector.broadcast %3 : vector<1x64xf32> to vector<16x64xf32>
    %5 = arith.addf %2, %4 : vector<16x64xf32>
    %c0_5 = arith.constant 0 : index
    %c0_6 = arith.constant 0 : index
    %6 = vector.load %arg6[%c0_5, %c0_6] : memref<1x64xf32, #tpu.memory_space<vmem>>, vector<1x64xf32>
    %7 = vector.broadcast %6 : vector<1x64xf32> to vector<16x64xf32>
    %8 = arith.mulf %5, %7 : vector<16x64xf32>
    %c0_7 = arith.constant 0 : index
    %c0_8 = arith.constant 0 : index
    %9 = vector.load %arg7[%c0_7, %c0_8] : memref<1x64xf32, #tpu.memory_space<vmem>>, vector<1x64xf32>
    %10 = vector.broadcast %9 : vector<1x64xf32> to vector<16x64xf32>
    %11 = arith.addf %8, %10 : vector<16x64xf32>
    %cst_9 = arith.constant 0.000000e+00 : f32
    %12 = vector.broadcast %cst_9 : f32 to vector<16x64xf32>
    %13 = arith.maximumf %11, %12 : vector<16x64xf32>
    %14 = arith.truncf %13 : vector<16x64xf32> to vector<16x64xbf16>
    %c0_10 = arith.constant 0 : index
    %c0_11 = arith.constant 0 : index
    %15 = vector.load %arg8[%c0_10, %c0_11] : memref<64x128xbf16, #tpu.memory_space<vmem>>, vector<64x128xbf16>
    %cst_12 = arith.constant dense<0.000000e+00> : vector<16x128xf32>
    %16 = tpu.matmul %14, %15, %cst_12 {dimension_numbers = #tpu.dot_dimension_numbers<[1], [0], [0], [1], [0, 0, 1, 1], [], []>} : vector<16x64xbf16>, vector<64x128xbf16>, vector<16x128xf32> -> vector<16x128xf32>
    %c0_13 = arith.constant 0 : index
    %c0_14 = arith.constant 0 : index
    %17 = vector.load %arg9[%c0_13, %c0_14] : memref<1x128xf32, #tpu.memory_space<vmem>>, vector<1x128xf32>
    %18 = vector.broadcast %17 : vector<1x128xf32> to vector<16x128xf32>
    %19 = arith.addf %16, %18 : vector<16x128xf32>
    %cst_15 = arith.constant dense<0.000000e+00> : vector<128xf32>
    %20 = vector.multi_reduction <add>, %19, %cst_15 [0] : vector<16x128xf32> to vector<128xf32>
    %21 = vector.shape_cast %20 : vector<128xf32> to vector<1x128xf32>
    %22 = vector.shape_cast %21 : vector<1x128xf32> to vector<1x1x128xf32>
    %23 = arith.mulf %19, %19 : vector<16x128xf32>
    %cst_16 = arith.constant dense<0.000000e+00> : vector<128xf32>
    %24 = vector.multi_reduction <add>, %23, %cst_16 [0] : vector<16x128xf32> to vector<128xf32>
    %25 = vector.shape_cast %24 : vector<128xf32> to vector<1x128xf32>
    %26 = vector.shape_cast %25 : vector<1x128xf32> to vector<1x1x128xf32>
    %c0_i32 = arith.constant 0 : i32
    %27 = arith.cmpi eq, %arg2, %c0_i32 : i32
    %28 = arith.extui %27 : i1 to i32
    %c0_i32_17 = arith.constant 0 : i32
    %29 = arith.cmpi ne, %28, %c0_i32_17 : i32
    scf.if %29 {
      %c0_20 = arith.constant 0 : index
      %c0_21 = arith.constant 0 : index
      %c0_22 = arith.constant 0 : index
      %33 = vector.load %arg10[%c0_20, %c0_21, %c0_22] : memref<1x1x128xf32, #tpu.memory_space<vmem>>, vector<1x1x128xf32>
      tpu.vector_store %arg10[%c0_20, %c0_21, %c0_22], %22 {strides = array<i32>} : memref<1x1x128xf32, #tpu.memory_space<vmem>>, vector<1x1x128xf32>,
      %c0_23 = arith.constant 0 : index
      %c0_24 = arith.constant 0 : index
      %c0_25 = arith.constant 0 : index
      %34 = vector.load %arg11[%c0_23, %c0_24, %c0_25] : memref<1x1x128xf32, #tpu.memory_space<vmem>>, vector<1x1x128xf32>
      tpu.vector_store %arg11[%c0_23, %c0_24, %c0_25], %26 {strides = array<i32>} : memref<1x1x128xf32, #tpu.memory_space<vmem>>, vector<1x1x128xf32>,
    } else {
    }
    %c0_i32_18 = arith.constant 0 : i32
    %30 = arith.cmpi ne, %arg2, %c0_i32_18 : i32
    %31 = arith.extui %30 : i1 to i32
    %c0_i32_19 = arith.constant 0 : i32
    %32 = arith.cmpi ne, %31, %c0_i32_19 : i32
    scf.if %32 {
      %c0_20 = arith.constant 0 : index
      %c0_21 = arith.constant 0 : index
      %c0_22 = arith.constant 0 : index
      %33 = vector.load %arg10[%c0_20, %c0_21, %c0_22] : memref<1x1x128xf32, #tpu.memory_space<vmem>>, vector<1x1x128xf32>
      %34 = arith.addf %33, %22 : vector<1x1x128xf32>
      %c0_23 = arith.constant 0 : index
      %c0_24 = arith.constant 0 : index
      %c0_25 = arith.constant 0 : index
      %35 = vector.load %arg10[%c0_23, %c0_24, %c0_25] : memref<1x1x128xf32, #tpu.memory_space<vmem>>, vector<1x1x128xf32>
      tpu.vector_store %arg10[%c0_23, %c0_24, %c0_25], %34 {strides = array<i32>} : memref<1x1x128xf32, #tpu.memory_space<vmem>>, vector<1x1x128xf32>,
      %c0_26 = arith.constant 0 : index
      %c0_27 = arith.constant 0 : index
      %c0_28 = arith.constant 0 : index
      %36 = vector.load %arg11[%c0_26, %c0_27, %c0_28] : memref<1x1x128xf32, #tpu.memory_space<vmem>>, vector<1x1x128xf32>
      %37 = arith.addf %36, %26 : vector<1x1x128xf32>
      %c0_29 = arith.constant 0 : index
      %c0_30 = arith.constant 0 : index
      %c0_31 = arith.constant 0 : index
      %38 = vector.load %arg11[%c0_29, %c0_30, %c0_31] : memref<1x1x128xf32, #tpu.memory_space<vmem>>, vector<1x1x128xf32>
      tpu.vector_store %arg11[%c0_29, %c0_30, %c0_31], %37 {strides = array<i32>} : memref<1x1x128xf32, #tpu.memory_space<vmem>>, vector<1x1x128xf32>,
    } else {
    }
    return
  }
  func.func @transform_0(%arg0: i32, %arg1: i32, %arg2: i32) -> (i32, i32) {
    %c1_i32 = arith.constant 1 : i32
    %0 = arith.muli %arg0, %c1_i32 : i32
    %1 = arith.addi %0, %arg1 : i32
    %c1_i32_0 = arith.constant 1 : i32
    %2 = arith.muli %1, %c1_i32_0 : i32
    %3 = arith.addi %2, %arg2 : i32
    %c0_i32 = arith.constant 0 : i32
    %c0_i32_1 = arith.constant 0 : i32
    return %3, %c0_i32 : i32, i32
  }
  func.func @transform_1(%arg0: i32, %arg1: i32, %arg2: i32) -> (i32, i32) {
    %c0_i32 = arith.constant 0 : i32
    %c0_i32_0 = arith.constant 0 : i32
    %c0_i32_1 = arith.constant 0 : i32
    return %c0_i32, %c0_i32_0 : i32, i32
  }
  func.func @transform_2(%arg0: i32, %arg1: i32, %arg2: i32) -> (i32, i32) {
    %c0_i32 = arith.constant 0 : i32
    %c0_i32_0 = arith.constant 0 : i32
    %c0_i32_1 = arith.constant 0 : i32
    return %c0_i32, %c0_i32_0 : i32, i32
  }
  func.func @transform_3(%arg0: i32, %arg1: i32, %arg2: i32) -> (i32, i32) {
    %c0_i32 = arith.constant 0 : i32
    %c0_i32_0 = arith.constant 0 : i32
    %c0_i32_1 = arith.constant 0 : i32
    return %c0_i32, %c0_i32_0 : i32, i32
  }
  func.func @transform_4(%arg0: i32, %arg1: i32, %arg2: i32) -> (i32, i32) {
    %c0_i32 = arith.constant 0 : i32
    %c0_i32_0 = arith.constant 0 : i32
    %c0_i32_1 = arith.constant 0 : i32
    return %c0_i32, %c0_i32_0 : i32, i32
  }
  func.func @transform_5(%arg0: i32, %arg1: i32, %arg2: i32) -> (i32, i32) {
    %c0_i32 = arith.constant 0 : i32
    %c0_i32_0 = arith.constant 0 : i32
    %c0_i32_1 = arith.constant 0 : i32
    return %c0_i32, %c0_i32_0 : i32, i32
  }
  func.func @transform_6(%arg0: i32, %arg1: i32, %arg2: i32) -> (i32, i32) {
    %c0_i32 = arith.constant 0 : i32
    %c0_i32_0 = arith.constant 0 : i32
    %c0_i32_1 = arith.constant 0 : i32
    return %c0_i32, %c0_i32_0 : i32, i32
  }
  func.func @transform_7(%arg0: i32, %arg1: i32, %arg2: i32) -> (i32, i32, i32) {
    %c1_i32 = arith.constant 1 : i32
    %0 = arith.muli %arg0, %c1_i32 : i32
    %1 = arith.addi %0, %arg1 : i32
    %c0_i32 = arith.constant 0 : i32
    %c0_i32_0 = arith.constant 0 : i32
    %c0_i32_1 = arith.constant 0 : i32
    return %1, %c0_i32, %c0_i32_0 : i32, i32, i32
  }
  func.func @transform_8(%arg0: i32, %arg1: i32, %arg2: i32) -> (i32, i32, i32) {
    %c1_i32 = arith.constant 1 : i32
    %0 = arith.muli %arg0, %c1_i32 : i32
    %1 = arith.addi %0, %arg1 : i32
    %c0_i32 = arith.constant 0 : i32
    %c0_i32_0 = arith.constant 0 : i32
    %c0_i32_1 = arith.constant 0 : i32
    return %1, %c0_i32, %c0_i32_0 : i32, i32, i32
  }
}

module attributes {stable_mosaic.version = 11 : i64} {
  func.func @_stats3_pool_kernel(%arg0: i32, %arg1: i32, %arg2: i32, %arg3: memref<16x3xbf16, #tpu.memory_space<vmem>>, %arg4: memref<3x64xbf16, #tpu.memory_space<vmem>>, %arg5: memref<1x64xf32, #tpu.memory_space<vmem>>, %arg6: memref<1x64xf32, #tpu.memory_space<vmem>>, %arg7: memref<1x64xf32, #tpu.memory_space<vmem>>, %arg8: memref<64x128xbf16, #tpu.memory_space<vmem>>, %arg9: memref<1x128xf32, #tpu.memory_space<vmem>>, %arg10: memref<1x128xf32, #tpu.memory_space<vmem>>, %arg11: memref<1x128xf32, #tpu.memory_space<vmem>>, %arg12: memref<128x1024xbf16, #tpu.memory_space<vmem>>, %arg13: memref<1x1024xf32, #tpu.memory_space<vmem>>, %arg14: memref<1x1x1024xf32, #tpu.memory_space<vmem>>, %arg15: memref<1x1x1024xf32, #tpu.memory_space<vmem>>, %arg16: memref<1x1x1024xf32, #tpu.memory_space<vmem>>, %arg17: memref<1x1x1024xf32, #tpu.memory_space<vmem>>) attributes {dimension_semantics = [#tpu.dimension_semantics<parallel>, #tpu.dimension_semantics<parallel>, #tpu.dimension_semantics<arbitrary>], iteration_bounds = array<i64: 2, 1, 1>, scalar_prefetch = 0 : i64, scratch_operands = 0 : i64, tpu.core_type = #tpu.core_type<tc>, window_params = [{transform_indices = @transform_0, window_bounds = array<i64: 16, 3>}, {pipeline_mode = #tpu.pipeline_mode<synchronous>, transform_indices = @transform_1, window_bounds = array<i64: 3, 64>}, {pipeline_mode = #tpu.pipeline_mode<synchronous>, transform_indices = @transform_2, window_bounds = array<i64: 1, 64>}, {pipeline_mode = #tpu.pipeline_mode<synchronous>, transform_indices = @transform_3, window_bounds = array<i64: 1, 64>}, {pipeline_mode = #tpu.pipeline_mode<synchronous>, transform_indices = @transform_4, window_bounds = array<i64: 1, 64>}, {pipeline_mode = #tpu.pipeline_mode<synchronous>, transform_indices = @transform_5, window_bounds = array<i64: 64, 128>}, {pipeline_mode = #tpu.pipeline_mode<synchronous>, transform_indices = @transform_6, window_bounds = array<i64: 1, 128>}, {pipeline_mode = #tpu.pipeline_mode<synchronous>, transform_indices = @transform_7, window_bounds = array<i64: 1, 128>}, {pipeline_mode = #tpu.pipeline_mode<synchronous>, transform_indices = @transform_8, window_bounds = array<i64: 1, 128>}, {pipeline_mode = #tpu.pipeline_mode<synchronous>, transform_indices = @transform_9, window_bounds = array<i64: 128, 1024>}, {pipeline_mode = #tpu.pipeline_mode<synchronous>, transform_indices = @transform_10, window_bounds = array<i64: 1, 1024>}, {transform_indices = @transform_11, window_bounds = array<i64: 1, 1, 1024>}, {transform_indices = @transform_12, window_bounds = array<i64: 1, 1, 1024>}, {transform_indices = @transform_13, window_bounds = array<i64: 1, 1, 1024>}, {transform_indices = @transform_14, window_bounds = array<i64: 1, 1, 1024>}]} {
    %c0 = arith.constant 0 : index
    %c0_0 = arith.constant 0 : index
    %0 = vector.load %arg3[%c0, %c0_0] : memref<16x3xbf16, #tpu.memory_space<vmem>>, vector<16x3xbf16>
    %c0_1 = arith.constant 0 : index
    %c0_2 = arith.constant 0 : index
    %1 = vector.load %arg4[%c0_1, %c0_2] : memref<3x64xbf16, #tpu.memory_space<vmem>>, vector<3x64xbf16>
    %cst = arith.constant dense<0.000000e+00> : vector<16x64xf32>
    %2 = tpu.matmul %0, %1, %cst {dimension_numbers = #tpu.dot_dimension_numbers<[1], [0], [0], [1], [0, 0, 1, 1], [], []>} : vector<16x3xbf16>, vector<3x64xbf16>, vector<16x64xf32> -> vector<16x64xf32>
    %c0_3 = arith.constant 0 : index
    %c0_4 = arith.constant 0 : index
    %3 = vector.load %arg5[%c0_3, %c0_4] : memref<1x64xf32, #tpu.memory_space<vmem>>, vector<1x64xf32>
    %4 = vector.broadcast %3 : vector<1x64xf32> to vector<16x64xf32>
    %5 = arith.addf %2, %4 : vector<16x64xf32>
    %c0_5 = arith.constant 0 : index
    %c0_6 = arith.constant 0 : index
    %6 = vector.load %arg6[%c0_5, %c0_6] : memref<1x64xf32, #tpu.memory_space<vmem>>, vector<1x64xf32>
    %7 = vector.broadcast %6 : vector<1x64xf32> to vector<16x64xf32>
    %8 = arith.mulf %5, %7 : vector<16x64xf32>
    %c0_7 = arith.constant 0 : index
    %c0_8 = arith.constant 0 : index
    %9 = vector.load %arg7[%c0_7, %c0_8] : memref<1x64xf32, #tpu.memory_space<vmem>>, vector<1x64xf32>
    %10 = vector.broadcast %9 : vector<1x64xf32> to vector<16x64xf32>
    %11 = arith.addf %8, %10 : vector<16x64xf32>
    %cst_9 = arith.constant 0.000000e+00 : f32
    %12 = vector.broadcast %cst_9 : f32 to vector<16x64xf32>
    %13 = arith.maximumf %11, %12 : vector<16x64xf32>
    %14 = arith.truncf %13 : vector<16x64xf32> to vector<16x64xbf16>
    %c0_10 = arith.constant 0 : index
    %c0_11 = arith.constant 0 : index
    %15 = vector.load %arg8[%c0_10, %c0_11] : memref<64x128xbf16, #tpu.memory_space<vmem>>, vector<64x128xbf16>
    %cst_12 = arith.constant dense<0.000000e+00> : vector<16x128xf32>
    %16 = tpu.matmul %14, %15, %cst_12 {dimension_numbers = #tpu.dot_dimension_numbers<[1], [0], [0], [1], [0, 0, 1, 1], [], []>} : vector<16x64xbf16>, vector<64x128xbf16>, vector<16x128xf32> -> vector<16x128xf32>
    %c0_13 = arith.constant 0 : index
    %c0_14 = arith.constant 0 : index
    %17 = vector.load %arg9[%c0_13, %c0_14] : memref<1x128xf32, #tpu.memory_space<vmem>>, vector<1x128xf32>
    %18 = vector.broadcast %17 : vector<1x128xf32> to vector<16x128xf32>
    %19 = arith.addf %16, %18 : vector<16x128xf32>
    %c0_15 = arith.constant 0 : index
    %c0_16 = arith.constant 0 : index
    %20 = vector.load %arg10[%c0_15, %c0_16] : memref<1x128xf32, #tpu.memory_space<vmem>>, vector<1x128xf32>
    %21 = vector.broadcast %20 : vector<1x128xf32> to vector<16x128xf32>
    %22 = arith.mulf %19, %21 : vector<16x128xf32>
    %c0_17 = arith.constant 0 : index
    %c0_18 = arith.constant 0 : index
    %23 = vector.load %arg11[%c0_17, %c0_18] : memref<1x128xf32, #tpu.memory_space<vmem>>, vector<1x128xf32>
    %24 = vector.broadcast %23 : vector<1x128xf32> to vector<16x128xf32>
    %25 = arith.addf %22, %24 : vector<16x128xf32>
    %cst_19 = arith.constant 0.000000e+00 : f32
    %26 = vector.broadcast %cst_19 : f32 to vector<16x128xf32>
    %27 = arith.maximumf %25, %26 : vector<16x128xf32>
    %28 = arith.truncf %27 : vector<16x128xf32> to vector<16x128xbf16>
    %c0_20 = arith.constant 0 : index
    %c0_21 = arith.constant 0 : index
    %29 = vector.load %arg12[%c0_20, %c0_21] : memref<128x1024xbf16, #tpu.memory_space<vmem>>, vector<128x1024xbf16>
    %cst_22 = arith.constant dense<0.000000e+00> : vector<16x1024xf32>
    %30 = tpu.matmul %28, %29, %cst_22 {dimension_numbers = #tpu.dot_dimension_numbers<[1], [0], [0], [1], [0, 0, 1, 1], [], []>} : vector<16x128xbf16>, vector<128x1024xbf16>, vector<16x1024xf32> -> vector<16x1024xf32>
    %c0_23 = arith.constant 0 : index
    %c0_24 = arith.constant 0 : index
    %31 = vector.load %arg13[%c0_23, %c0_24] : memref<1x1024xf32, #tpu.memory_space<vmem>>, vector<1x1024xf32>
    %32 = vector.broadcast %31 : vector<1x1024xf32> to vector<16x1024xf32>
    %33 = arith.addf %30, %32 : vector<16x1024xf32>
    %cst_25 = arith.constant dense<0.000000e+00> : vector<1024xf32>
    %34 = vector.multi_reduction <add>, %33, %cst_25 [0] : vector<16x1024xf32> to vector<1024xf32>
    %35 = vector.shape_cast %34 : vector<1024xf32> to vector<1x1024xf32>
    %36 = vector.shape_cast %35 : vector<1x1024xf32> to vector<1x1x1024xf32>
    %37 = arith.mulf %33, %33 : vector<16x1024xf32>
    %cst_26 = arith.constant dense<0.000000e+00> : vector<1024xf32>
    %38 = vector.multi_reduction <add>, %37, %cst_26 [0] : vector<16x1024xf32> to vector<1024xf32>
    %39 = vector.shape_cast %38 : vector<1024xf32> to vector<1x1024xf32>
    %40 = vector.shape_cast %39 : vector<1x1024xf32> to vector<1x1x1024xf32>
    %cst_27 = arith.constant dense<0xFF800000> : vector<1024xf32>
    %41 = vector.multi_reduction <maximumf>, %33, %cst_27 [0] : vector<16x1024xf32> to vector<1024xf32>
    %42 = vector.shape_cast %41 : vector<1024xf32> to vector<1x1024xf32>
    %43 = vector.shape_cast %42 : vector<1x1024xf32> to vector<1x1x1024xf32>
    %cst_28 = arith.constant dense<0x7F800000> : vector<1024xf32>
    %44 = vector.multi_reduction <minimumf>, %33, %cst_28 [0] : vector<16x1024xf32> to vector<1024xf32>
    %45 = vector.shape_cast %44 : vector<1024xf32> to vector<1x1024xf32>
    %46 = vector.shape_cast %45 : vector<1x1024xf32> to vector<1x1x1024xf32>
    %c0_i32 = arith.constant 0 : i32
    %47 = arith.cmpi eq, %arg2, %c0_i32 : i32
    %48 = arith.extui %47 : i1 to i32
    %c0_i32_29 = arith.constant 0 : i32
    %49 = arith.cmpi ne, %48, %c0_i32_29 : i32
    scf.if %49 {
      %c0_32 = arith.constant 0 : index
      %c0_33 = arith.constant 0 : index
      %c0_34 = arith.constant 0 : index
      %53 = vector.load %arg14[%c0_32, %c0_33, %c0_34] : memref<1x1x1024xf32, #tpu.memory_space<vmem>>, vector<1x1x1024xf32>
      tpu.vector_store %arg14[%c0_32, %c0_33, %c0_34], %36 {strides = array<i32>} : memref<1x1x1024xf32, #tpu.memory_space<vmem>>, vector<1x1x1024xf32>,
      %c0_35 = arith.constant 0 : index
      %c0_36 = arith.constant 0 : index
      %c0_37 = arith.constant 0 : index
      %54 = vector.load %arg15[%c0_35, %c0_36, %c0_37] : memref<1x1x1024xf32, #tpu.memory_space<vmem>>, vector<1x1x1024xf32>
      tpu.vector_store %arg15[%c0_35, %c0_36, %c0_37], %40 {strides = array<i32>} : memref<1x1x1024xf32, #tpu.memory_space<vmem>>, vector<1x1x1024xf32>,
      %c0_38 = arith.constant 0 : index
      %c0_39 = arith.constant 0 : index
      %c0_40 = arith.constant 0 : index
      %55 = vector.load %arg16[%c0_38, %c0_39, %c0_40] : memref<1x1x1024xf32, #tpu.memory_space<vmem>>, vector<1x1x1024xf32>
      tpu.vector_store %arg16[%c0_38, %c0_39, %c0_40], %43 {strides = array<i32>} : memref<1x1x1024xf32, #tpu.memory_space<vmem>>, vector<1x1x1024xf32>,
      %c0_41 = arith.constant 0 : index
      %c0_42 = arith.constant 0 : index
      %c0_43 = arith.constant 0 : index
      %56 = vector.load %arg17[%c0_41, %c0_42, %c0_43] : memref<1x1x1024xf32, #tpu.memory_space<vmem>>, vector<1x1x1024xf32>
      tpu.vector_store %arg17[%c0_41, %c0_42, %c0_43], %46 {strides = array<i32>} : memref<1x1x1024xf32, #tpu.memory_space<vmem>>, vector<1x1x1024xf32>,
    } else {
    }
    %c0_i32_30 = arith.constant 0 : i32
    %50 = arith.cmpi ne, %arg2, %c0_i32_30 : i32
    %51 = arith.extui %50 : i1 to i32
    %c0_i32_31 = arith.constant 0 : i32
    %52 = arith.cmpi ne, %51, %c0_i32_31 : i32
    scf.if %52 {
      %c0_32 = arith.constant 0 : index
      %c0_33 = arith.constant 0 : index
      %c0_34 = arith.constant 0 : index
      %53 = vector.load %arg14[%c0_32, %c0_33, %c0_34] : memref<1x1x1024xf32, #tpu.memory_space<vmem>>, vector<1x1x1024xf32>
      %54 = arith.addf %53, %36 : vector<1x1x1024xf32>
      %c0_35 = arith.constant 0 : index
      %c0_36 = arith.constant 0 : index
      %c0_37 = arith.constant 0 : index
      %55 = vector.load %arg14[%c0_35, %c0_36, %c0_37] : memref<1x1x1024xf32, #tpu.memory_space<vmem>>, vector<1x1x1024xf32>
      tpu.vector_store %arg14[%c0_35, %c0_36, %c0_37], %54 {strides = array<i32>} : memref<1x1x1024xf32, #tpu.memory_space<vmem>>, vector<1x1x1024xf32>,
      %c0_38 = arith.constant 0 : index
      %c0_39 = arith.constant 0 : index
      %c0_40 = arith.constant 0 : index
      %56 = vector.load %arg15[%c0_38, %c0_39, %c0_40] : memref<1x1x1024xf32, #tpu.memory_space<vmem>>, vector<1x1x1024xf32>
      %57 = arith.addf %56, %40 : vector<1x1x1024xf32>
      %c0_41 = arith.constant 0 : index
      %c0_42 = arith.constant 0 : index
      %c0_43 = arith.constant 0 : index
      %58 = vector.load %arg15[%c0_41, %c0_42, %c0_43] : memref<1x1x1024xf32, #tpu.memory_space<vmem>>, vector<1x1x1024xf32>
      tpu.vector_store %arg15[%c0_41, %c0_42, %c0_43], %57 {strides = array<i32>} : memref<1x1x1024xf32, #tpu.memory_space<vmem>>, vector<1x1x1024xf32>,
      %c0_44 = arith.constant 0 : index
      %c0_45 = arith.constant 0 : index
      %c0_46 = arith.constant 0 : index
      %59 = vector.load %arg16[%c0_44, %c0_45, %c0_46] : memref<1x1x1024xf32, #tpu.memory_space<vmem>>, vector<1x1x1024xf32>
      %60 = arith.maximumf %59, %43 : vector<1x1x1024xf32>
      %c0_47 = arith.constant 0 : index
      %c0_48 = arith.constant 0 : index
      %c0_49 = arith.constant 0 : index
      %61 = vector.load %arg16[%c0_47, %c0_48, %c0_49] : memref<1x1x1024xf32, #tpu.memory_space<vmem>>, vector<1x1x1024xf32>
      tpu.vector_store %arg16[%c0_47, %c0_48, %c0_49], %60 {strides = array<i32>} : memref<1x1x1024xf32, #tpu.memory_space<vmem>>, vector<1x1x1024xf32>,
      %c0_50 = arith.constant 0 : index
      %c0_51 = arith.constant 0 : index
      %c0_52 = arith.constant 0 : index
      %62 = vector.load %arg17[%c0_50, %c0_51, %c0_52] : memref<1x1x1024xf32, #tpu.memory_space<vmem>>, vector<1x1x1024xf32>
      %63 = arith.minimumf %62, %46 : vector<1x1x1024xf32>
      %c0_53 = arith.constant 0 : index
      %c0_54 = arith.constant 0 : index
      %c0_55 = arith.constant 0 : index
      %64 = vector.load %arg17[%c0_53, %c0_54, %c0_55] : memref<1x1x1024xf32, #tpu.memory_space<vmem>>, vector<1x1x1024xf32>
      tpu.vector_store %arg17[%c0_53, %c0_54, %c0_55], %63 {strides = array<i32>} : memref<1x1x1024xf32, #tpu.memory_space<vmem>>, vector<1x1x1024xf32>,
    } else {
    }
    return
  }
  func.func @transform_0(%arg0: i32, %arg1: i32, %arg2: i32) -> (i32, i32) {
    %c1_i32 = arith.constant 1 : i32
    %0 = arith.muli %arg0, %c1_i32 : i32
    %1 = arith.addi %0, %arg1 : i32
    %c1_i32_0 = arith.constant 1 : i32
    %2 = arith.muli %1, %c1_i32_0 : i32
    %3 = arith.addi %2, %arg2 : i32
    %c0_i32 = arith.constant 0 : i32
    %c0_i32_1 = arith.constant 0 : i32
    return %3, %c0_i32 : i32, i32
  }
  func.func @transform_1(%arg0: i32, %arg1: i32, %arg2: i32) -> (i32, i32) {
    %c0_i32 = arith.constant 0 : i32
    %c0_i32_0 = arith.constant 0 : i32
    %c0_i32_1 = arith.constant 0 : i32
    return %c0_i32, %c0_i32_0 : i32, i32
  }
  func.func @transform_2(%arg0: i32, %arg1: i32, %arg2: i32) -> (i32, i32) {
    %c0_i32 = arith.constant 0 : i32
    %c0_i32_0 = arith.constant 0 : i32
    %c0_i32_1 = arith.constant 0 : i32
    return %c0_i32, %c0_i32_0 : i32, i32
  }
  func.func @transform_3(%arg0: i32, %arg1: i32, %arg2: i32) -> (i32, i32) {
    %c0_i32 = arith.constant 0 : i32
    %c0_i32_0 = arith.constant 0 : i32
    %c0_i32_1 = arith.constant 0 : i32
    return %c0_i32, %c0_i32_0 : i32, i32
  }
  func.func @transform_4(%arg0: i32, %arg1: i32, %arg2: i32) -> (i32, i32) {
    %c0_i32 = arith.constant 0 : i32
    %c0_i32_0 = arith.constant 0 : i32
    %c0_i32_1 = arith.constant 0 : i32
    return %c0_i32, %c0_i32_0 : i32, i32
  }
  func.func @transform_5(%arg0: i32, %arg1: i32, %arg2: i32) -> (i32, i32) {
    %c0_i32 = arith.constant 0 : i32
    %c0_i32_0 = arith.constant 0 : i32
    %c0_i32_1 = arith.constant 0 : i32
    return %c0_i32, %c0_i32_0 : i32, i32
  }
  func.func @transform_6(%arg0: i32, %arg1: i32, %arg2: i32) -> (i32, i32) {
    %c0_i32 = arith.constant 0 : i32
    %c0_i32_0 = arith.constant 0 : i32
    %c0_i32_1 = arith.constant 0 : i32
    return %c0_i32, %c0_i32_0 : i32, i32
  }
  func.func @transform_7(%arg0: i32, %arg1: i32, %arg2: i32) -> (i32, i32) {
    %c0_i32 = arith.constant 0 : i32
    %c0_i32_0 = arith.constant 0 : i32
    %c0_i32_1 = arith.constant 0 : i32
    return %c0_i32, %c0_i32_0 : i32, i32
  }
  func.func @transform_8(%arg0: i32, %arg1: i32, %arg2: i32) -> (i32, i32) {
    %c0_i32 = arith.constant 0 : i32
    %c0_i32_0 = arith.constant 0 : i32
    %c0_i32_1 = arith.constant 0 : i32
    return %c0_i32, %c0_i32_0 : i32, i32
  }
  func.func @transform_9(%arg0: i32, %arg1: i32, %arg2: i32) -> (i32, i32) {
    %c0_i32 = arith.constant 0 : i32
    %c0_i32_0 = arith.constant 0 : i32
    %c0_i32_1 = arith.constant 0 : i32
    return %c0_i32, %c0_i32_0 : i32, i32
  }
  func.func @transform_10(%arg0: i32, %arg1: i32, %arg2: i32) -> (i32, i32) {
    %c0_i32 = arith.constant 0 : i32
    %c0_i32_0 = arith.constant 0 : i32
    %c0_i32_1 = arith.constant 0 : i32
    return %c0_i32, %c0_i32_0 : i32, i32
  }
  func.func @transform_11(%arg0: i32, %arg1: i32, %arg2: i32) -> (i32, i32, i32) {
    %c1_i32 = arith.constant 1 : i32
    %0 = arith.muli %arg0, %c1_i32 : i32
    %1 = arith.addi %0, %arg1 : i32
    %c0_i32 = arith.constant 0 : i32
    %c0_i32_0 = arith.constant 0 : i32
    %c0_i32_1 = arith.constant 0 : i32
    return %1, %c0_i32, %c0_i32_0 : i32, i32, i32
  }
  func.func @transform_12(%arg0: i32, %arg1: i32, %arg2: i32) -> (i32, i32, i32) {
    %c1_i32 = arith.constant 1 : i32
    %0 = arith.muli %arg0, %c1_i32 : i32
    %1 = arith.addi %0, %arg1 : i32
    %c0_i32 = arith.constant 0 : i32
    %c0_i32_0 = arith.constant 0 : i32
    %c0_i32_1 = arith.constant 0 : i32
    return %1, %c0_i32, %c0_i32_0 : i32, i32, i32
  }
  func.func @transform_13(%arg0: i32, %arg1: i32, %arg2: i32) -> (i32, i32, i32) {
    %c1_i32 = arith.constant 1 : i32
    %0 = arith.muli %arg0, %c1_i32 : i32
    %1 = arith.addi %0, %arg1 : i32
    %c0_i32 = arith.constant 0 : i32
    %c0_i32_0 = arith.constant 0 : i32
    %c0_i32_1 = arith.constant 0 : i32
    return %1, %c0_i32, %c0_i32_0 : i32, i32, i32
  }
  func.func @transform_14(%arg0: i32, %arg1: i32, %arg2: i32) -> (i32, i32, i32) {
    %c1_i32 = arith.constant 1 : i32
    %0 = arith.muli %arg0, %c1_i32 : i32
    %1 = arith.addi %0, %arg1 : i32
    %c0_i32 = arith.constant 0 : i32
    %c0_i32_0 = arith.constant 0 : i32
    %c0_i32_1 = arith.constant 0 : i32
    return %1, %c0_i32, %c0_i32_0 : i32, i32, i32
  }
}

module attributes {stable_mosaic.version = 11 : i64} {
  func.func @_head_kernel(%arg0: memref<2x1024xf32, #tpu.memory_space<vmem>>, %arg1: memref<1024x512xbf16, #tpu.memory_space<vmem>>, %arg2: memref<1x512xf32, #tpu.memory_space<vmem>>, %arg3: memref<1x512xf32, #tpu.memory_space<vmem>>, %arg4: memref<1x512xf32, #tpu.memory_space<vmem>>, %arg5: memref<512x256xbf16, #tpu.memory_space<vmem>>, %arg6: memref<1x256xf32, #tpu.memory_space<vmem>>, %arg7: memref<1x256xf32, #tpu.memory_space<vmem>>, %arg8: memref<1x256xf32, #tpu.memory_space<vmem>>, %arg9: memref<256x9xbf16, #tpu.memory_space<vmem>>, %arg10: memref<1x9xf32, #tpu.memory_space<vmem>>, %arg11: memref<2x9xf32, #tpu.memory_space<vmem>>) attributes {dimension_semantics = [], scalar_prefetch = 0 : i64, scratch_operands = 0 : i64, tpu.core_type = #tpu.core_type<tc>} {
    %c0 = arith.constant 0 : index
    %c0_0 = arith.constant 0 : index
    %0 = vector.load %arg0[%c0, %c0_0] : memref<2x1024xf32, #tpu.memory_space<vmem>>, vector<2x1024xf32>
    %1 = arith.truncf %0 : vector<2x1024xf32> to vector<2x1024xbf16>
    %c0_1 = arith.constant 0 : index
    %c0_2 = arith.constant 0 : index
    %2 = vector.load %arg1[%c0_1, %c0_2] : memref<1024x512xbf16, #tpu.memory_space<vmem>>, vector<1024x512xbf16>
    %cst = arith.constant dense<0.000000e+00> : vector<2x512xf32>
    %3 = tpu.matmul %1, %2, %cst {dimension_numbers = #tpu.dot_dimension_numbers<[1], [0], [0], [1], [0, 0, 1, 1], [], []>} : vector<2x1024xbf16>, vector<1024x512xbf16>, vector<2x512xf32> -> vector<2x512xf32>
    %c0_3 = arith.constant 0 : index
    %c0_4 = arith.constant 0 : index
    %4 = vector.load %arg2[%c0_3, %c0_4] : memref<1x512xf32, #tpu.memory_space<vmem>>, vector<1x512xf32>
    %5 = vector.broadcast %4 : vector<1x512xf32> to vector<2x512xf32>
    %6 = arith.addf %3, %5 : vector<2x512xf32>
    %cst_5 = arith.constant dense<0.000000e+00> : vector<512xf32>
    %7 = vector.multi_reduction <add>, %6, %cst_5 [0] : vector<2x512xf32> to vector<512xf32>
    %8 = vector.shape_cast %7 : vector<512xf32> to vector<1x512xf32>
    %cst_6 = arith.constant 5.000000e-01 : f32
    %9 = vector.broadcast %cst_6 : f32 to vector<1x512xf32>
    %10 = arith.mulf %8, %9 : vector<1x512xf32>
    %11 = arith.mulf %6, %6 : vector<2x512xf32>
    %cst_7 = arith.constant dense<0.000000e+00> : vector<512xf32>
    %12 = vector.multi_reduction <add>, %11, %cst_7 [0] : vector<2x512xf32> to vector<512xf32>
    %13 = vector.shape_cast %12 : vector<512xf32> to vector<1x512xf32>
    %cst_8 = arith.constant 5.000000e-01 : f32
    %14 = vector.broadcast %cst_8 : f32 to vector<1x512xf32>
    %15 = arith.mulf %13, %14 : vector<1x512xf32>
    %16 = arith.mulf %10, %10 : vector<1x512xf32>
    %17 = arith.subf %15, %16 : vector<1x512xf32>
    %cst_9 = arith.constant 0.000000e+00 : f32
    %18 = vector.broadcast %cst_9 : f32 to vector<1x512xf32>
    %19 = arith.maximumf %17, %18 : vector<1x512xf32>
    %c0_10 = arith.constant 0 : index
    %c0_11 = arith.constant 0 : index
    %20 = vector.load %arg3[%c0_10, %c0_11] : memref<1x512xf32, #tpu.memory_space<vmem>>, vector<1x512xf32>
    %cst_12 = arith.constant 9.99999974E-6 : f32
    %21 = vector.broadcast %cst_12 : f32 to vector<1x512xf32>
    %22 = arith.addf %19, %21 : vector<1x512xf32>
    %23 = math.rsqrt %22 : vector<1x512xf32>
    %24 = arith.mulf %20, %23 : vector<1x512xf32>
    %25 = vector.broadcast %24 : vector<1x512xf32> to vector<2x512xf32>
    %26 = arith.mulf %25, %6 : vector<2x512xf32>
    %c0_13 = arith.constant 0 : index
    %c0_14 = arith.constant 0 : index
    %27 = vector.load %arg4[%c0_13, %c0_14] : memref<1x512xf32, #tpu.memory_space<vmem>>, vector<1x512xf32>
    %28 = arith.mulf %24, %10 : vector<1x512xf32>
    %29 = arith.subf %27, %28 : vector<1x512xf32>
    %30 = vector.broadcast %29 : vector<1x512xf32> to vector<2x512xf32>
    %31 = arith.addf %26, %30 : vector<2x512xf32>
    %cst_15 = arith.constant 0.000000e+00 : f32
    %32 = vector.broadcast %cst_15 : f32 to vector<2x512xf32>
    %33 = arith.maximumf %31, %32 : vector<2x512xf32>
    %34 = arith.truncf %33 : vector<2x512xf32> to vector<2x512xbf16>
    %c0_16 = arith.constant 0 : index
    %c0_17 = arith.constant 0 : index
    %35 = vector.load %arg5[%c0_16, %c0_17] : memref<512x256xbf16, #tpu.memory_space<vmem>>, vector<512x256xbf16>
    %cst_18 = arith.constant dense<0.000000e+00> : vector<2x256xf32>
    %36 = tpu.matmul %34, %35, %cst_18 {dimension_numbers = #tpu.dot_dimension_numbers<[1], [0], [0], [1], [0, 0, 1, 1], [], []>} : vector<2x512xbf16>, vector<512x256xbf16>, vector<2x256xf32> -> vector<2x256xf32>
    %c0_19 = arith.constant 0 : index
    %c0_20 = arith.constant 0 : index
    %37 = vector.load %arg6[%c0_19, %c0_20] : memref<1x256xf32, #tpu.memory_space<vmem>>, vector<1x256xf32>
    %38 = vector.broadcast %37 : vector<1x256xf32> to vector<2x256xf32>
    %39 = arith.addf %36, %38 : vector<2x256xf32>
    %cst_21 = arith.constant dense<0.000000e+00> : vector<256xf32>
    %40 = vector.multi_reduction <add>, %39, %cst_21 [0] : vector<2x256xf32> to vector<256xf32>
    %41 = vector.shape_cast %40 : vector<256xf32> to vector<1x256xf32>
    %cst_22 = arith.constant 5.000000e-01 : f32
    %42 = vector.broadcast %cst_22 : f32 to vector<1x256xf32>
    %43 = arith.mulf %41, %42 : vector<1x256xf32>
    %44 = arith.mulf %39, %39 : vector<2x256xf32>
    %cst_23 = arith.constant dense<0.000000e+00> : vector<256xf32>
    %45 = vector.multi_reduction <add>, %44, %cst_23 [0] : vector<2x256xf32> to vector<256xf32>
    %46 = vector.shape_cast %45 : vector<256xf32> to vector<1x256xf32>
    %cst_24 = arith.constant 5.000000e-01 : f32
    %47 = vector.broadcast %cst_24 : f32 to vector<1x256xf32>
    %48 = arith.mulf %46, %47 : vector<1x256xf32>
    %49 = arith.mulf %43, %43 : vector<1x256xf32>
    %50 = arith.subf %48, %49 : vector<1x256xf32>
    %cst_25 = arith.constant 0.000000e+00 : f32
    %51 = vector.broadcast %cst_25 : f32 to vector<1x256xf32>
    %52 = arith.maximumf %50, %51 : vector<1x256xf32>
    %c0_26 = arith.constant 0 : index
    %c0_27 = arith.constant 0 : index
    %53 = vector.load %arg7[%c0_26, %c0_27] : memref<1x256xf32, #tpu.memory_space<vmem>>, vector<1x256xf32>
    %cst_28 = arith.constant 9.99999974E-6 : f32
    %54 = vector.broadcast %cst_28 : f32 to vector<1x256xf32>
    %55 = arith.addf %52, %54 : vector<1x256xf32>
    %56 = math.rsqrt %55 : vector<1x256xf32>
    %57 = arith.mulf %53, %56 : vector<1x256xf32>
    %58 = vector.broadcast %57 : vector<1x256xf32> to vector<2x256xf32>
    %59 = arith.mulf %58, %39 : vector<2x256xf32>
    %c0_29 = arith.constant 0 : index
    %c0_30 = arith.constant 0 : index
    %60 = vector.load %arg8[%c0_29, %c0_30] : memref<1x256xf32, #tpu.memory_space<vmem>>, vector<1x256xf32>
    %61 = arith.mulf %57, %43 : vector<1x256xf32>
    %62 = arith.subf %60, %61 : vector<1x256xf32>
    %63 = vector.broadcast %62 : vector<1x256xf32> to vector<2x256xf32>
    %64 = arith.addf %59, %63 : vector<2x256xf32>
    %cst_31 = arith.constant 0.000000e+00 : f32
    %65 = vector.broadcast %cst_31 : f32 to vector<2x256xf32>
    %66 = arith.maximumf %64, %65 : vector<2x256xf32>
    %67 = arith.truncf %66 : vector<2x256xf32> to vector<2x256xbf16>
    %c0_32 = arith.constant 0 : index
    %c0_33 = arith.constant 0 : index
    %68 = vector.load %arg9[%c0_32, %c0_33] : memref<256x9xbf16, #tpu.memory_space<vmem>>, vector<256x9xbf16>
    %cst_34 = arith.constant dense<0.000000e+00> : vector<2x9xf32>
    %69 = tpu.matmul %67, %68, %cst_34 {dimension_numbers = #tpu.dot_dimension_numbers<[1], [0], [0], [1], [0, 0, 1, 1], [], []>} : vector<2x256xbf16>, vector<256x9xbf16>, vector<2x9xf32> -> vector<2x9xf32>
    %c0_35 = arith.constant 0 : index
    %c0_36 = arith.constant 0 : index
    %70 = vector.load %arg10[%c0_35, %c0_36] : memref<1x9xf32, #tpu.memory_space<vmem>>, vector<1x9xf32>
    %71 = vector.broadcast %70 : vector<1x9xf32> to vector<2x9xf32>
    %72 = arith.addf %69, %71 : vector<2x9xf32>
    %c0_37 = arith.constant 0 : index
    %c0_38 = arith.constant 0 : index
    %73 = vector.load %arg11[%c0_37, %c0_38] : memref<2x9xf32, #tpu.memory_space<vmem>>, vector<2x9xf32>
    tpu.vector_store %arg11[%c0_37, %c0_38], %72 {strides = array<i32>} : memref<2x9xf32, #tpu.memory_space<vmem>>, vector<2x9xf32>,
    return
  }
}

</mosaic_0001>

<bundles_post_ra>
// kernel: tnet_forward.3
= control target key start
LH: loop header
LB: loop body
LE: loop exit
PB: predicated region body
PF: predicated region fallthrough
CT: control target
= control target key end

     0   :  { %14 = vsyncpa [#allocation3], 0  ;;  %s1042_s0 = inlined_call_operand.vmem [shape: bf16[32,3], index: 0, kind: input, shape index: {}]   ;;  %s1043_s1 = inlined_call_operand.vmem [shape: bf16[3,64], index: 1, kind: input, shape index: {}]   ;;  %s1044_s2 = inlined_call_operand.hbm [shape: f32[1,64], index: 2, kind: input, shape index: {}]   ;;  %s1045_s3 = inlined_call_operand.vmem [shape: f32[1,64], index: 3, kind: input, shape index: {}]   ;;  %s1046_s4 = inlined_call_operand.vmem [shape: f32[1,64], index: 4, kind: input, shape index: {}]   ;;  %s1047_s5 = inlined_call_operand.vmem [shape: bf16[64,128], index: 5, kind: input, shape index: {}]   ;;  %s1048_s6 = inlined_call_operand.hbm [shape: f32[1,128], index: 6, kind: input, shape index: {}]   ;;  %s1049_s7 = inlined_call_operand.vmem [shape: f32[2,1,128], index: 7, kind: output, shape index: {0}]   ;;  %s1050_s8 = inlined_call_operand.vmem [shape: f32[2,1,128], index: 8, kind: output, shape index: {1}]  }
   0x1   :  { %15 = vsyncpa [#allocation5], 0  ;;  %s935_s27 = smov 0   ;;  %s937_s28 = smov 0  }
   0x2   :  { %s939_s29 = smov 0  }
   0x3 LB: > { %s699_s30 = sadd.s32 4294967295, %s883_s29   ;;  %s40_s9 = sadd.s32 1, %s879_s28  ;;  %s883_s29 = sphi %s939_s29, %s21_s29   ;;  %s879_s28 = sphi %s937_s28, %s1058_s28   ;;  %s875_s27 = sphi %s935_s27, %s1057_s27  }
   0x4   : > { %p42_p0 = scmp.ge.s32.totalorder %s40_s9, 2  ;;  %p701_p1 = scmp.ge.s32.totalorder %s883_s29, 1 }
   0x5   : > { %p257_p2 = scmp.lt.s32.totalorder %s883_s29, 3  ;;  %p960_p4 = scmp.eq.s32.totalorder %s699_s30, 0 }
   0x6   : > { %s1060_s9 = smov (%p42_p0, %s40_s9), 0  ;;  %s885_s12 = smov [#allocation2]  }
   0x7   : > { %p956_p3 = pnand %p701_p1, %p257_p2  ;;  %s273_s13 = sshll.u32 %s885_s12, 4  ;;  %s274_s13 = int_to_ptr.vmem [resolvable:$true] %s273_s13 }
   0x8   : > { %s1054_s11 = scalar_select %p960_p4, 1, 0 }
   0x9   : > { %p756_p5 = pneg %p956_p3  ;;  %s886_s14 = smov [#allocation4]  }
   0xa   : > { %s293_s15 = sshll.u32 %s886_s14, 4  ;;  %s812_s17 = scalar_lea.vmem %s274_s13, 16  ;;  %s294_s15 = int_to_ptr.vmem [resolvable:$true] %s293_s15 }
   0xb   : > { %p968_p6 = pnand %p960_p4, %p756_p5  ;;  %p813_p8 = scmp.ne.s32.totalorder %s274_s13, %s812_s17 }
   0xc   : > { %s819_s18 = scalar_lea.vmem %s274_s13, 32  ;;  %p820_p11 = scmp.lt.s32.totalorder %s274_s13, %s274_s13 }
   0xd   : > { %p803_p7 = pneg %p968_p6  ;;  %p821_p12 = scmp.lt.s32.totalorder %s819_s18, %s812_s17 }
   0xf   : > { %p815_p9 = pnand %p813_p8, %p803_p7  ;;  %p822_p13 = por %p821_p12, %p820_p11 }
  0x11   : > { %p816_p10 = pneg %p815_p9 }
  0x13   : > { %p823_p0 = pnand %p822_p13, %p816_p10 }
  0x15   : > { %826 = shalt.err (!%p823_p0)
}
  0x16   : > { %759 = dma.hbm_to_vmem [thread:$0]  (!%p968_p6), %s1044_s2, 16, %s274_s13, [#allocation3]  }
  0x17   : > { %s838_s21 = scalar_lea.vmem %s294_s15, 16  ;;  %s845_s22 = scalar_lea.vmem %s294_s15, 32 }
  0x18   : > { %p839_p1 = scmp.ne.s32.totalorder %s294_s15, %s838_s21  ;;  %p846_p8 = scmp.lt.s32.totalorder %s294_s15, %s294_s15 }
  0x19   : > { %p847_p9 = scmp.lt.s32.totalorder %s845_s22, %s838_s21 }
  0x1a   : > { %p841_p2 = pnand %p839_p1, %p803_p7 }
  0x1b   : > { %p848_p4 = por %p847_p9, %p846_p8 }
  0x1c   : > { %p842_p5 = pneg %p841_p2 }
  0x1e   : > { %p849_p11 = pnand %p848_p4, %p842_p5 }
  0x20   : > { %852 = shalt.err (!%p849_p11)
}
  0x21   : > { %762 = dma.hbm_to_vmem [thread:$0]  (!%p968_p6), %s1048_s6, 16, %s294_s15, [#allocation5]  }
  0x22   : > { %319 = sbr.rel (%p956_p3) target bundleno = 474 (0x1da), region = 48  ;;  %p1056_p10 = scmp.ne.s32.totalorder (!%p956_p3), %s1054_s11, 0 }
  0x27   : > { %866 = dma.done.wait (%p1056_p10), [#allocation3], 16  }
  0x28   : > { %868 = vsyncadd (%p1056_p10), [#allocation3], 4294967280 }
  0x29   : > { %870 = dma.done.wait (%p1056_p10), [#allocation5], 16  }
  0x2a   : > { %872 = vsyncadd (%p1056_p10), [#allocation5], 4294967280  ;;  %vm402_vm0 = vcmask 1040384   ;;  %v887_v0 = vmov 0.0   ;;  %s708_s25 = sshll.u32 %s875_s27, 1  ;;  %vm403_vm1 = vcmask 1041408  }
  0x2b   : > { %730 = vmatprep.subr.bf16.mxu0 %v887_v0  ;;  %736 = vmatprep.subr.bf16.mxu1 %v887_v0  ;;  %v888_v1 = vmov 65535   ;;  %vm889_vm2 = vmmov 0   ;;  %p365_p3 = scmp.lt.s32.totalorder %s708_s25, 3  ;;  %v385_v4 = vld [vmem:[%s1043_s1] sm:$0x3]  ;;  %vm398_vm3 = vcmask 23552  }
  0x2c   : > { %v404_v2 = vsel %vm402_vm0, 4294967295, %v888_v1  ;;  %732 = vmatprep.mubr.msk.bf16.mxu0 %vm889_vm2, %v887_v0  ;;  %744 = vmatprep.mubr.msk.bf16.mxu1 %vm889_vm2, %v887_v0  ;;  %v797_v7 = vld [vmem:[%s1047_s5 + $0x18] sm:$0xff]   ;;  %v798_v8 = vld [vmem:[%s1047_s5 + $0x10] sm:$0xff]   ;;  %v799_v9 = vld [vmem:[%s1047_s5 + $0x8] sm:$0xff]   ;;  %vm510_vm4 = vcmask 523264   ;;  %p373_p4 = scmp.lt.s32.totalorder %s875_s27, 1 }
  0x2d   : > { %s1062_s25 = smov (!%p365_p3, %s708_s25), 3  ;;  %v405_v3 = vsel %vm403_vm1, %v404_v2, 0  ;;  %737 = vmatpush3.bf16.msra.mxu1 %v797_v7  ;;  %v800_v10 = vld [vmem:[%s1047_s5] sm:$0xff]  }
  0x2e   : > { %s709_s26 = sshll.u32 %s1062_s25, 2  ;;  %v407_v5 = vand.u32 %v405_v3, %v385_v4  ;;  %738 = vmatprep.subr.bf16.mxu1 %v887_v0  ;;  %v710_v11 = vld [vmem:[#allocation2] ss:$0 sm:$0xff]  ;;  %v715_v27 = vld [vmem:[#allocation4] ss:$0 sm:$0xff]  ;;  %s1064_s27 = smov (!%p373_p4, %s875_s27), 1 }
  0x2f   : > { %s368_s13 = scalar_lea.vmem %s1042_s0, %s709_s26  ;;  %v713_v13 = vld [vmem:[%s1045_s3] ss:$0 sm:$0xff]  ;;  %s375_s10 = scalar_lea.vmem %s1049_s7, %s1064_s27 }
  0x30   : > { %v796_v6 = vld [vmem:[%s368_s13] sm:$0xff]   ;;  %731 = vmatpush3.bf16.msra.mxu0 %v407_v5  ;;  %s380_s13 = scalar_lea.vmem %s1050_s8, %s1064_s27 }
  0x31   : > { %739 = vmatpush3.bf16.msra.mxu1 %v798_v8  ;;  %v714_v17 = vld [vmem:[%s1046_s4] ss:$0 sm:$0xff] }
  0x32   : > { %740 = vmatprep.subr.bf16.mxu1 %v887_v0 }
  0x33   : > { %733 = vmatmul.mubr.msk.bf16.vlgmr.msra.gmra.mxu0 %vm398_vm3, %v796_v6 }
  0x35   : > { %741 = vmatpush3.bf16.msra.mxu1 %v799_v9 }
  0x36   : > { %742 = vmatprep.subr.bf16.mxu1 %v887_v0 }
  0x39   : > { %743 = vmatpush3.bf16.msra.mxu1 %v800_v10 }
  0xf3   : > { %v443_v12 = vpop.f32.mrf.mxu0 }
  0xf4   : > { %v444_v14 = vadd.f32 %v710_v11, %v443_v12 }
  0xf5   : > { %v734_v15 = vpop.f32.mrf.mxu0 }
  0xf6   : > { %v457_v16 = vmul.f32 %v713_v13, %v444_v14 }
  0xf7   : > { %v446_v18 = vpop.f32.mrf.mxu0 }
  0xf8   : > { %v447_v19 = vadd.f32 %v710_v11, %v446_v18  ;;  %v466_v21 = vadd.f32 %v714_v17, %v457_v16 }
  0xf9   : > { %v735_v20 = vpop.f32.mrf.mxu0 }
  0xfa   : > { %v458_v22 = vmul.f32 %v713_v13, %v447_v19  ;;  %v468_v24 = vmax.f32 %v466_v21, 0.0 }
  0xfc   : > { %v467_v23 = vadd.f32 %v714_v17, %v458_v22 }
  0xfe   : > { %v469_v25 = vmax.f32 %v467_v23, 0.0 }
 0x100   : > { %v470_v26 = vpack.c.bf16 %v469_v25, %v468_v24 }
 0x102   : > { %745 = vmatmul.mubr.msk.bf16.vlgmr.msra.gmra.mxu1 %vm510_vm4, %v470_v26 }
 0x1c2   : > { %v548_v28 = vpop.f32.mrf.mxu1 }
 0x1c3   : > { %v549_v30 = vadd.f32 %v715_v27, %v548_v28 }
 0x1c4   : > { %v746_v29 = vpop.f32.mrf.mxu1 }
 0x1c5   : > { %v562_v34 = vmul.f32 %v549_v30, %v549_v30 }
 0x1c6   : > { %v551_v31 = vpop.f32.mrf.mxu1 }
 0x1c7   : > { %v552_v32 = vadd.f32 %v715_v27, %v551_v31 }
 0x1c8   : > { %v747_v33 = vpop.f32.mrf.mxu1 }
 0x1c9   : > { %v555_v35 = vadd.f32 %v552_v32, %v549_v30  ;;  %v563_v36 = vmul.f32 %v552_v32, %v552_v32 }
 0x1cb   : > { %v556_v37 = vrot.slane %v555_v35, 4  ;;  %v564_v38 = vadd.f32 %v563_v36, %v562_v34 }
 0x1cd   : > { %v557_v39 = vadd.f32 %v556_v37, %v555_v35  ;;  %v565_v40 = vrot.slane %v564_v38, 4 }
 0x1cf   : > { %v558_v41 = vrot.slane %v557_v39, 2  ;;  %v566_v42 = vadd.f32 %v565_v40, %v564_v38 }
 0x1d1   : > { %v559_v43 = vadd.f32 %v558_v41, %v557_v39  ;;  %v567_v44 = vrot.slane %v566_v42, 2 }
 0x1d3   : > { %v560_v45 = vrot.slane %v559_v43, 1  ;;  %v568_v46 = vadd.f32 %v567_v44, %v566_v42 }
 0x1d5   : > { %v561_v47 = vadd.f32 %v560_v45, %v559_v43  ;;  %v569_v48 = vrot.slane %v568_v46, 1 }
 0x1d7   : > { %v570_v49 = vadd.f32 %v569_v48, %v568_v46  ;;  %575 = vst [vmem:[%s375_s10] sm:$0x1] %v561_v47 }
 0x1d9   : > { %576 = vst [vmem:[%s380_s13] sm:$0x1] %v570_v49 }
 0x1da PF: > { %s21_s29 = sadd.s32 1, %s883_s29   ;;  %s1057_s27 = smov %s879_s28 }
 0x1db   : > { %p18_p6 = scmp.ge.s32.totalorder %s21_s29, 4   ;;  %s1058_s28 = smov %s1060_s9 }
 0x1dd   :  { %20 = sbr.rel (!%p18_p6) target bundleno = 3 (0x3), region = 107 }
 0x1e2   :  { %622 = vsyncpa [#allocation3], 1 }
 0x1e3   :  { %624 = vsyncpa [#allocation3 + $0x1], 1 }
 0x1e4   :  { %625 = vsyncpa [#allocation5], 1 }

// kernel: tnet_forward.4
= control target key start
LH: loop header
LB: loop body
LE: loop exit
PB: predicated region body
PF: predicated region fallthrough
CT: control target
= control target key end

     0   :  { %20 = vsyncpa [#allocation3], 0  ;;  %s3229_s0 = inlined_call_operand.vmem [shape: bf16[32,3], index: 0, kind: input, shape index: {}]   ;;  %s3230_s1 = inlined_call_operand.vmem [shape: bf16[3,64], index: 1, kind: input, shape index: {}]   ;;  %s3231_s2 = inlined_call_operand.hbm [shape: f32[1,64], index: 2, kind: input, shape index: {}]   ;;  %s3232_s3 = inlined_call_operand.vmem [shape: f32[1,64], index: 3, kind: input, shape index: {}]   ;;  %s3233_s4 = inlined_call_operand.vmem [shape: f32[1,64], index: 4, kind: input, shape index: {}]   ;;  %s3234_s5 = inlined_call_operand.vmem [shape: bf16[64,128], index: 5, kind: input, shape index: {}]   ;;  %s3235_s6 = inlined_call_operand.hbm [shape: f32[1,128], index: 6, kind: input, shape index: {}]   ;;  %s3236_s7 = inlined_call_operand.vmem [shape: f32[1,128], index: 7, kind: input, shape index: {}]   ;;  %s3237_s8 = inlined_call_operand.vmem [shape: f32[1,128], index: 8, kind: input, shape index: {}]   ;;  %s3238_s9 = inlined_call_operand.vmem [shape: bf16[128,1024], index: 9, kind: input, shape index: {}]   ;;  %s3239_s10 = inlined_call_operand.hbm [shape: f32[1,1024], index: 10, kind: input, shape index: {}]   ;;  %s3240_s11 = inlined_call_operand.vmem [shape: f32[2,1,1024], index: 11, kind: output, shape index: {0}]   ;;  %s3241_s12 = inlined_call_operand.vmem [shape: f32[2,1,1024], index: 12, kind: output, shape index: {1}]   ;;  %s3242_s13 = inlined_call_operand.vmem [shape: f32[2,1,1024], index: 13, kind: output, shape index: {2}]   ;;  %s3243_s14 = inlined_call_operand.vmem [shape: f32[2,1,1024], index: 14, kind: output, shape index: {3}]  }
   0x1   :  { %21 = vsyncpa [#allocation5], 0  ;;  %s2690_s29 = smov 0   ;;  %s2692_s30 = smov 0  }
   0x2   :  { %s2694_s15 = smov 0  }
   0x3 LB: > { %s2607_s16 = smov [#allocation4]   ;;  %s2311_s18 = sadd.s32 4294967295, %s2605_s15   ;;  %s2605_s15 = sphi %s2694_s15, %s27_s15   ;;  %s2601_s30 = sphi %s2692_s30, %s3249_s30   ;;  %s2597_s29 = sphi %s2690_s29, %s3248_s29  }
   0x4   : > { %s439_s17 = sshll.u32 %s2607_s16, 4  ;;  %p2313_p0 = scmp.ge.s32.totalorder %s2605_s15, 1  ;;  %s440_s17 = int_to_ptr.vmem [resolvable:$true] %s439_s17 }
   0x5   : > { %p403_p1 = scmp.lt.s32.totalorder %s2605_s15, 3  ;;  %p2708_p2 = scmp.eq.s32.totalorder %s2311_s18, 0 }
   0x6   : > { %s46_s21 = sadd.s32 1, %s2601_s30  ;;  %s2608_s24 = smov [#allocation2]  }
   0x7   : > { %p2712_p3 = pnand %p2313_p0, %p403_p1  ;;  %p2725_p6 = scmp.ge.s32.totalorder %s46_s21, 2 }
   0x8   : > { %s419_s25 = sshll.u32 %s2608_s24, 4  ;;  %s2508_s26 = scalar_lea.vmem %s440_s17, 16  ;;  %s420_s25 = int_to_ptr.vmem [resolvable:$true] %s419_s25 }
   0x9   : > { %p2444_p4 = pneg %p2712_p3  ;;  %p2509_p8 = scmp.ne.s32.totalorder %s440_s17, %s2508_s26 }
   0xa   : > { %s2515_s27 = scalar_lea.vmem %s440_s17, 32  ;;  %p2516_p11 = scmp.lt.s32.totalorder %s440_s17, %s440_s17 }
   0xb   : > { %p2721_p5 = pnand %p2708_p2, %p2444_p4  ;;  %p2517_p12 = scmp.lt.s32.totalorder %s2515_s27, %s2508_s26 }
   0xd   : > { %p2499_p7 = pneg %p2721_p5  ;;  %p2518_p13 = por %p2517_p12, %p2516_p11 }
   0xf   : > { %p2511_p9 = pnand %p2509_p8, %p2499_p7 }
  0x11   : > { %p2512_p10 = pneg %p2511_p9 }
  0x13   : > { %p2519_p0 = pnand %p2518_p13, %p2512_p10 }
  0x15   : > { %2522 = shalt.err (!%p2519_p0)
}
  0x16   : > { %2450 = dma.hbm_to_vmem [thread:$0]  (!%p2721_p5), %s3235_s6, 16, %s440_s17, [#allocation5]  }
  0x17   : > { %s3251_s21 = smov (%p2725_p6, %s46_s21), 0  ;;  %s2534_s18 = scalar_lea.vmem %s420_s25, 16 }
  0x18   : > { %p2535_p1 = scmp.ne.s32.totalorder %s420_s25, %s2534_s18  ;;  %s2541_s24 = scalar_lea.vmem %s420_s25, 32 }
  0x19   : > { %p2542_p9 = scmp.lt.s32.totalorder %s420_s25, %s420_s25  ;;  %p2543_p10 = scmp.lt.s32.totalorder %s2541_s24, %s2534_s18 }
  0x1a   : > { %p2537_p4 = pnand %p2535_p1, %p2499_p7 }
  0x1b   : > { %p2544_p11 = por %p2543_p10, %p2542_p9 }
  0x1c   : > { %p2538_p8 = pneg %p2537_p4 }
  0x1e   : > { %p2545_p12 = pnand %p2544_p11, %p2538_p8 }
  0x20   : > { %2548 = shalt.err (!%p2545_p12)
}
  0x21   : > { %2447 = dma.hbm_to_vmem [thread:$0]  (!%p2721_p5), %s3231_s2, 16, %s420_s25, [#allocation3]  }
  0x22   : > { %s2609_s17 = smov [#allocation6]  }
  0x23   : > { %s459_s23 = sshll.u32 %s2609_s17, 4  ;;  %s460_s23 = int_to_ptr.vmem [resolvable:$true] %s459_s23 }
  0x24   : > { %s2560_s28 = scalar_lea.vmem %s460_s23, 128  ;;  %p2568_p1 = scmp.lt.s32.totalorder %s460_s23, %s460_s23 }
  0x25   : > { %p2561_p6 = scmp.ne.s32.totalorder %s460_s23, %s2560_s28  ;;  %p2569_p4 = scmp.lt.s32.totalorder %s2560_s28, %s2560_s28 }
  0x27   : > { %p2563_p13 = pnand %p2561_p6, %p2499_p7  ;;  %p2570_p8 = por %p2569_p4, %p2568_p1 }
  0x29   : > { %p2564_p0 = pneg %p2563_p13 }
  0x2b   : > { %p2571_p9 = pnand %p2570_p8, %p2564_p0 }
  0x2d   : > { %2574 = shalt.err (!%p2571_p9)
}
  0x2e   : > { %2453 = dma.hbm_to_vmem [thread:$0]  (!%p2721_p5), %s3239_s10, 128, %s460_s23, [#allocation5]  }
  0x2f   : > { %485 = sbr.rel (%p2712_p3) target bundleno = 757 (0x2f5), region = 64 }
  0x34   : > { %2588 = dma.done.wait (%p2708_p2), [#allocation3], 16  }
  0x35   : > { %2590 = vsyncadd (%p2708_p2), [#allocation3], 4294967280 }
  0x36   : > { %2592 = dma.done.wait (%p2708_p2), [#allocation5], 144  }
  0x37   : > { %2594 = vsyncadd (%p2708_p2), [#allocation5], 4294967152  ;;  %vm610_vm0 = vcmask 1040384   ;;  %v2610_v0 = vmov 0.0   ;;  %s2322_s22 = sshll.u32 %s2597_s29, 1  ;;  %vm611_vm1 = vcmask 1041408  }
  0x38   : > { %2414 = vmatprep.subr.bf16.mxu0 %v2610_v0  ;;  %2420 = vmatprep.subr.bf16.mxu1 %v2610_v0  ;;  %v2611_v1 = vmov 65535   ;;  %vm2612_vm2 = vmmov 0   ;;  %p559_p3 = scmp.lt.s32.totalorder %s2322_s22, 3  ;;  %v593_v4 = vld [vmem:[%s3230_s1] sm:$0x3]  ;;  %vm606_vm3 = vcmask 23552  }
  0x39   : > { %v612_v2 = vsel %vm610_vm0, 4294967295, %v2611_v1  ;;  %2416 = vmatprep.mubr.msk.bf16.mxu0 %vm2612_vm2, %v2610_v0  ;;  %2428 = vmatprep.mubr.msk.bf16.mxu1 %vm2612_vm2, %v2610_v0  ;;  %v2493_v7 = vld [vmem:[%s3234_s5 + $0x18] sm:$0xff]   ;;  %v2494_v8 = vld [vmem:[%s3234_s5 + $0x10] sm:$0xff]   ;;  %v2495_v9 = vld [vmem:[%s3234_s5 + $0x8] sm:$0xff]   ;;  %vm718_vm4 = vcmask 523264   ;;  %p567_p2 = scmp.lt.s32.totalorder %s2597_s29, 1 }
  0x3a   : > { %s3253_s22 = smov (!%p559_p3, %s2322_s22), 3  ;;  %v613_v3 = vsel %vm611_vm1, %v612_v2, 0  ;;  %2421 = vmatpush3.bf16.msra.mxu1 %v2493_v7  ;;  %v2496_v10 = vld [vmem:[%s3234_s5] sm:$0xff]   ;;  %v841_v13 = vld [vmem:[%s3238_s9 + $0x1c8] sm:$0xff] }
  0x3b   : > { %s2323_s20 = sshll.u32 %s3253_s22, 2  ;;  %v615_v5 = vand.u32 %v613_v3, %v593_v4  ;;  %2422 = vmatprep.subr.bf16.mxu1 %v2610_v0  ;;  %v840_v11 = vld [vmem:[%s3238_s9 + $0x1c0] sm:$0xff]  ;;  %v845_v16 = vld [vmem:[%s3238_s9 + $0x1e8] sm:$0xff]  ;;  %s3255_s29 = smov (!%p567_p2, %s2597_s29), 1 }
  0x3c   : > { %s562_s27 = scalar_lea.vmem %s3229_s0, %s2323_s20  ;;  %v844_v12 = vld [vmem:[%s3238_s9 + $0x1e0] sm:$0xff]  ;;  %v2399_v19 = vcombine.low %v841_v13, %v845_v16  ;;  %v2400_v20 = vcombine.high %v841_v13, %v845_v16  ;;  %v833_v48 = vld [vmem:[%s3238_s9 + $0x188] sm:$0xff]  ;;  %s2324_s17 = sshll.u32 %s3255_s29, 3 }
  0x3d   : > { %v2492_v6 = vld [vmem:[%s562_s27] sm:$0xff]   ;;  %2415 = vmatpush3.bf16.msra.mxu0 %v615_v5  ;;  %v2397_v14 = vcombine.low %v840_v11, %v844_v12  ;;  %v2398_v15 = vcombine.high %v840_v11, %v844_v12  ;;  %v837_v49 = vld [vmem:[%s3238_s9 + $0x1a8] sm:$0xff]  ;;  %s570_s28 = scalar_lea.vmem %s3240_s11, %s2324_s17  ;;  %s582_s22 = scalar_lea.vmem %s3242_s13, %s2324_s17 }
  0x3e   : > { %2423 = vmatpush3.bf16.msra.mxu1 %v2494_v8  ;;  %v832_v17 = vld [vmem:[%s3238_s9 + $0x180] sm:$0xff]  ;;  %v2392_v53 = vcombine.high %v833_v48, %v837_v49  ;;  %v825_v54 = vld [vmem:[%s3238_s9 + $0x148] sm:$0xff]  ;;  %v2391_v56 = vcombine.low %v833_v48, %v837_v49  ;;  %v834_v49 = vld [vmem:[%s3238_s9 + $0x190] sm:$0xff]  ;;  %s576_s24 = scalar_lea.vmem %s3241_s12, %s2324_s17  ;;  %s588_s27 = scalar_lea.vmem %s3243_s14, %s2324_s17 }
  0x3f   : > { %2424 = vmatprep.subr.bf16.mxu1 %v2610_v0  ;;  %v836_v18 = vld [vmem:[%s3238_s9 + $0x1a0] sm:$0xff]  ;;  %1210 = vmatprep.subr.bf16.mxu0 %v2398_v15  ;;  %v829_v55 = vld [vmem:[%s3238_s9 + $0x168] sm:$0xff] }
  0x40   : > { %2417 = vmatmul.mubr.msk.bf16.vlgmr.msra.gmra.mxu0 %vm606_vm3, %v2492_v6  ;;  %v2390_v21 = vcombine.high %v832_v17, %v836_v18  ;;  %v2389_v22 = vcombine.low %v832_v17, %v836_v18  ;;  %v824_v23 = vld [vmem:[%s3238_s9 + $0x140] sm:$0xff]  ;;  %v2384_v57 = vcombine.high %v825_v54, %v829_v55  ;;  %v817_v58 = vld [vmem:[%s3238_s9 + $0x108] sm:$0xff]  ;;  %v2383_v60 = vcombine.low %v825_v54, %v829_v55 }
  0x41   : > { %1211 = vmatpush1.bf16.msra.mxu0 %v2397_v14  ;;  %v828_v24 = vld [vmem:[%s3238_s9 + $0x160] sm:$0xff]  ;;  %v821_v59 = vld [vmem:[%s3238_s9 + $0x128] sm:$0xff] }
  0x42   : > { %2425 = vmatpush3.bf16.msra.mxu1 %v2495_v9  ;;  %1212 = vmatprep.subr.bf16.mxu0 %v2390_v21  ;;  %v2382_v25 = vcombine.high %v824_v23, %v828_v24  ;;  %v2381_v26 = vcombine.low %v824_v23, %v828_v24  ;;  %v816_v27 = vld [vmem:[%s3238_s9 + $0x100] sm:$0xff]  ;;  %v2376_v61 = vcombine.high %v817_v58, %v821_v59  ;;  %v809_v62 = vld [vmem:[%s3238_s9 + $0xc8] sm:$0xff] }
  0x43   : > { %2426 = vmatprep.subr.bf16.mxu1 %v2610_v0  ;;  %v820_v28 = vld [vmem:[%s3238_s9 + $0x120] sm:$0xff]  ;;  %v813_v63 = vld [vmem:[%s3238_s9 + $0xe8] sm:$0xff]  ;;  %v2375_v0 = vcombine.low %v817_v58, %v821_v59  ;;  %v826_v58 = vld [vmem:[%s3238_s9 + $0x150] sm:$0xff] }
  0x44   : > { %v2374_v29 = vcombine.high %v816_v27, %v820_v28  ;;  %v2373_v30 = vcombine.low %v816_v27, %v820_v28  ;;  %v808_v31 = vld [vmem:[%s3238_s9 + $0xc0] sm:$0xff]  ;;  %v2368_v1 = vcombine.high %v809_v62, %v813_v63  ;;  %v2367_v2 = vcombine.low %v809_v62, %v813_v63  ;;  %v801_v5 = vld [vmem:[%s3238_s9 + $0x88] sm:$0xff]  ;;  %v842_v27 = vld [vmem:[%s3238_s9 + $0x1d0] sm:$0xff] }
  0x45   : > { %1213 = vmatpush1.bf16.msra.mxu0 %v2389_v22  ;;  %v812_v32 = vld [vmem:[%s3238_s9 + $0xe0] sm:$0xff]  ;;  %v805_v7 = vld [vmem:[%s3238_s9 + $0xa8] sm:$0xff]  ;;  %v846_v28 = vld [vmem:[%s3238_s9 + $0x1f0] sm:$0xff] }
  0x46   : > { %2427 = vmatpush3.bf16.msra.mxu1 %v2496_v10  ;;  %1214 = vmatprep.subr.bf16.mxu0 %v2382_v25  ;;  %v2366_v33 = vcombine.high %v808_v31, %v812_v32  ;;  %v2365_v34 = vcombine.low %v808_v31, %v812_v32  ;;  %v2328_v35 = vld [vmem:[#allocation2] ss:$0 sm:$0xff]  ;;  %v2359_v9 = vcombine.low %v801_v5, %v805_v7  ;;  %v793_v14 = vld [vmem:[%s3238_s9 + $0x48] sm:$0xff]  ;;  %v847_v31 = vld [vmem:[%s3238_s9 + $0x1f8] sm:$0xff] }
  0x47   : > { %1253 = vmatprep.subr.bf16.mxu1 %v2400_v20  ;;  %v2331_v37 = vld [vmem:[%s3232_s3] ss:$0 sm:$0xff]  ;;  %v2360_v10 = vcombine.high %v801_v5, %v805_v7  ;;  %v797_v15 = vld [vmem:[%s3238_s9 + $0x68] sm:$0xff]  ;;  %v2401_v32 = vcombine.low %v842_v27, %v846_v28  ;;  %v830_v59 = vld [vmem:[%s3238_s9 + $0x170] sm:$0xff] }
  0x48   : > { %v2332_v41 = vld [vmem:[%s3233_s4] ss:$0 sm:$0xff]  ;;  %v2351_v17 = vcombine.low %v793_v14, %v797_v15  ;;  %v2352_v18 = vcombine.high %v793_v14, %v797_v15  ;;  %v785_v21 = vld [vmem:[%s3238_s9 + $0x8] sm:$0xff]  ;;  %v823_v5 = vld [vmem:[%s3238_s9 + $0x138] sm:$0xff] }
  0x49   : > { %1215 = vmatpush1.bf16.msra.mxu0 %v2381_v26  ;;  %v800_v3 = vld [vmem:[%s3238_s9 + $0x80] sm:$0xff]  ;;  %v789_v23 = vld [vmem:[%s3238_s9 + $0x28] sm:$0xff] }
  0x4a   : > { %1216 = vmatprep.subr.bf16.mxu0 %v2374_v29  ;;  %v804_v4 = vld [vmem:[%s3238_s9 + $0xa0] sm:$0xff]  ;;  %v2343_v25 = vcombine.low %v785_v21, %v789_v23  ;;  %v2344_v26 = vcombine.high %v785_v21, %v789_v23  ;;  %v843_v29 = vld [vmem:[%s3238_s9 + $0x1d8] sm:$0xff] }
  0x4b   : > { %v2358_v6 = vcombine.high %v800_v3, %v804_v4  ;;  %v2357_v8 = vcombine.low %v800_v3, %v804_v4  ;;  %v792_v11 = vld [vmem:[%s3238_s9 + $0x40] sm:$0xff]  ;;  %v822_v3 = vld [vmem:[%s3238_s9 + $0x130] sm:$0xff]  ;;  %v819_v4 = vld [vmem:[%s3238_s9 + $0x118] sm:$0xff] }
  0x4c   : > { %v796_v12 = vld [vmem:[%s3238_s9 + $0x60] sm:$0xff]  ;;  %v2379_v15 = vcombine.low %v819_v4, %v823_v5  ;;  %v807_v21 = vld [vmem:[%s3238_s9 + $0xb8] sm:$0xff] }
  0x4d   : > { %1217 = vmatpush1.bf16.msra.mxu0 %v2373_v30  ;;  %v2350_v13 = vcombine.high %v792_v11, %v796_v12  ;;  %v2349_v16 = vcombine.low %v792_v11, %v796_v12  ;;  %v788_v20 = vld [vmem:[%s3238_s9 + $0x20] sm:$0xff]  ;;  %v2402_v30 = vcombine.high %v842_v27, %v846_v28  ;;  %v814_v11 = vld [vmem:[%s3238_s9 + $0xf0] sm:$0xff]  ;;  %v811_v12 = vld [vmem:[%s3238_s9 + $0xd8] sm:$0xff] }
  0x4e   : > { %1218 = vmatprep.subr.bf16.mxu0 %v2366_v33  ;;  %v2403_v33 = vcombine.low %v843_v29, %v847_v31  ;;  %v798_v27 = vld [vmem:[%s3238_s9 + $0x70] sm:$0xff]  ;;  %v795_v28 = vld [vmem:[%s3238_s9 + $0x58] sm:$0xff] }
  0x51   : > { %1219 = vmatpush1.bf16.msra.mxu0 %v2365_v34  ;;  %v2404_v34 = vcombine.high %v843_v29, %v847_v31  ;;  %v799_v29 = vld [vmem:[%s3238_s9 + $0x78] sm:$0xff] }
  0x52   : > { %1220 = vmatprep.subr.bf16.mxu0 %v2358_v6  ;;  %v2385_v6 = vcombine.low %v826_v58, %v830_v59 }
  0x55   : > { %1221 = vmatpush1.bf16.msra.mxu0 %v2357_v8 }
  0x56   : > { %1222 = vmatprep.subr.bf16.mxu0 %v2350_v13  ;;  %v815_v13 = vld [vmem:[%s3238_s9 + $0xf8] sm:$0xff] }
  0x57   : > { %v2371_v23 = vcombine.low %v811_v12, %v815_v13 }
  0x59   : > { %1223 = vmatpush1.bf16.msra.mxu0 %v2349_v16 }
 0x100   : > { %v651_v36 = vpop.f32.mrf.mxu0 }
 0x101   : > { %v652_v38 = vadd.f32 %v2328_v35, %v651_v36  ;;  %v2333_v36 = vld [vmem:[#allocation4] ss:$0 sm:$0xff] }
 0x102   : > { %v2418_v39 = vpop.f32.mrf.mxu0 }
 0x103   : > { %v665_v40 = vmul.f32 %v2331_v37, %v652_v38  ;;  %v2339_v38 = vld [vmem:[%s3236_s7] ss:$0 sm:$0xff] }
 0x104   : > { %v654_v42 = vpop.f32.mrf.mxu0 }
 0x105   : > { %v655_v43 = vadd.f32 %v2328_v35, %v654_v42  ;;  %v674_v45 = vadd.f32 %v2332_v41, %v665_v40  ;;  %v2613_v35 = vmov 0   ;;  %v2340_v42 = vld [vmem:[%s3237_s8] ss:$0 sm:$0xff] }
 0x106   : > { %v2419_v44 = vpop.f32.mrf.mxu0  ;;  %1242 = vmatprep.mubr.bf16.mxu0 %v2613_v35 }
 0x107   : > { %v666_v46 = vmul.f32 %v2331_v37, %v655_v43  ;;  %v676_v50 = vmax.f32 %v674_v45, 0.0 }
 0x109   : > { %v675_v47 = vadd.f32 %v2332_v41, %v666_v46 }
 0x10b   : > { %v677_v51 = vmax.f32 %v675_v47, 0.0 }
 0x10d   : > { %v678_v52 = vpack.c.bf16 %v677_v51, %v676_v50  ;;  %v838_v50 = vld [vmem:[%s3238_s9 + $0x1b0] sm:$0xff]  ;;  %v835_v51 = vld [vmem:[%s3238_s9 + $0x198] sm:$0xff] }
 0x10e   : > { %v2393_v62 = vcombine.low %v834_v49, %v838_v50 }
 0x10f   : > { %2429 = vmatmul.mubr.msk.bf16.vlgmr.msra.gmra.mxu1 %vm718_vm4, %v678_v52  ;;  %v839_v52 = vld [vmem:[%s3238_s9 + $0x1b8] sm:$0xff] }
 0x110   : > { %1254 = vmatpush1.bf16.msra.mxu1 %v2399_v19  ;;  %v784_v19 = vld [vmem:[%s3238_s9] sm:$0xff]  ;;  %1285 = vmatprep.mubr.bf16.mxu1 %v2613_v35  ;;  %v2395_v63 = vcombine.low %v835_v51, %v839_v52 }
 0x111   : > { %1255 = vmatprep.subr.bf16.mxu1 %v2392_v53  ;;  %v2342_v22 = vcombine.high %v784_v19, %v788_v20  ;;  %v2341_v24 = vcombine.low %v784_v19, %v788_v20  ;;  %v806_v19 = vld [vmem:[%s3238_s9 + $0xb0] sm:$0xff]  ;;  %v803_v20 = vld [vmem:[%s3238_s9 + $0x98] sm:$0xff] }
 0x112   : > { %v2363_v31 = vcombine.low %v803_v20, %v807_v21 }
 0x113   : > { %1224 = vmatprep.subr.bf16.mxu0 %v2342_v22 }
 0x114   : > { %1256 = vmatpush1.bf16.msra.mxu1 %v2391_v56  ;;  %1225 = vmatpush1.bf16.msra.mxu0 %v2341_v24  ;;  %v2394_v56 = vcombine.high %v834_v49, %v838_v50 }
 0x115   : > { %1257 = vmatprep.subr.bf16.mxu1 %v2384_v57  ;;  %1296 = vmatprep.subr.bf16.mxu0 %v2402_v30  ;;  %v2396_v57 = vcombine.high %v835_v51, %v839_v52 }
 0x118   : > { %1258 = vmatpush1.bf16.msra.mxu1 %v2383_v60  ;;  %v827_v60 = vld [vmem:[%s3238_s9 + $0x158] sm:$0xff] }
 0x119   : > { %1259 = vmatprep.subr.bf16.mxu1 %v2376_v61  ;;  %v831_v61 = vld [vmem:[%s3238_s9 + $0x178] sm:$0xff] }
 0x11a   : > { %v2387_v7 = vcombine.low %v827_v60, %v831_v61 }
 0x11c   : > { %1260 = vmatpush1.bf16.msra.mxu1 %v2375_v0  ;;  %v2386_v0 = vcombine.high %v826_v58, %v830_v59 }
 0x11d   : > { %1261 = vmatprep.subr.bf16.mxu1 %v2368_v1  ;;  %v2388_v1 = vcombine.high %v827_v60, %v831_v61 }
 0x120   : > { %1262 = vmatpush1.bf16.msra.mxu1 %v2367_v2  ;;  %v818_v2 = vld [vmem:[%s3238_s9 + $0x110] sm:$0xff] }
 0x121   : > { %1263 = vmatprep.subr.bf16.mxu1 %v2360_v10  ;;  %v2378_v8 = vcombine.high %v818_v2, %v822_v3  ;;  %v810_v10 = vld [vmem:[%s3238_s9 + $0xd0] sm:$0xff]  ;;  %v2377_v14 = vcombine.low %v818_v2, %v822_v3 }
 0x122   : > { %v2370_v16 = vcombine.high %v810_v10, %v814_v11  ;;  %v2369_v22 = vcombine.low %v810_v10, %v814_v11 }
 0x124   : > { %1264 = vmatpush1.bf16.msra.mxu1 %v2359_v9  ;;  %v2380_v9 = vcombine.high %v819_v4, %v823_v5 }
 0x125   : > { %1265 = vmatprep.subr.bf16.mxu1 %v2352_v18  ;;  %v802_v18 = vld [vmem:[%s3238_s9 + $0x90] sm:$0xff] }
 0x126   : > { %v2362_v24 = vcombine.high %v802_v18, %v806_v19  ;;  %v2361_v30 = vcombine.low %v802_v18, %v806_v19 }
 0x128   : > { %1266 = vmatpush1.bf16.msra.mxu1 %v2351_v17  ;;  %v2372_v17 = vcombine.high %v811_v12, %v815_v13 }
 0x129   : > { %1267 = vmatprep.subr.bf16.mxu1 %v2344_v26  ;;  %v794_v26 = vld [vmem:[%s3238_s9 + $0x50] sm:$0xff] }
 0x12c   : > { %1268 = vmatpush1.bf16.msra.mxu1 %v2343_v25  ;;  %v2364_v25 = vcombine.high %v803_v20, %v807_v21 }
 0x12d   : > { %1339 = vmatprep.subr.bf16.mxu1 %v2404_v34  ;;  %v786_v34 = vld [vmem:[%s3238_s9 + $0x10] sm:$0xff] }
 0x1cf   : > { %v756_v37 = vpop.f32.mrf.mxu1 }
 0x1d0   : > { %v757_v39 = vadd.f32 %v2333_v36, %v756_v37  ;;  %v791_v37 = vld [vmem:[%s3238_s9 + $0x38] sm:$0xff] }
 0x1d1   : > { %v2430_v40 = vpop.f32.mrf.mxu1 }
 0x1d2   : > { %v770_v41 = vmul.f32 %v2339_v38, %v757_v39  ;;  %v2355_v39 = vcombine.low %v795_v28, %v799_v29 }
 0x1d3   : > { %v759_v43 = vpop.f32.mrf.mxu1 }
 0x1d4   : > { %v760_v44 = vadd.f32 %v2333_v36, %v759_v43  ;;  %v779_v46 = vadd.f32 %v2340_v42, %v770_v41  ;;  %v787_v36 = vld [vmem:[%s3238_s9 + $0x18] sm:$0xff] }
 0x1d5   : > { %v2431_v45 = vpop.f32.mrf.mxu1  ;;  %v2348_v41 = vcombine.high %v787_v36, %v791_v37  ;;  %v2347_v43 = vcombine.low %v787_v36, %v791_v37 }
 0x1d6   : > { %v771_v47 = vmul.f32 %v2339_v38, %v760_v44  ;;  %v781_v53 = vmax.f32 %v779_v46, 0.0  ;;  %v2353_v38 = vcombine.low %v794_v26, %v798_v27  ;;  %v850_v44 = vlaneseq }
 0x1d8   : > { %v780_v48 = vadd.f32 %v2340_v42, %v771_v47  ;;  %v2998_v45 = vshrl.u32 %v850_v44, 7 }
 0x1da   : > { %v782_v54 = vmax.f32 %v780_v48, 0.0  ;;  %v852_v46 = vsub.s32 0, %v2998_v45  ;;  %v860_v47 = vsub.s32 2, %v2998_v45  ;;  %v3002_v48 = vld [vmem:[#allocation6] sm:$0xff]  ;;  %v856_v51 = vsub.s32 1, %v2998_v45 }
 0x1db   : > { %v864_v52 = vsub.s32 3, %v2998_v45  ;;  %v868_v2 = vsub.s32 4, %v2998_v45  ;;  %v876_v3 = vsub.s32 6, %v2998_v45 }
 0x1dc   : > { %v2920_v55 = vpack.c.bf16 %v782_v54, %v781_v53  ;;  %v853_v49 = vrot.slane %v3002_v48, %v852_v46  ;;  %v861_v50 = vrot.slane %v3002_v48, %v860_v47  ;;  %v2614_v54 = vmov 1966171168  }
 0x1dd   : > { %v3009_v59 = vrot.slane %v3002_v48, %v856_v51  ;;  %v3012_v61 = vrot.slane %v3002_v48, %v864_v52 }
 0x1de   : > { %1243 = vmatmul.mubr.bf16.vlgmr.msra.gmra.mxu0 %v2920_v55  ;;  %1286 = vmatmul.mubr.bf16.vlgmr.msra.gmra.mxu1 %v2920_v55 }
 0x1df   : > { %1297 = vmatpush1.bf16.msra.mxu0 %v2401_v32  ;;  %1340 = vmatpush1.bf16.msra.mxu1 %v2403_v33  ;;  %v2354_v32 = vcombine.high %v794_v26, %v798_v27  ;;  %v2356_v33 = vcombine.high %v795_v28, %v799_v29 }
 0x1e0   : > { %1298 = vmatprep.subr.bf16.mxu0 %v2394_v56  ;;  %1341 = vmatprep.subr.bf16.mxu1 %v2396_v57 }
 0x1e1   : > { %1328 = vmatprep.mubr.bf16.mxu0 %v2613_v35  ;;  %1371 = vmatprep.mubr.bf16.mxu1 %v2613_v35  ;;  %v790_v35 = vld [vmem:[%s3238_s9 + $0x30] sm:$0xff] }
 0x1e2   : > { %v2346_v40 = vcombine.high %v786_v34, %v790_v35  ;;  %v2345_v42 = vcombine.low %v786_v34, %v790_v35 }
 0x1e3   : > { %1299 = vmatpush1.bf16.msra.mxu0 %v2393_v62  ;;  %1342 = vmatpush1.bf16.msra.mxu1 %v2395_v63 }
 0x1e4   : > { %1300 = vmatprep.subr.bf16.mxu0 %v2386_v0  ;;  %1343 = vmatprep.subr.bf16.mxu1 %v2388_v1 }
 0x1e7   : > { %1301 = vmatpush1.bf16.msra.mxu0 %v2385_v6  ;;  %1344 = vmatpush1.bf16.msra.mxu1 %v2387_v7  ;;  %v872_v6 = vsub.s32 5, %v2998_v45  ;;  %v880_v7 = vsub.s32 7, %v2998_v45 }
 0x1e8   : > { %1302 = vmatprep.subr.bf16.mxu0 %v2378_v8  ;;  %1345 = vmatprep.subr.bf16.mxu1 %v2380_v9 }
 0x1eb   : > { %1303 = vmatpush1.bf16.msra.mxu0 %v2377_v14  ;;  %1346 = vmatpush1.bf16.msra.mxu1 %v2379_v15 }
 0x1ec   : > { %1304 = vmatprep.subr.bf16.mxu0 %v2370_v16  ;;  %1347 = vmatprep.subr.bf16.mxu1 %v2372_v17 }
 0x1ef   : > { %1305 = vmatpush1.bf16.msra.mxu0 %v2369_v22  ;;  %1348 = vmatpush1.bf16.msra.mxu1 %v2371_v23 }
 0x1f0   : > { %1306 = vmatprep.subr.bf16.mxu0 %v2362_v24  ;;  %1349 = vmatprep.subr.bf16.mxu1 %v2364_v25 }
 0x1f3   : > { %1307 = vmatpush1.bf16.msra.mxu0 %v2361_v30  ;;  %1350 = vmatpush1.bf16.msra.mxu1 %v2363_v31 }
 0x1f4   : > { %1308 = vmatprep.subr.bf16.mxu0 %v2354_v32  ;;  %1351 = vmatprep.subr.bf16.mxu1 %v2356_v33 }
 0x1f7   : > { %1309 = vmatpush1.bf16.msra.mxu0 %v2353_v38  ;;  %1352 = vmatpush1.bf16.msra.mxu1 %v2355_v39 }
 0x1f8   : > { %1310 = vmatprep.subr.bf16.mxu0 %v2346_v40  ;;  %1353 = vmatprep.subr.bf16.mxu1 %v2348_v41 }
 0x1fb   : > { %1311 = vmatpush1.bf16.msra.mxu0 %v2345_v42  ;;  %1354 = vmatpush1.bf16.msra.mxu1 %v2347_v43 }
 0x1fe   : > { %1329 = vmatmul.mubr.bf16.vlgmr.msra.gmra.mxu0 %v2920_v55  ;;  %1372 = vmatmul.mubr.bf16.vlgmr.msra.gmra.mxu1 %v2920_v55  ;;  %v1639_v55 = vunpack.c.l.s4 %v2614_v54 }
 0x200   : > { %v1640_v63 = vunpack.c.0.s8 %v1639_v55 }
 0x202   : > { %v3029_v54 = vsub.s32 %v1640_v63, %v2998_v45  ;;  %v3045_v45 = vrot.slane %v3002_v48, %v880_v7 }
 0x29e   : > { %v1244_v53 = vpop.f32.mrf.mxu0  ;;  %v1287_v56 = vpop.f32.mrf.mxu1 }
 0x29f   : > { %v1245_v57 = vadd.f32 %v1244_v53, %v853_v49  ;;  %v1288_v58 = vadd.f32 %v1287_v56, %v861_v50 }
 0x2a0   : > { %v1246_v60 = vpop.f32.mrf.mxu0  ;;  %v1289_v62 = vpop.f32.mrf.mxu1 }
 0x2a1   : > { %v1438_v8 = vmul.f32 %v1245_v57, %v1245_v57  ;;  %v1440_v9 = vmul.f32 %v1288_v58, %v1288_v58  ;;  %v3019_v10 = vadd.f32 %v1246_v60, %v3009_v59  ;;  %v3022_v11 = vadd.f32 %v1289_v62, %v3012_v61 }
 0x2a2   : > { %v1248_v0 = vpop.f32.mrf.mxu0  ;;  %v1291_v1 = vpop.f32.mrf.mxu1 }
 0x2a3   : > { %v1249_v4 = vadd.f32 %v1248_v0, %v853_v49  ;;  %v1292_v5 = vadd.f32 %v1291_v1, %v861_v50  ;;  %v1439_v63 = vmul.f32 %v3019_v10, %v3019_v10 }
 0x2a4   : > { %v1250_v0 = vpop.f32.mrf.mxu0  ;;  %v1293_v1 = vpop.f32.mrf.mxu1 }
 0x2a5   : > { %v1382_v12 = vadd.f32 %v1249_v4, %v1245_v57  ;;  %v1446_v13 = vmul.f32 %v1249_v4, %v1249_v4  ;;  %v1510_v14 = vmax.f32 %v1245_v57, %v1249_v4  ;;  %v1566_v15 = vmin.f32 %v1245_v57, %v1249_v4 }
 0x2a6   : > { %v1396_v16 = vadd.f32 %v1292_v5, %v1288_v58  ;;  %v1448_v17 = vmul.f32 %v1292_v5, %v1292_v5  ;;  %v1524_v18 = vmax.f32 %v1288_v58, %v1292_v5  ;;  %v1580_v19 = vmin.f32 %v1288_v58, %v1292_v5 }
 0x2a7   : > { %v1383_v20 = vrot.slane %v1382_v12, 4  ;;  %v1454_v21 = vadd.f32 %v1446_v13, %v1438_v8  ;;  %v1511_v22 = vrot.slane %v1510_v14, 4  ;;  %v1567_v23 = vrot.slane %v1566_v15, 4 }
 0x2a8   : > { %v1397_v24 = vrot.slane %v1396_v16, 4  ;;  %v1468_v25 = vadd.f32 %v1448_v17, %v1440_v9  ;;  %v1525_v26 = vrot.slane %v1524_v18, 4  ;;  %v1581_v27 = vrot.slane %v1580_v19, 4 }
 0x2a9   : > { %v1384_v28 = vadd.f32 %v1383_v20, %v1382_v12  ;;  %v1455_v29 = vrot.slane %v1454_v21, 4  ;;  %v1512_v30 = vmax.f32 %v1510_v14, %v1511_v22  ;;  %v1568_v31 = vmin.f32 %v1566_v15, %v1567_v23 }
 0x2aa   : > { %v1398_v32 = vadd.f32 %v1397_v24, %v1396_v16  ;;  %v1469_v33 = vrot.slane %v1468_v25, 4  ;;  %v1526_v34 = vmax.f32 %v1524_v18, %v1525_v26  ;;  %v1582_v35 = vmin.f32 %v1580_v19, %v1581_v27 }
 0x2ab   : > { %v1385_v36 = vrot.slane %v1384_v28, 2  ;;  %v1456_v37 = vadd.f32 %v1455_v29, %v1454_v21  ;;  %v1513_v38 = vrot.slane %v1512_v30, 2  ;;  %v1569_v39 = vrot.slane %v1568_v31, 2 }
 0x2ac   : > { %v1399_v40 = vrot.slane %v1398_v32, 2  ;;  %v1470_v41 = vadd.f32 %v1469_v33, %v1468_v25  ;;  %v1527_v42 = vrot.slane %v1526_v34, 2  ;;  %v1583_v43 = vrot.slane %v1582_v35, 2 }
 0x2ad   : > { %v1386_v44 = vadd.f32 %v1385_v36, %v1384_v28  ;;  %v1457_v46 = vrot.slane %v1456_v37, 2  ;;  %v1514_v47 = vmax.f32 %v1512_v30, %v1513_v38  ;;  %v1570_v49 = vmin.f32 %v1568_v31, %v1569_v39 }
 0x2ae   : > { %v1400_v50 = vadd.f32 %v1399_v40, %v1398_v32  ;;  %v1471_v51 = vrot.slane %v1470_v41, 2  ;;  %v3024_v52 = vmax.f32 %v1526_v34, %v1527_v42  ;;  %v3026_v53 = vmin.f32 %v1582_v35, %v1583_v43 }
 0x2af   : > { %v1387_v55 = vrot.slane %v1386_v44, 1  ;;  %v3031_v56 = vadd.f32 %v1457_v46, %v1456_v37  ;;  %v1515_v57 = vrot.slane %v1514_v47, 1  ;;  %v1571_v58 = vrot.slane %v1570_v49, 1 }
 0x2b0   : > { %v1401_v60 = vrot.slane %v1400_v50, 1  ;;  %v3033_v62 = vadd.f32 %v1471_v51, %v1470_v41  ;;  %v3036_v4 = vrot.slane %v3002_v48, %v868_v2  ;;  %v3039_v5 = vrot.slane %v3002_v48, %v876_v3 }
 0x2b1   : > { %v3042_v8 = vrot.slane %v3002_v48, %v872_v6  ;;  %v1441_v9 = vmul.f32 %v3022_v11, %v3022_v11  ;;  %v1529_v12 = vrot.slane %v3024_v52, 1  ;;  %v1585_v2 = vrot.slane %v3026_v53, 1 }
 0x2b2   : > { %v3053_v13 = vadd.f32 %v1387_v55, %v1386_v44  ;;  %v1459_v3 = vrot.slane %v3031_v56, 1  ;;  %v1251_v6 = vadd.f32 %v1250_v0, %v3009_v59  ;;  %v1294_v14 = vadd.f32 %v1293_v1, %v3012_v61 }
 0x2b3   : > { %v3058_v48 = vmax.f32 %v1514_v47, %v1515_v57  ;;  %v3060_v7 = vmin.f32 %v1570_v49, %v1571_v58  ;;  %v3062_v15 = vadd.f32 %v1401_v60, %v1400_v50  ;;  %v1473_v16 = vrot.slane %v3033_v62, 1 }
 0x2b4   : > { %v1389_v17 = vadd.f32 %v1251_v6, %v3019_v10  ;;  %v1447_v18 = vmul.f32 %v1251_v6, %v1251_v6  ;;  %v1517_v19 = vmax.f32 %v3019_v10, %v1251_v6  ;;  %v1573_v20 = vmin.f32 %v3019_v10, %v1251_v6 }
 0x2b5   : > { %v1403_v21 = vadd.f32 %v1294_v14, %v3022_v11  ;;  %v1449_v59 = vmul.f32 %v1294_v14, %v1294_v14  ;;  %v1531_v61 = vmax.f32 %v3022_v11, %v1294_v14  ;;  %v1587_v22 = vmin.f32 %v3022_v11, %v1294_v14 }
 0x2b6   : > { %v1390_v23 = vrot.slane %v1389_v17, 4  ;;  %v1461_v24 = vadd.f32 %v1447_v18, %v1439_v63  ;;  %v1518_v25 = vrot.slane %v1517_v19, 4  ;;  %v1574_v26 = vrot.slane %v1573_v20, 4 }
 0x2b7   : > { %v1404_v27 = vrot.slane %v1403_v21, 4  ;;  %v1475_v28 = vadd.f32 %v1449_v59, %v1441_v9  ;;  %v1532_v29 = vrot.slane %v1531_v61, 4  ;;  %v1588_v30 = vrot.slane %v1587_v22, 4 }
 0x2b8   : > { %v1391_v31 = vadd.f32 %v1390_v23, %v1389_v17  ;;  %v1462_v32 = vrot.slane %v1461_v24, 4  ;;  %v1519_v33 = vmax.f32 %v1517_v19, %v1518_v25  ;;  %v1575_v34 = vmin.f32 %v1573_v20, %v1574_v26 }
 0x2b9   : > { %v1405_v10 = vadd.f32 %v1404_v27, %v1403_v21  ;;  %v1476_v35 = vrot.slane %v1475_v28, 4  ;;  %v1533_v36 = vmax.f32 %v1531_v61, %v1532_v29  ;;  %v1589_v37 = vmin.f32 %v1587_v22, %v1588_v30 }
 0x2ba   : > { %v1392_v38 = vrot.slane %v1391_v31, 2  ;;  %v1463_v39 = vadd.f32 %v1462_v32, %v1461_v24  ;;  %v1520_v40 = vrot.slane %v1519_v33, 2  ;;  %v1576_v11 = vrot.slane %v1575_v34, 2 }
 0x2bb   : > { %v1406_v41 = vrot.slane %v1405_v10, 2  ;;  %v1477_v42 = vadd.f32 %v1476_v35, %v1475_v28  ;;  %v1534_v43 = vrot.slane %v1533_v36, 2  ;;  %v1590_v44 = vrot.slane %v1589_v37, 2 }
 0x2bc   : > { %v1393_v46 = vadd.f32 %v1392_v38, %v1391_v31  ;;  %v1464_v47 = vrot.slane %v1463_v39, 2  ;;  %v1521_v49 = vmax.f32 %v1519_v33, %v1520_v40  ;;  %v1577_v50 = vmin.f32 %v1575_v34, %v1576_v11 }
 0x2bd   : > { %v1407_v51 = vadd.f32 %v1406_v41, %v1405_v10  ;;  %v1478_v55 = vrot.slane %v1477_v42, 2  ;;  %v1535_v57 = vmax.f32 %v1533_v36, %v1534_v43  ;;  %v1591_v58 = vmin.f32 %v1589_v37, %v1590_v44 }
 0x2be   : > { %v1330_v60 = vpop.f32.mrf.mxu0  ;;  %v1373_v0 = vpop.f32.mrf.mxu1  ;;  %v1394_v1 = vrot.slane %v1393_v46, 1  ;;  %v1465_v63 = vadd.f32 %v1464_v47, %v1463_v39  ;;  %v1522_v9 = vrot.slane %v1521_v49, 1  ;;  %v1578_v6 = vrot.slane %v1577_v50, 1 }
 0x2bf   : > { %v1408_v14 = vrot.slane %v1407_v51, 1  ;;  %v1479_v17 = vadd.f32 %v1478_v55, %v1477_v42  ;;  %v1536_v18 = vrot.slane %v1535_v57, 1  ;;  %v1592_v19 = vrot.slane %v1591_v58, 1 }
 0x2c0   : > { %v1395_v20 = vadd.f32 %v1394_v1, %v1393_v46  ;;  %v1466_v21 = vrot.slane %v1465_v63, 1  ;;  %v1523_v59 = vmax.f32 %v1521_v49, %v1522_v9  ;;  %v1579_v61 = vmin.f32 %v1577_v50, %v1578_v6  ;;  %v1332_v22 = vpop.f32.mrf.mxu0  ;;  %v1375_v23 = vpop.f32.mrf.mxu1 }
 0x2c1   : > { %v1409_v24 = vadd.f32 %v1408_v14, %v1407_v51  ;;  %v1480_v25 = vrot.slane %v1479_v17, 1  ;;  %v1537_v26 = vmax.f32 %v1535_v57, %v1536_v18  ;;  %v1593_v27 = vmin.f32 %v1591_v58, %v1592_v19 }
 0x2c2   : > { %v1530_v28 = vmax.f32 %v3024_v52, %v1529_v12  ;;  %v1586_v29 = vmin.f32 %v3026_v53, %v1585_v2  ;;  %v1467_v30 = vadd.f32 %v1466_v21, %v1465_v63  ;;  %v1634_v31 = vcombine.low %v3053_v13, %v1395_v20  ;;  %v1334_v2 = vpop.f32.mrf.mxu0  ;;  %v1377_v36 = vpop.f32.mrf.mxu1 }
 0x2c3   : > { %v1460_v32 = vadd.f32 %v1459_v3, %v3031_v56  ;;  %v1474_v33 = vadd.f32 %v1473_v16, %v3033_v62  ;;  %v1481_v34 = vadd.f32 %v1480_v25, %v1479_v17  ;;  %v1635_v10 = vcombine.low %v3062_v15, %v1409_v24 }
 0x2c4   : > { %v1752_v52 = vcombine.low %v3058_v48, %v1523_v59  ;;  %v1811_v12 = vcombine.low %v3060_v7, %v1579_v61  ;;  %v1753_v35 = vcombine.low %v1530_v28, %v1537_v26  ;;  %v1812_v53 = vcombine.low %v1586_v29, %v1593_v27  ;;  %v1336_v40 = vpop.f32.mrf.mxu0  ;;  %v1379_v11 = vpop.f32.mrf.mxu1 }
 0x2c5   : > { %v3088_v13 = vrot.slane %v1634_v31, %v3029_v54  ;;  %v1693_v37 = vcombine.low %v1460_v32, %v1467_v30  ;;  %v3091_v56 = vrot.slane %v1635_v10, %v3029_v54  ;;  %v1694_v3 = vcombine.low %v1474_v33, %v1481_v34 }
 0x2c6   : > { %v1331_v62 = vadd.f32 %v1330_v60, %v3036_v4  ;;  %v1374_v15 = vadd.f32 %v1373_v0, %v3039_v5  ;;  %v3096_v48 = vadd.f32 %v1332_v22, %v3042_v8  ;;  %v3099_v7 = vrot.slane %v1752_v52, %v3029_v54 }
 0x2c7   : > { %v3102_v16 = vrot.slane %v1811_v12, %v3029_v54  ;;  %v3105_v38 = vrot.slane %v1753_v35, %v3029_v54  ;;  %v3108_v39 = vadd.f32 %v1375_v23, %v3045_v45  ;;  %v3111_v41 = vrot.slane %v1693_v37, %v3029_v54 }
 0x2c8   : > { %v1666_v42 = vcombine.low %v3088_v13, %v3091_v56  ;;  %v3116_v43 = vrot.slane %v1694_v3, %v3029_v54  ;;  %v3119_v44 = vrot.slane %v1812_v53, %v3029_v54  ;;  %v1442_v46 = vmul.f32 %v1331_v62, %v1331_v62 }
 0x2c9   : > { %v1444_v47 = vmul.f32 %v1374_v15, %v1374_v15  ;;  %v1335_v49 = vadd.f32 %v1334_v2, %v3036_v4  ;;  %v1378_v50 = vadd.f32 %v1377_v36, %v3039_v5  ;;  %v3125_v51 = vmul.f32 %v3096_v48, %v3096_v48 }
 0x2ca   : > { %v3129_v55 = vmul.f32 %v3108_v39, %v3108_v39  ;;  %v3132_v57 = vadd.f32 %v1336_v40, %v3042_v8  ;;  %v3135_v58 = vadd.f32 %v1379_v11, %v3045_v45 }
 0x2cb   : > { %v1410_v60 = vadd.f32 %v1335_v49, %v1331_v62  ;;  %v1450_v0 = vmul.f32 %v1335_v49, %v1335_v49  ;;  %v1538_v1 = vmax.f32 %v1331_v62, %v1335_v49  ;;  %v1594_v4 = vmin.f32 %v1331_v62, %v1335_v49 }
 0x2cc   : > { %v1424_v63 = vadd.f32 %v1378_v50, %v1374_v15  ;;  %v1452_v5 = vmul.f32 %v1378_v50, %v1378_v50  ;;  %v1552_v9 = vmax.f32 %v1374_v15, %v1378_v50  ;;  %v1608_v6 = vmin.f32 %v1374_v15, %v1378_v50 }
 0x2cd   : > { %v1411_v14 = vrot.slane %v1410_v60, 4  ;;  %v1482_v17 = vadd.f32 %v1450_v0, %v1442_v46  ;;  %v1539_v18 = vrot.slane %v1538_v1, 4  ;;  %v1595_v19 = vrot.slane %v1594_v4, 4 }
 0x2ce   : > { %v1425_v20 = vrot.slane %v1424_v63, 4  ;;  %v1496_v21 = vadd.f32 %v1452_v5, %v1444_v47  ;;  %v1553_v59 = vrot.slane %v1552_v9, 4  ;;  %v1609_v8 = vrot.slane %v1608_v6, 4 }
 0x2cf   : > { %v1412_v61 = vadd.f32 %v1411_v14, %v1410_v60  ;;  %v1483_v22 = vrot.slane %v1482_v17, 4  ;;  %v1540_v45 = vmax.f32 %v1538_v1, %v1539_v18  ;;  %v1596_v23 = vmin.f32 %v1594_v4, %v1595_v19 }
 0x2d0   : > { %v1426_v24 = vadd.f32 %v1425_v20, %v1424_v63  ;;  %v1497_v25 = vrot.slane %v1496_v21, 4  ;;  %v1554_v26 = vmax.f32 %v1552_v9, %v1553_v59  ;;  %v1610_v27 = vmin.f32 %v1608_v6, %v1609_v8 }
 0x2d1   : > { %v1413_v28 = vrot.slane %v1412_v61, 2  ;;  %v1484_v29 = vadd.f32 %v1483_v22, %v1482_v17  ;;  %v1541_v30 = vrot.slane %v1540_v45, 2  ;;  %v1597_v31 = vrot.slane %v1596_v23, 2 }
 0x2d2   : > { %v1427_v32 = vrot.slane %v1426_v24, 2  ;;  %v1498_v33 = vadd.f32 %v1497_v25, %v1496_v21  ;;  %v1555_v34 = vrot.slane %v1554_v26, 2  ;;  %v1611_v10 = vrot.slane %v1610_v27, 2 }
 0x2d3   : > { %v1414_v52 = vadd.f32 %v1413_v28, %v1412_v61  ;;  %v1485_v12 = vrot.slane %v1484_v29, 2  ;;  %v1542_v35 = vmax.f32 %v1540_v45, %v1541_v30  ;;  %v1598_v53 = vmin.f32 %v1596_v23, %v1597_v31 }
 0x2d4   : > { %v1428_v2 = vadd.f32 %v1427_v32, %v1426_v24  ;;  %v1499_v36 = vrot.slane %v1498_v33, 2  ;;  %v1556_v37 = vmax.f32 %v1554_v26, %v1555_v34  ;;  %v1612_v3 = vmin.f32 %v1610_v27, %v1611_v10 }
 0x2d5   : > { %v1415_v62 = vrot.slane %v1414_v52, 1  ;;  %v1486_v15 = vadd.f32 %v1485_v12, %v1484_v29  ;;  %v1543_v40 = vrot.slane %v1542_v35, 1  ;;  %v1599_v11 = vrot.slane %v1598_v53, 1 }
 0x2d6   : > { %v1429_v46 = vrot.slane %v1428_v2, 1  ;;  %v1500_v47 = vadd.f32 %v1499_v36, %v1498_v33  ;;  %v1557_v49 = vrot.slane %v1556_v37, 1  ;;  %v1613_v50 = vrot.slane %v1612_v3, 1 }
 0x2d7   : > { %v3137_v60 = vadd.f32 %v1415_v62, %v1414_v52  ;;  %v1487_v0 = vrot.slane %v1486_v15, 1  ;;  %v3139_v1 = vmax.f32 %v1542_v35, %v1543_v40  ;;  %v3141_v4 = vmin.f32 %v1598_v53, %v1599_v11 }
 0x2d8   : > { %v3143_v63 = vadd.f32 %v1429_v46, %v1428_v2  ;;  %v1501_v5 = vrot.slane %v1500_v47, 1  ;;  %v3145_v9 = vmax.f32 %v1556_v37, %v1557_v49  ;;  %v3147_v6 = vmin.f32 %v1612_v3, %v1613_v50 }
 0x2d9   : > { %v3149_v14 = vadd.f32 %v1487_v0, %v1486_v15  ;;  %v1417_v17 = vadd.f32 %v3132_v57, %v3096_v48  ;;  %v1451_v18 = vmul.f32 %v3132_v57, %v3132_v57  ;;  %v1545_v19 = vmax.f32 %v3096_v48, %v3132_v57 }
 0x2da   : > { %v3157_v20 = vadd.f32 %v1501_v5, %v1500_v47  ;;  %v1601_v21 = vmin.f32 %v3096_v48, %v3132_v57  ;;  %v1431_v59 = vadd.f32 %v3135_v58, %v3108_v39  ;;  %v1453_v8 = vmul.f32 %v3135_v58, %v3135_v58 }
 0x2db   : > { %v1418_v61 = vrot.slane %v1417_v17, 4  ;;  %v1489_v22 = vadd.f32 %v1451_v18, %v3125_v51  ;;  %v1546_v45 = vrot.slane %v1545_v19, 4  ;;  %v1559_v23 = vmax.f32 %v3108_v39, %v3135_v58 }
 0x2dc   : > { %v1602_v24 = vrot.slane %v1601_v21, 4  ;;  %v1432_v25 = vrot.slane %v1431_v59, 4  ;;  %v1503_v26 = vadd.f32 %v1453_v8, %v3129_v55  ;;  %v1615_v48 = vmin.f32 %v3108_v39, %v3135_v58 }
 0x2dd   : > { %v1419_v57 = vadd.f32 %v1418_v61, %v1417_v17  ;;  %v1490_v27 = vrot.slane %v1489_v22, 4  ;;  %v1547_v28 = vmax.f32 %v1545_v19, %v1546_v45  ;;  %v1560_v29 = vrot.slane %v1559_v23, 4 }
 0x2de   : > { %v1603_v30 = vmin.f32 %v1601_v21, %v1602_v24  ;;  %v1433_v31 = vadd.f32 %v1432_v25, %v1431_v59  ;;  %v1504_v32 = vrot.slane %v1503_v26, 4  ;;  %v1616_v33 = vrot.slane %v1615_v48, 4 }
 0x2df   : > { %v1420_v51 = vrot.slane %v1419_v57, 2  ;;  %v1491_v34 = vadd.f32 %v1490_v27, %v1489_v22  ;;  %v1548_v10 = vrot.slane %v1547_v28, 2  ;;  %v1561_v52 = vmax.f32 %v1559_v23, %v1560_v29 }
 0x2e0   : > { %v1604_v12 = vrot.slane %v1603_v30, 2  ;;  %v1434_v35 = vrot.slane %v1433_v31, 2  ;;  %v1505_v53 = vadd.f32 %v1504_v32, %v1503_v26  ;;  %v1617_v55 = vmin.f32 %v1615_v48, %v1616_v33 }
 0x2e1   : > { %v1421_v2 = vadd.f32 %v1420_v51, %v1419_v57  ;;  %v1492_v36 = vrot.slane %v1491_v34, 2  ;;  %v1549_v39 = vmax.f32 %v1547_v28, %v1548_v10  ;;  %v1562_v58 = vrot.slane %v1561_v52, 2 }
 0x2e2   : > { %v1605_v37 = vmin.f32 %v1603_v30, %v1604_v12  ;;  %v1435_v3 = vadd.f32 %v1434_v35, %v1433_v31  ;;  %v1506_v62 = vrot.slane %v1505_v53, 2  ;;  %v1618_v15 = vrot.slane %v1617_v55, 2 }
 0x2e3   : > { %v1422_v40 = vrot.slane %v1421_v2, 1  ;;  %v1493_v11 = vadd.f32 %v1492_v36, %v1491_v34  ;;  %v1550_v46 = vrot.slane %v1549_v39, 1  ;;  %v1563_v47 = vmax.f32 %v1561_v52, %v1562_v58 }
 0x2e4   : > { %v1606_v49 = vrot.slane %v1605_v37, 1  ;;  %v1436_v50 = vrot.slane %v1435_v3, 1  ;;  %v1507_v0 = vadd.f32 %v1506_v62, %v1505_v53  ;;  %v1619_v5 = vmin.f32 %v1617_v55, %v1618_v15 }
 0x2e5   : > { %v1423_v17 = vadd.f32 %v1422_v40, %v1421_v2  ;;  %v1494_v18 = vrot.slane %v1493_v11, 1  ;;  %v1551_v19 = vmax.f32 %v1549_v39, %v1550_v46  ;;  %v1564_v21 = vrot.slane %v1563_v47, 1 }
 0x2e6   : > { %v1607_v59 = vmin.f32 %v1605_v37, %v1606_v49  ;;  %v1437_v8 = vadd.f32 %v1436_v50, %v1435_v3  ;;  %v1508_v61 = vrot.slane %v1507_v0, 1  ;;  %v1620_v22 = vrot.slane %v1619_v5, 1 }
 0x2e7   : > { %v1495_v45 = vadd.f32 %v1494_v18, %v1493_v11  ;;  %v1636_v23 = vcombine.low %v3137_v60, %v1423_v17  ;;  %v1754_v24 = vcombine.low %v3139_v1, %v1551_v19  ;;  %v1565_v25 = vmax.f32 %v1563_v47, %v1564_v21 }
 0x2e8   : > { %v1813_v26 = vcombine.low %v3141_v4, %v1607_v59  ;;  %v1509_v48 = vadd.f32 %v1508_v61, %v1507_v0  ;;  %v1621_v57 = vmin.f32 %v1619_v5, %v1620_v22  ;;  %v1637_v27 = vcombine.low %v3143_v63, %v1437_v8 }
 0x2e9   : > { %v1658_v28 = vrot.slane %v1636_v23, %v3029_v54  ;;  %v1695_v29 = vcombine.low %v3149_v14, %v1495_v45  ;;  %v1776_v30 = vrot.slane %v1754_v24, %v3029_v54  ;;  %v1755_v31 = vcombine.low %v3145_v9, %v1565_v25 }
 0x2ea   : > { %v1835_v60 = vrot.slane %v1813_v26, %v3029_v54  ;;  %v1665_v1 = vrot.slane %v1637_v27, %v3029_v54  ;;  %v1696_v4 = vcombine.low %v3157_v20, %v1509_v48  ;;  %v1814_v32 = vcombine.low %v3147_v6, %v1621_v57 }
 0x2eb   : > { %v1784_v33 = vcombine.low %v3099_v7, %v3105_v38  ;;  %v1843_v63 = vcombine.low %v3102_v16, %v3119_v44  ;;  %v1717_v14 = vrot.slane %v1695_v29, %v3029_v54  ;;  %v1783_v51 = vrot.slane %v1755_v31, %v3029_v54 }
 0x2ec   : > { %v1725_v9 = vcombine.low %v3111_v41, %v3116_v43  ;;  %v1667_v34 = vcombine.low %v1658_v28, %v1665_v1  ;;  %v1724_v10 = vrot.slane %v1696_v4, %v3029_v54  ;;  %v1842_v20 = vrot.slane %v1814_v32, %v3029_v54 }
 0x2ed   : > { %v1785_v6 = vcombine.low %v1776_v30, %v1783_v51  ;;  %v1674_v7 = vrot.slane %v1666_v42, %v3029_v54  ;;  %v1792_v52 = vrot.slane %v1784_v33, %v3029_v54  ;;  %v1851_v41 = vrot.slane %v1843_v63, %v3029_v54 }
 0x2ee   : > { %v1681_v16 = vrot.slane %v1667_v34, %v3029_v54  ;;  %v1726_v38 = vcombine.low %v1717_v14, %v1724_v10  ;;  %v1844_v44 = vcombine.low %v1835_v60, %v1842_v20  ;;  %v1733_v12 = vrot.slane %v1725_v9, %v3029_v54 }
 0x2ef   : > { %v1799_v43 = vrot.slane %v1785_v6, %v3029_v54 }
 0x2f0   : > { %v1682_v13 = vcombine.low %v1674_v7, %v1681_v16  ;;  %v1740_v56 = vrot.slane %v1726_v38, %v3029_v54  ;;  %v1858_v42 = vrot.slane %v1844_v44, %v3029_v54 }
 0x2f1   : > { %v1800_v35 = vcombine.low %v1792_v52, %v1799_v43 }
 0x2f2   : > { %1684 = vst [vmem:[%s570_s28] sm:$0xff] %v1682_v13  ;;  %v1741_v53 = vcombine.low %v1733_v12, %v1740_v56  ;;  %v1859_v55 = vcombine.low %v1851_v41, %v1858_v42 }
 0x2f3   : > { %1802 = vst [vmem:[%s582_s22] sm:$0xff] %v1800_v35 }
 0x2f4   : > { %1743 = vst [vmem:[%s576_s24] sm:$0xff] %v1741_v53  ;;  %1861 = vst [vmem:[%s588_s27] sm:$0xff] %v1859_v55 }
 0x2f5 PF: > { %s27_s15 = sadd.s32 1, %s2605_s15   ;;  %s3248_s29 = smov %s2601_s30 }
 0x2f6   : > { %p24_p5 = scmp.ge.s32.totalorder %s27_s15, 4   ;;  %s3249_s30 = smov %s3251_s21 }
 0x2f8   :  { %26 = sbr.rel (!%p24_p5) target bundleno = 3 (0x3), region = 151 }
 0x2fd   :  { %2183 = vsyncpa [#allocation3], 1 }
 0x2fe   :  { %2185 = vsyncpa [#allocation3 + $0x1], 1 }
 0x2ff   :  { %2186 = vsyncpa [#allocation5], 1 }

// kernel: tnet_forward.5
= control target key start
LH: loop header
LB: loop body
LE: loop exit
PB: predicated region body
PF: predicated region fallthrough
CT: control target
= control target key end

     0   :  { %v3834_v36 = vmov 1983009808   ;;  %v47_v38 = vlaneseq  ;;  %vm1979_vm0 = vcmask 1041408   ;;  %vm2957_vm1 = vcmask 66560   ;;  %s5094_s1 = inlined_call_operand.vmem [shape: bf16[1024,512], index: 1, kind: input, shape index: {}]   ;;  %s5095_s0 = inlined_call_operand.vmem [shape: f32[2,1024], index: 0, kind: input, shape index: {}]   ;;  %s5096_s2 = inlined_call_operand.vmem [shape: f32[1,512], index: 2, kind: input, shape index: {}]   ;;  %s5097_s5 = inlined_call_operand.vmem [shape: bf16[512,256], index: 5, kind: input, shape index: {}]   ;;  %s5098_s3 = inlined_call_operand.vmem [shape: f32[1,512], index: 3, kind: input, shape index: {}]   ;;  %s5099_s4 = inlined_call_operand.vmem [shape: f32[1,512], index: 4, kind: input, shape index: {}]   ;;  %s5100_s9 = inlined_call_operand.vmem [shape: bf16[256,9], index: 9, kind: input, shape index: {}]   ;;  %s5101_s6 = inlined_call_operand.vmem [shape: f32[1,256], index: 6, kind: input, shape index: {}]   ;;  %s5102_s7 = inlined_call_operand.vmem [shape: f32[1,256], index: 7, kind: input, shape index: {}]   ;;  %s5103_s8 = inlined_call_operand.vmem [shape: f32[1,256], index: 8, kind: input, shape index: {}]   ;;  %s5104_s10 = inlined_call_operand.vmem [shape: f32[1,9], index: 10, kind: input, shape index: {}]   ;;  %s5105_s11 = inlined_call_operand.vmem [shape: f32[2,9], index: 11, kind: output, shape index: {}]  }
   0x1   :  { %v3324_v0 = vld [vmem:[%s5094_s1 + $0xe4] ss:$16 sps:$4 sm:$0xff]   ;;  %v3328_v2 = vld [vmem:[%s5094_s1 + $0xe0] ss:$16 sps:$4 sm:$0xff]   ;;  %v45_v37 = vunpack.c.l.s4 %v3834_v36 }
   0x2   :  { %v3326_v1 = vld [vmem:[%s5094_s1 + $0x2e4] ss:$16 sps:$4 sm:$0xff]   ;;  %1651 = vmatprep.subr.bf16.mxu0 %v3324_v0  ;;  %v3329_v3 = vld [vmem:[%s5094_s1 + $0x2e0] ss:$16 sps:$4 sm:$0xff]   ;;  %v4013_v43 = vshrl.u32 %v47_v38, 7 }
   0x3   :  { %1692 = vmatprep.subr.bf16.mxu1 %v3326_v1  ;;  %v3330_v4 = vld [vmem:[%s5094_s1 + $0xc4] ss:$16 sps:$4 sm:$0xff]   ;;  %1652 = vmatpush1.bf16.msra.mxu0 %v3328_v2  ;;  %v3334_v6 = vld [vmem:[%s5094_s1 + $0xc0] ss:$16 sps:$4 sm:$0xff]   ;;  %v46_v42 = vunpack.c.0.s8 %v45_v37 }
   0x4   :  { %1693 = vmatpush1.bf16.msra.mxu1 %v3329_v3  ;;  %v3332_v5 = vld [vmem:[%s5094_s1 + $0x2c4] ss:$16 sps:$4 sm:$0xff]   ;;  %1653 = vmatprep.subr.bf16.mxu0 %v3330_v4  ;;  %v3335_v7 = vld [vmem:[%s5094_s1 + $0x2c0] ss:$16 sps:$4 sm:$0xff]   ;;  %v40_v4 = vld [vmem:[%s5095_s0 + $0x8] sm:$0xff] }
   0x5   :  { %1694 = vmatprep.subr.bf16.mxu1 %v3332_v5  ;;  %v3336_v8 = vld [vmem:[%s5094_s1 + $0xa4] ss:$16 sps:$4 sm:$0xff]   ;;  %v3340_v10 = vld [vmem:[%s5094_s1 + $0xa0] ss:$16 sps:$4 sm:$0xff]   ;;  %v49_v49 = vsub.s32 %v46_v42, %v4013_v43 }
   0x6   :  { %v3338_v9 = vld [vmem:[%s5094_s1 + $0x2a4] ss:$16 sps:$4 sm:$0xff]   ;;  %v3341_v11 = vld [vmem:[%s5094_s1 + $0x2a0] ss:$16 sps:$4 sm:$0xff]  }
   0x7   :  { %1654 = vmatpush1.bf16.msra.mxu0 %v3334_v6  ;;  %v3342_v12 = vld [vmem:[%s5094_s1 + $0x84] ss:$16 sps:$4 sm:$0xff]   ;;  %v3346_v14 = vld [vmem:[%s5094_s1 + $0x80] ss:$16 sps:$4 sm:$0xff]  }
   0x8   :  { %1695 = vmatpush1.bf16.msra.mxu1 %v3335_v7  ;;  %1655 = vmatprep.subr.bf16.mxu0 %v3336_v8  ;;  %v3344_v13 = vld [vmem:[%s5094_s1 + $0x284] ss:$16 sps:$4 sm:$0xff]   ;;  %v3347_v15 = vld [vmem:[%s5094_s1 + $0x280] ss:$16 sps:$4 sm:$0xff]  }
   0x9   :  { %1696 = vmatprep.subr.bf16.mxu1 %v3338_v9  ;;  %v3348_v16 = vld [vmem:[%s5094_s1 + $0x64] ss:$16 sps:$4 sm:$0xff]   ;;  %v3352_v18 = vld [vmem:[%s5094_s1 + $0x60] ss:$16 sps:$4 sm:$0xff]   ;;  %v60_v9 = vcombine.high %v40_v4, %v40_v4 }
   0xa   :  { %v3350_v17 = vld [vmem:[%s5094_s1 + $0x264] ss:$16 sps:$4 sm:$0xff]   ;;  %v3353_v19 = vld [vmem:[%s5094_s1 + $0x260] ss:$16 sps:$4 sm:$0xff]  }
   0xb   :  { %1656 = vmatpush1.bf16.msra.mxu0 %v3340_v10  ;;  %v3354_v20 = vld [vmem:[%s5094_s1 + $0x44] ss:$16 sps:$4 sm:$0xff]   ;;  %v3358_v22 = vld [vmem:[%s5094_s1 + $0x40] ss:$16 sps:$4 sm:$0xff]  }
   0xc   :  { %1697 = vmatpush1.bf16.msra.mxu1 %v3341_v11  ;;  %1657 = vmatprep.subr.bf16.mxu0 %v3342_v12  ;;  %v3356_v21 = vld [vmem:[%s5094_s1 + $0x244] ss:$16 sps:$4 sm:$0xff]   ;;  %v3359_v23 = vld [vmem:[%s5094_s1 + $0x240] ss:$16 sps:$4 sm:$0xff]  }
   0xd   :  { %1698 = vmatprep.subr.bf16.mxu1 %v3344_v13  ;;  %v3360_v24 = vld [vmem:[%s5094_s1 + $0x24] ss:$16 sps:$4 sm:$0xff]   ;;  %v3364_v26 = vld [vmem:[%s5094_s1 + $0x20] ss:$16 sps:$4 sm:$0xff]  }
   0xe   :  { %v3362_v25 = vld [vmem:[%s5094_s1 + $0x224] ss:$16 sps:$4 sm:$0xff]   ;;  %v3365_v27 = vld [vmem:[%s5094_s1 + $0x220] ss:$16 sps:$4 sm:$0xff]  }
   0xf   :  { %1658 = vmatpush1.bf16.msra.mxu0 %v3346_v14  ;;  %v3366_v28 = vld [vmem:[%s5094_s1 + $0x4] ss:$16 sps:$4 sm:$0xff]   ;;  %v3370_v30 = vld [vmem:[%s5094_s1] ss:$16 sps:$4 sm:$0xff]   ;;  %v4097_v14 = vrot.slane %v40_v4, %v49_v49 }
  0x10   :  { %1699 = vmatpush1.bf16.msra.mxu1 %v3347_v15  ;;  %1659 = vmatprep.subr.bf16.mxu0 %v3348_v16  ;;  %v3368_v29 = vld [vmem:[%s5094_s1 + $0x204] ss:$16 sps:$4 sm:$0xff]   ;;  %v3371_v31 = vld [vmem:[%s5094_s1 + $0x200] ss:$16 sps:$4 sm:$0xff]   ;;  %v4099_v15 = vrot.slane %v60_v9, %v49_v49 }
  0x11   :  { %1700 = vmatprep.subr.bf16.mxu1 %v3350_v17  ;;  %v3372_v32 = vld [vmem:[%s5094_s1 + $0x1e4] ss:$16 sps:$4 sm:$0xff]   ;;  %v3376_v34 = vld [vmem:[%s5094_s1 + $0x1e0] ss:$16 sps:$4 sm:$0xff]  }
  0x12   :  { %v3374_v33 = vld [vmem:[%s5094_s1 + $0x3e4] ss:$16 sps:$4 sm:$0xff]   ;;  %v3377_v35 = vld [vmem:[%s5094_s1 + $0x3e0] ss:$16 sps:$4 sm:$0xff]  }
  0x13   :  { %1660 = vmatpush1.bf16.msra.mxu0 %v3352_v18  ;;  %v3378_v39 = vld [vmem:[%s5094_s1 + $0x1c4] ss:$16 sps:$4 sm:$0xff]   ;;  %v3382_v41 = vld [vmem:[%s5094_s1 + $0x1c0] ss:$16 sps:$4 sm:$0xff]  }
  0x14   :  { %1701 = vmatpush1.bf16.msra.mxu1 %v3353_v19  ;;  %1661 = vmatprep.subr.bf16.mxu0 %v3354_v20  ;;  %v3380_v40 = vld [vmem:[%s5094_s1 + $0x3c4] ss:$16 sps:$4 sm:$0xff]   ;;  %v3383_v44 = vld [vmem:[%s5094_s1 + $0x3c0] ss:$16 sps:$4 sm:$0xff]   ;;  %v75_v20 = vcombine.high %v4097_v14, %v4097_v14 }
  0x15   :  { %1702 = vmatprep.subr.bf16.mxu1 %v3356_v21  ;;  %v3384_v45 = vld [vmem:[%s5094_s1 + $0x1a4] ss:$16 sps:$4 sm:$0xff]   ;;  %v3388_v47 = vld [vmem:[%s5094_s1 + $0x1a0] ss:$16 sps:$4 sm:$0xff]   ;;  %v76_v21 = vcombine.high %v4099_v15, %v4099_v15 }
  0x16   :  { %v3386_v46 = vld [vmem:[%s5094_s1 + $0x3a4] ss:$16 sps:$4 sm:$0xff]   ;;  %v3389_v48 = vld [vmem:[%s5094_s1 + $0x3a0] ss:$16 sps:$4 sm:$0xff]  }
  0x17   :  { %1662 = vmatpush1.bf16.msra.mxu0 %v3358_v22  ;;  %v3390_v50 = vld [vmem:[%s5094_s1 + $0x184] ss:$16 sps:$4 sm:$0xff]   ;;  %v3394_v55 = vld [vmem:[%s5094_s1 + $0x180] ss:$16 sps:$4 sm:$0xff]  }
  0x18   :  { %1703 = vmatpush1.bf16.msra.mxu1 %v3359_v23  ;;  %1663 = vmatprep.subr.bf16.mxu0 %v3360_v24  ;;  %v3392_v51 = vld [vmem:[%s5094_s1 + $0x384] ss:$16 sps:$4 sm:$0xff]   ;;  %v3395_v56 = vld [vmem:[%s5094_s1 + $0x380] ss:$16 sps:$4 sm:$0xff]  }
  0x19   :  { %1704 = vmatprep.subr.bf16.mxu1 %v3362_v25  ;;  %v39_v52 = vld [vmem:[%s5095_s0] sm:$0xff] }
  0x1a   :  { %v50_v53 = vrot.slane %v39_v52, %v49_v49  ;;  %v43_v54 = vcombine.high %v39_v52, %v39_v52  ;;  %v3396_v57 = vld [vmem:[%s5094_s1 + $0x164] ss:$16 sps:$4 sm:$0xff]   ;;  %v3400_v63 = vld [vmem:[%s5094_s1 + $0x160] ss:$16 sps:$4 sm:$0xff]  }
  0x1b   :  { %1664 = vmatpush1.bf16.msra.mxu0 %v3364_v26  ;;  %v3398_v58 = vld [vmem:[%s5094_s1 + $0x364] ss:$16 sps:$4 sm:$0xff]   ;;  %v3401_v0 = vld [vmem:[%s5094_s1 + $0x360] ss:$16 sps:$4 sm:$0xff]  }
  0x1c   :  { %1705 = vmatpush1.bf16.msra.mxu1 %v3365_v27  ;;  %1665 = vmatprep.subr.bf16.mxu0 %v3366_v28  ;;  %v58_v59 = vcombine.high %v50_v53, %v50_v53  ;;  %v57_v60 = vrot.slane %v43_v54, %v49_v49  ;;  %v3402_v1 = vld [vmem:[%s5094_s1 + $0x144] ss:$16 sps:$4 sm:$0xff]   ;;  %v3406_v5 = vld [vmem:[%s5094_s1 + $0x140] ss:$16 sps:$4 sm:$0xff]   ;;  %v4117_v22 = vpack.c.bf16 %v50_v53, %v50_v53 }
  0x1d   :  { %1706 = vmatprep.subr.bf16.mxu1 %v3368_v29  ;;  %v3404_v2 = vld [vmem:[%s5094_s1 + $0x344] ss:$16 sps:$4 sm:$0xff]   ;;  %v3407_v6 = vld [vmem:[%s5094_s1 + $0x340] ss:$16 sps:$4 sm:$0xff]   ;;  %v4133_v28 = vpack.c.bf16 %v75_v20, %v75_v20  ;;  %v4135_v29 = vpack.c.bf16 %v76_v21, %v76_v21 }
  0x1e   :  { %v4052_v61 = vpack.c.bf16 %v58_v59, %v58_v59  ;;  %v59_v62 = vcombine.high %v57_v60, %v57_v60  ;;  %v3408_v7 = vld [vmem:[%s5094_s1 + $0x124] ss:$16 sps:$4 sm:$0xff]   ;;  %v3412_v10 = vld [vmem:[%s5094_s1 + $0x120] ss:$16 sps:$4 sm:$0xff]   ;;  %v4119_v23 = vpack.c.bf16 %v57_v60, %v57_v60 }
  0x1f   :  { %1666 = vmatpush1.bf16.msra.mxu0 %v3370_v30  ;;  %v3410_v8 = vld [vmem:[%s5094_s1 + $0x324] ss:$16 sps:$4 sm:$0xff]   ;;  %v3413_v11 = vld [vmem:[%s5094_s1 + $0x320] ss:$16 sps:$4 sm:$0xff]  }
  0x20   :  { %1707 = vmatpush1.bf16.msra.mxu1 %v3371_v31  ;;  %1667 = vmatprep.subr.bf16.mxu0 %v3372_v32  ;;  %v4066_v3 = vpack.c.bf16 %v59_v62, %v59_v62  ;;  %v3414_v12 = vld [vmem:[%s5094_s1 + $0x104] ss:$16 sps:$4 sm:$0xff]   ;;  %v3418_v16 = vld [vmem:[%s5094_s1 + $0x100] ss:$16 sps:$4 sm:$0xff]  }
  0x21   :  { %1708 = vmatprep.subr.bf16.mxu1 %v3374_v33  ;;  %1683 = vmatprep.mubr.bf16.mxu0 %v4052_v61  ;;  %v3416_v13 = vld [vmem:[%s5094_s1 + $0x304] ss:$16 sps:$4 sm:$0xff]   ;;  %v3419_v17 = vld [vmem:[%s5094_s1 + $0x300] ss:$16 sps:$4 sm:$0xff]  }
  0x22   :  { %1724 = vmatprep.mubr.bf16.mxu1 %v4066_v3  ;;  %v3424_v18 = vld [vmem:[%s5094_s1 + $0x4e4] ss:$16 sps:$4 sm:$0xff]   ;;  %v3422_v24 = vld [vmem:[%s5094_s1 + $0x4e0] ss:$16 sps:$4 sm:$0xff]  }
  0x23   :  { %1668 = vmatpush2.bf16.msra.mxu0 %v3376_v34  ;;  %v3427_v19 = vld [vmem:[%s5094_s1 + $0x6e4] ss:$16 sps:$4 sm:$0xff]   ;;  %v3425_v25 = vld [vmem:[%s5094_s1 + $0x6e0] ss:$16 sps:$4 sm:$0xff]  }
  0x24   :  { %1709 = vmatpush2.bf16.msra.mxu1 %v3377_v35  ;;  %1669 = vmatprep.subr.bf16.mxu0 %v3378_v39  ;;  %v3430_v26 = vld [vmem:[%s5094_s1 + $0x4c4] ss:$16 sps:$4 sm:$0xff]   ;;  %v3428_v30 = vld [vmem:[%s5094_s1 + $0x4c0] ss:$16 sps:$4 sm:$0xff]  }
  0x25   :  { %1710 = vmatprep.subr.bf16.mxu1 %v3380_v40  ;;  %v3433_v27 = vld [vmem:[%s5094_s1 + $0x6c4] ss:$16 sps:$4 sm:$0xff]   ;;  %v3431_v31 = vld [vmem:[%s5094_s1 + $0x6c0] ss:$16 sps:$4 sm:$0xff]  }
  0x26   :  { %v3436_v32 = vld [vmem:[%s5094_s1 + $0x4a4] ss:$16 sps:$4 sm:$0xff]   ;;  %v3434_v34 = vld [vmem:[%s5094_s1 + $0x4a0] ss:$16 sps:$4 sm:$0xff]  }
  0x27   :  { %1670 = vmatpush2.bf16.msra.mxu0 %v3382_v41  ;;  %v3439_v33 = vld [vmem:[%s5094_s1 + $0x6a4] ss:$16 sps:$4 sm:$0xff]   ;;  %v3437_v35 = vld [vmem:[%s5094_s1 + $0x6a0] ss:$16 sps:$4 sm:$0xff]  }
  0x28   :  { %1711 = vmatpush2.bf16.msra.mxu1 %v3383_v44  ;;  %1671 = vmatprep.subr.bf16.mxu0 %v3384_v45  ;;  %v3442_v36 = vld [vmem:[%s5094_s1 + $0x484] ss:$16 sps:$4 sm:$0xff]   ;;  %v3440_v38 = vld [vmem:[%s5094_s1 + $0x480] ss:$16 sps:$4 sm:$0xff]  }
  0x29   :  { %1712 = vmatprep.subr.bf16.mxu1 %v3386_v46  ;;  %v3445_v37 = vld [vmem:[%s5094_s1 + $0x684] ss:$16 sps:$4 sm:$0xff]   ;;  %v3443_v39 = vld [vmem:[%s5094_s1 + $0x680] ss:$16 sps:$4 sm:$0xff]  }
  0x2a   :  { %v3448_v40 = vld [vmem:[%s5094_s1 + $0x464] ss:$16 sps:$4 sm:$0xff]   ;;  %v3446_v42 = vld [vmem:[%s5094_s1 + $0x460] ss:$16 sps:$4 sm:$0xff]  }
  0x2b   :  { %1672 = vmatpush2.bf16.msra.mxu0 %v3388_v47  ;;  %v3451_v41 = vld [vmem:[%s5094_s1 + $0x664] ss:$16 sps:$4 sm:$0xff]   ;;  %v3449_v44 = vld [vmem:[%s5094_s1 + $0x660] ss:$16 sps:$4 sm:$0xff]  }
  0x2c   :  { %1713 = vmatpush2.bf16.msra.mxu1 %v3389_v48  ;;  %1673 = vmatprep.subr.bf16.mxu0 %v3390_v50  ;;  %v3454_v45 = vld [vmem:[%s5094_s1 + $0x444] ss:$16 sps:$4 sm:$0xff]   ;;  %v3452_v47 = vld [vmem:[%s5094_s1 + $0x440] ss:$16 sps:$4 sm:$0xff]  }
  0x2d   :  { %1714 = vmatprep.subr.bf16.mxu1 %v3392_v51  ;;  %v3457_v46 = vld [vmem:[%s5094_s1 + $0x644] ss:$16 sps:$4 sm:$0xff]   ;;  %v3455_v48 = vld [vmem:[%s5094_s1 + $0x640] ss:$16 sps:$4 sm:$0xff]  }
  0x2e   :  { %v3460_v49 = vld [vmem:[%s5094_s1 + $0x424] ss:$16 sps:$4 sm:$0xff]   ;;  %v3458_v51 = vld [vmem:[%s5094_s1 + $0x420] ss:$16 sps:$4 sm:$0xff]  }
  0x2f   :  { %1674 = vmatpush2.bf16.msra.mxu0 %v3394_v55  ;;  %v3463_v50 = vld [vmem:[%s5094_s1 + $0x624] ss:$16 sps:$4 sm:$0xff]   ;;  %v3461_v52 = vld [vmem:[%s5094_s1 + $0x620] ss:$16 sps:$4 sm:$0xff]  }
  0x30   :  { %1715 = vmatpush2.bf16.msra.mxu1 %v3395_v56  ;;  %1675 = vmatprep.subr.bf16.mxu0 %v3396_v57  ;;  %v3466_v53 = vld [vmem:[%s5094_s1 + $0x404] ss:$16 sps:$4 sm:$0xff]   ;;  %v3464_v55 = vld [vmem:[%s5094_s1 + $0x400] ss:$16 sps:$4 sm:$0xff]  }
  0x31   :  { %1716 = vmatprep.subr.bf16.mxu1 %v3398_v58  ;;  %v3469_v54 = vld [vmem:[%s5094_s1 + $0x604] ss:$16 sps:$4 sm:$0xff]   ;;  %v3467_v56 = vld [vmem:[%s5094_s1 + $0x600] ss:$16 sps:$4 sm:$0xff]  }
  0x32   :  { %v3472_v57 = vld [vmem:[%s5094_s1 + $0x5e4] ss:$16 sps:$4 sm:$0xff]   ;;  %v3470_v59 = vld [vmem:[%s5094_s1 + $0x5e0] ss:$16 sps:$4 sm:$0xff]  }
  0x33   :  { %1676 = vmatpush2.bf16.msra.mxu0 %v3400_v63  ;;  %v3475_v58 = vld [vmem:[%s5094_s1 + $0x7e4] ss:$16 sps:$4 sm:$0xff]   ;;  %v3473_v60 = vld [vmem:[%s5094_s1 + $0x7e0] ss:$16 sps:$4 sm:$0xff]  }
  0x34   :  { %1717 = vmatpush2.bf16.msra.mxu1 %v3401_v0  ;;  %1677 = vmatprep.subr.bf16.mxu0 %v3402_v1  ;;  %v3478_v62 = vld [vmem:[%s5094_s1 + $0x5c4] ss:$16 sps:$4 sm:$0xff]   ;;  %v3476_v0 = vld [vmem:[%s5094_s1 + $0x5c0] ss:$16 sps:$4 sm:$0xff]  }
  0x35   :  { %1718 = vmatprep.subr.bf16.mxu1 %v3404_v2  ;;  %v3481_v63 = vld [vmem:[%s5094_s1 + $0x7c4] ss:$16 sps:$4 sm:$0xff]   ;;  %v3479_v1 = vld [vmem:[%s5094_s1 + $0x7c0] ss:$16 sps:$4 sm:$0xff]  }
  0x36   :  { %v3484_v2 = vld [vmem:[%s5094_s1 + $0x5a4] ss:$16 sps:$4 sm:$0xff]   ;;  %v3488_v9 = vld [vmem:[%s5094_s1 + $0x580] ss:$16 sps:$4 sm:$0xff]  }
  0x37   :  { %1678 = vmatpush2.bf16.msra.mxu0 %v3406_v5  ;;  %v3487_v4 = vld [vmem:[%s5094_s1 + $0x7a4] ss:$16 sps:$4 sm:$0xff]   ;;  %v3482_v5 = vld [vmem:[%s5094_s1 + $0x5a0] ss:$16 sps:$4 sm:$0xff]  }
  0x38   :  { %1719 = vmatpush2.bf16.msra.mxu1 %v3407_v6  ;;  %1679 = vmatprep.subr.bf16.mxu0 %v3408_v7  ;;  %v3485_v6 = vld [vmem:[%s5094_s1 + $0x7a0] ss:$16 sps:$4 sm:$0xff]   ;;  %v3490_v7 = vld [vmem:[%s5094_s1 + $0x584] ss:$16 sps:$4 sm:$0xff]  }
  0x39   :  { %1720 = vmatprep.subr.bf16.mxu1 %v3410_v8  ;;  %v3493_v8 = vld [vmem:[%s5094_s1 + $0x784] ss:$16 sps:$4 sm:$0xff]   ;;  %v3503_v20 = vld [vmem:[%s5094_s1 + $0x740] ss:$16 sps:$4 sm:$0xff]  }
  0x3a   :  { %v3508_v21 = vld [vmem:[%s5094_s1 + $0x524] ss:$16 sps:$4 sm:$0xff]  }
  0x3b   :  { %1680 = vmatpush2.bf16.msra.mxu0 %v3412_v10  ;;  %v3491_v10 = vld [vmem:[%s5094_s1 + $0x780] ss:$16 sps:$4 sm:$0xff]  }
  0x3c   :  { %1721 = vmatpush2.bf16.msra.mxu1 %v3413_v11  ;;  %1681 = vmatprep.subr.bf16.mxu0 %v3414_v12  ;;  %v3496_v11 = vld [vmem:[%s5094_s1 + $0x564] ss:$16 sps:$4 sm:$0xff]  }
  0x3d   :  { %1722 = vmatprep.subr.bf16.mxu1 %v3416_v13  ;;  %v3499_v12 = vld [vmem:[%s5094_s1 + $0x764] ss:$16 sps:$4 sm:$0xff]   ;;  %v3494_v13 = vld [vmem:[%s5094_s1 + $0x560] ss:$16 sps:$4 sm:$0xff]  }
  0x3f   :  { %1682 = vmatpush2.bf16.msra.mxu0 %v3418_v16  ;;  %v3497_v16 = vld [vmem:[%s5094_s1 + $0x760] ss:$16 sps:$4 sm:$0xff]  }
  0x40   :  { %1723 = vmatpush2.bf16.msra.mxu1 %v3419_v17  ;;  %1733 = vmatprep.subr.bf16.mxu0 %v3424_v18  ;;  %v3502_v17 = vld [vmem:[%s5094_s1 + $0x544] ss:$16 sps:$4 sm:$0xff]  }
  0x41   :  { %1774 = vmatprep.subr.bf16.mxu1 %v3427_v19  ;;  %v3505_v18 = vld [vmem:[%s5094_s1 + $0x744] ss:$16 sps:$4 sm:$0xff]   ;;  %v3500_v19 = vld [vmem:[%s5094_s1 + $0x540] ss:$16 sps:$4 sm:$0xff]  }
  0x42   :  { %1684 = vmatmul.mubr.bf16.vlgmr.msra.gmra.mxu0 %v4117_v22 }
  0x43   :  { %1725 = vmatmul.mubr.bf16.vlgmr.msra.gmra.mxu1 %v4119_v23  ;;  %1734 = vmatpush1.bf16.msra.mxu0 %v3422_v24  ;;  %v3511_v24 = vld [vmem:[%s5094_s1 + $0x724] ss:$16 sps:$4 sm:$0xff]  }
  0x44   :  { %1775 = vmatpush1.bf16.msra.mxu1 %v3425_v25  ;;  %1735 = vmatprep.subr.bf16.mxu0 %v3430_v26  ;;  %v3506_v25 = vld [vmem:[%s5094_s1 + $0x520] ss:$16 sps:$4 sm:$0xff]  }
  0x45   :  { %1776 = vmatprep.subr.bf16.mxu1 %v3433_v27  ;;  %1765 = vmatprep.mubr.bf16.mxu0 %v4133_v28  ;;  %v3509_v26 = vld [vmem:[%s5094_s1 + $0x720] ss:$16 sps:$4 sm:$0xff]   ;;  %v3514_v27 = vld [vmem:[%s5094_s1 + $0x504] ss:$16 sps:$4 sm:$0xff]  }
  0x46   :  { %1806 = vmatprep.mubr.bf16.mxu1 %v4135_v29 }
  0x47   :  { %1736 = vmatpush1.bf16.msra.mxu0 %v3428_v30  ;;  %v3517_v30 = vld [vmem:[%s5094_s1 + $0x704] ss:$16 sps:$4 sm:$0xff]  }
  0x48   :  { %1777 = vmatpush1.bf16.msra.mxu1 %v3431_v31  ;;  %1737 = vmatprep.subr.bf16.mxu0 %v3436_v32  ;;  %v3512_v31 = vld [vmem:[%s5094_s1 + $0x500] ss:$16 sps:$4 sm:$0xff]  }
  0x49   :  { %1778 = vmatprep.subr.bf16.mxu1 %v3439_v33  ;;  %v3515_v32 = vld [vmem:[%s5094_s1 + $0x700] ss:$16 sps:$4 sm:$0xff]   ;;  %v3520_v33 = vld [vmem:[%s5094_s1 + $0xec] ss:$16 sps:$4 sm:$0xff]  }
  0x4b   :  { %1738 = vmatpush1.bf16.msra.mxu0 %v3434_v34  ;;  %v3523_v34 = vld [vmem:[%s5094_s1 + $0x2ec] ss:$16 sps:$4 sm:$0xff]  }
  0x4c   :  { %1779 = vmatpush1.bf16.msra.mxu1 %v3437_v35  ;;  %1739 = vmatprep.subr.bf16.mxu0 %v3442_v36  ;;  %v4323_v35 = vpack.c.bf16 %v4097_v14, %v4097_v14  ;;  %v4327_v36 = vpack.c.bf16 %v4099_v15, %v4099_v15  ;;  %v3526_v14 = vld [vmem:[%s5094_s1 + $0xcc] ss:$16 sps:$4 sm:$0xff]  }
  0x4d   :  { %1780 = vmatprep.subr.bf16.mxu1 %v3445_v37  ;;  %v3518_v37 = vld [vmem:[%s5094_s1 + $0xe8] ss:$16 sps:$4 sm:$0xff]   ;;  %v3529_v15 = vld [vmem:[%s5094_s1 + $0x2cc] ss:$16 sps:$4 sm:$0xff]  }
  0x4f   :  { %1740 = vmatpush1.bf16.msra.mxu0 %v3440_v38  ;;  %v3521_v38 = vld [vmem:[%s5094_s1 + $0x2e8] ss:$16 sps:$4 sm:$0xff]  }
  0x50   :  { %1781 = vmatpush1.bf16.msra.mxu1 %v3443_v39  ;;  %1741 = vmatprep.subr.bf16.mxu0 %v3448_v40  ;;  %v3524_v39 = vld [vmem:[%s5094_s1 + $0xc8] ss:$16 sps:$4 sm:$0xff]  }
  0x51   :  { %1782 = vmatprep.subr.bf16.mxu1 %v3451_v41  ;;  %v3527_v40 = vld [vmem:[%s5094_s1 + $0x2c8] ss:$16 sps:$4 sm:$0xff]   ;;  %v3532_v41 = vld [vmem:[%s5094_s1 + $0xac] ss:$16 sps:$4 sm:$0xff]  }
  0x53   :  { %1742 = vmatpush1.bf16.msra.mxu0 %v3446_v42  ;;  %v3535_v42 = vld [vmem:[%s5094_s1 + $0x2ac] ss:$16 sps:$4 sm:$0xff]  }
  0x54   :  { %1783 = vmatpush1.bf16.msra.mxu1 %v3449_v44  ;;  %1743 = vmatprep.subr.bf16.mxu0 %v3454_v45  ;;  %v3530_v44 = vld [vmem:[%s5094_s1 + $0xa8] ss:$16 sps:$4 sm:$0xff]  }
  0x55   :  { %1784 = vmatprep.subr.bf16.mxu1 %v3457_v46  ;;  %v3533_v45 = vld [vmem:[%s5094_s1 + $0x2a8] ss:$16 sps:$4 sm:$0xff]   ;;  %v3538_v46 = vld [vmem:[%s5094_s1 + $0x8c] ss:$16 sps:$4 sm:$0xff]  }
  0x57   :  { %1744 = vmatpush1.bf16.msra.mxu0 %v3452_v47  ;;  %v3539_v47 = vld [vmem:[%s5094_s1 + $0x288] ss:$16 sps:$4 sm:$0xff]  }
  0x58   :  { %1785 = vmatpush1.bf16.msra.mxu1 %v3455_v48  ;;  %1745 = vmatprep.subr.bf16.mxu0 %v3460_v49  ;;  %v3544_v48 = vld [vmem:[%s5094_s1 + $0x6c] ss:$16 sps:$4 sm:$0xff]  }
  0x59   :  { %1786 = vmatprep.subr.bf16.mxu1 %v3463_v50  ;;  %v3547_v49 = vld [vmem:[%s5094_s1 + $0x26c] ss:$16 sps:$4 sm:$0xff]   ;;  %v3542_v50 = vld [vmem:[%s5094_s1 + $0x68] ss:$16 sps:$4 sm:$0xff]  }
  0x5b   :  { %1746 = vmatpush1.bf16.msra.mxu0 %v3458_v51  ;;  %v3545_v51 = vld [vmem:[%s5094_s1 + $0x268] ss:$16 sps:$4 sm:$0xff]  }
  0x5c   :  { %1787 = vmatpush1.bf16.msra.mxu1 %v3461_v52  ;;  %1747 = vmatprep.subr.bf16.mxu0 %v3466_v53  ;;  %v3550_v52 = vld [vmem:[%s5094_s1 + $0x4c] ss:$16 sps:$4 sm:$0xff]  }
  0x5d   :  { %1788 = vmatprep.subr.bf16.mxu1 %v3469_v54  ;;  %v3553_v53 = vld [vmem:[%s5094_s1 + $0x24c] ss:$16 sps:$4 sm:$0xff]   ;;  %v3548_v54 = vld [vmem:[%s5094_s1 + $0x48] ss:$16 sps:$4 sm:$0xff]  }
  0x5f   :  { %1748 = vmatpush1.bf16.msra.mxu0 %v3464_v55  ;;  %v3551_v55 = vld [vmem:[%s5094_s1 + $0x248] ss:$16 sps:$4 sm:$0xff]  }
  0x60   :  { %1789 = vmatpush1.bf16.msra.mxu1 %v3467_v56  ;;  %1749 = vmatprep.subr.bf16.mxu0 %v3472_v57  ;;  %v3556_v56 = vld [vmem:[%s5094_s1 + $0x2c] ss:$16 sps:$4 sm:$0xff]  }
  0x61   :  { %1790 = vmatprep.subr.bf16.mxu1 %v3475_v58  ;;  %v3559_v57 = vld [vmem:[%s5094_s1 + $0x22c] ss:$16 sps:$4 sm:$0xff]   ;;  %v3554_v58 = vld [vmem:[%s5094_s1 + $0x28] ss:$16 sps:$4 sm:$0xff]  }
  0x63   :  { %1750 = vmatpush2.bf16.msra.mxu0 %v3470_v59  ;;  %v3557_v59 = vld [vmem:[%s5094_s1 + $0x228] ss:$16 sps:$4 sm:$0xff]  }
  0x64   :  { %1791 = vmatpush2.bf16.msra.mxu1 %v3473_v60  ;;  %1751 = vmatprep.subr.bf16.mxu0 %v3478_v62  ;;  %v3562_v60 = vld [vmem:[%s5094_s1 + $0xc] ss:$16 sps:$4 sm:$0xff]  }
  0x65   :  { %1792 = vmatprep.subr.bf16.mxu1 %v3481_v63  ;;  %v3565_v62 = vld [vmem:[%s5094_s1 + $0x20c] ss:$16 sps:$4 sm:$0xff]   ;;  %v3560_v63 = vld [vmem:[%s5094_s1 + $0x8] ss:$16 sps:$4 sm:$0xff]  }
  0x67   :  { %1752 = vmatpush2.bf16.msra.mxu0 %v3476_v0  ;;  %v3563_v0 = vld [vmem:[%s5094_s1 + $0x208] ss:$16 sps:$4 sm:$0xff]  }
  0x68   :  { %1793 = vmatpush2.bf16.msra.mxu1 %v3479_v1  ;;  %1753 = vmatprep.subr.bf16.mxu0 %v3484_v2  ;;  %v3568_v1 = vld [vmem:[%s5094_s1 + $0x1ec] ss:$16 sps:$4 sm:$0xff]  }
  0x69   :  { %1794 = vmatprep.subr.bf16.mxu1 %v3487_v4  ;;  %v3571_v2 = vld [vmem:[%s5094_s1 + $0x3ec] ss:$16 sps:$4 sm:$0xff]   ;;  %v3566_v4 = vld [vmem:[%s5094_s1 + $0x1e8] ss:$16 sps:$4 sm:$0xff]  }
  0x6b   :  { %1754 = vmatpush2.bf16.msra.mxu0 %v3482_v5  ;;  %v3569_v5 = vld [vmem:[%s5094_s1 + $0x3e8] ss:$16 sps:$4 sm:$0xff]  }
  0x6c   :  { %1795 = vmatpush2.bf16.msra.mxu1 %v3485_v6  ;;  %1755 = vmatprep.subr.bf16.mxu0 %v3490_v7  ;;  %v3574_v6 = vld [vmem:[%s5094_s1 + $0x1cc] ss:$16 sps:$4 sm:$0xff]  }
  0x6d   :  { %1796 = vmatprep.subr.bf16.mxu1 %v3493_v8  ;;  %v3577_v7 = vld [vmem:[%s5094_s1 + $0x3cc] ss:$16 sps:$4 sm:$0xff]   ;;  %v3572_v8 = vld [vmem:[%s5094_s1 + $0x1c8] ss:$16 sps:$4 sm:$0xff]  }
  0x6f   :  { %1756 = vmatpush2.bf16.msra.mxu0 %v3488_v9  ;;  %v3575_v9 = vld [vmem:[%s5094_s1 + $0x3c8] ss:$16 sps:$4 sm:$0xff]  }
  0x70   :  { %1797 = vmatpush2.bf16.msra.mxu1 %v3491_v10  ;;  %1757 = vmatprep.subr.bf16.mxu0 %v3496_v11  ;;  %v3580_v10 = vld [vmem:[%s5094_s1 + $0x1ac] ss:$16 sps:$4 sm:$0xff]  }
  0x71   :  { %1798 = vmatprep.subr.bf16.mxu1 %v3499_v12  ;;  %v3583_v11 = vld [vmem:[%s5094_s1 + $0x3ac] ss:$16 sps:$4 sm:$0xff]   ;;  %v3578_v12 = vld [vmem:[%s5094_s1 + $0x1a8] ss:$16 sps:$4 sm:$0xff]  }
  0x73   :  { %1758 = vmatpush2.bf16.msra.mxu0 %v3494_v13  ;;  %v3581_v13 = vld [vmem:[%s5094_s1 + $0x3a8] ss:$16 sps:$4 sm:$0xff]  }
  0x74   :  { %1799 = vmatpush2.bf16.msra.mxu1 %v3497_v16  ;;  %1759 = vmatprep.subr.bf16.mxu0 %v3502_v17  ;;  %v3586_v16 = vld [vmem:[%s5094_s1 + $0x18c] ss:$16 sps:$4 sm:$0xff]  }
  0x75   :  { %1800 = vmatprep.subr.bf16.mxu1 %v3505_v18  ;;  %v3589_v17 = vld [vmem:[%s5094_s1 + $0x38c] ss:$16 sps:$4 sm:$0xff]   ;;  %v3584_v18 = vld [vmem:[%s5094_s1 + $0x188] ss:$16 sps:$4 sm:$0xff]  }
  0x77   :  { %1760 = vmatpush2.bf16.msra.mxu0 %v3500_v19  ;;  %v3587_v19 = vld [vmem:[%s5094_s1 + $0x388] ss:$16 sps:$4 sm:$0xff]  }
  0x78   :  { %1801 = vmatpush2.bf16.msra.mxu1 %v3503_v20  ;;  %1761 = vmatprep.subr.bf16.mxu0 %v3508_v21  ;;  %v3592_v20 = vld [vmem:[%s5094_s1 + $0x16c] ss:$16 sps:$4 sm:$0xff]  }
  0x79   :  { %1802 = vmatprep.subr.bf16.mxu1 %v3511_v24  ;;  %v3595_v21 = vld [vmem:[%s5094_s1 + $0x36c] ss:$16 sps:$4 sm:$0xff]   ;;  %v3590_v24 = vld [vmem:[%s5094_s1 + $0x168] ss:$16 sps:$4 sm:$0xff]  }
  0x7b   :  { %1762 = vmatpush2.bf16.msra.mxu0 %v3506_v25  ;;  %v3593_v25 = vld [vmem:[%s5094_s1 + $0x368] ss:$16 sps:$4 sm:$0xff]  }
  0x7c   :  { %1803 = vmatpush2.bf16.msra.mxu1 %v3509_v26  ;;  %1763 = vmatprep.subr.bf16.mxu0 %v3514_v27  ;;  %v3598_v26 = vld [vmem:[%s5094_s1 + $0x14c] ss:$16 sps:$4 sm:$0xff]  }
  0x7d   :  { %1804 = vmatprep.subr.bf16.mxu1 %v3517_v30  ;;  %v3601_v27 = vld [vmem:[%s5094_s1 + $0x34c] ss:$16 sps:$4 sm:$0xff]   ;;  %v3596_v30 = vld [vmem:[%s5094_s1 + $0x148] ss:$16 sps:$4 sm:$0xff]  }
  0x7f   :  { %1764 = vmatpush2.bf16.msra.mxu0 %v3512_v31  ;;  %v3599_v31 = vld [vmem:[%s5094_s1 + $0x348] ss:$16 sps:$4 sm:$0xff]  }
  0x80   :  { %1805 = vmatpush2.bf16.msra.mxu1 %v3515_v32  ;;  %1815 = vmatprep.subr.bf16.mxu0 %v3520_v33  ;;  %v3604_v32 = vld [vmem:[%s5094_s1 + $0x12c] ss:$16 sps:$4 sm:$0xff]  }
  0x81   :  { %1856 = vmatprep.subr.bf16.mxu1 %v3523_v34  ;;  %v3607_v33 = vld [vmem:[%s5094_s1 + $0x32c] ss:$16 sps:$4 sm:$0xff]   ;;  %v3602_v34 = vld [vmem:[%s5094_s1 + $0x128] ss:$16 sps:$4 sm:$0xff]  }
  0x82   :  { %1766 = vmatmul.mubr.bf16.vlgmr.msra.gmra.mxu0 %v4323_v35 }
  0x83   :  { %1807 = vmatmul.mubr.bf16.vlgmr.msra.gmra.mxu1 %v4327_v36  ;;  %1816 = vmatpush1.bf16.msra.mxu0 %v3518_v37  ;;  %v3605_v37 = vld [vmem:[%s5094_s1 + $0x328] ss:$16 sps:$4 sm:$0xff]  }
  0x84   :  { %1857 = vmatpush1.bf16.msra.mxu1 %v3521_v38  ;;  %1817 = vmatprep.subr.bf16.mxu0 %v3526_v14  ;;  %v3610_v38 = vld [vmem:[%s5094_s1 + $0x10c] ss:$16 sps:$4 sm:$0xff]  }
  0x85   :  { %1858 = vmatprep.subr.bf16.mxu1 %v3529_v15  ;;  %1847 = vmatprep.mubr.bf16.mxu0 %v4052_v61  ;;  %v3541_v61 = vld [vmem:[%s5094_s1 + $0x28c] ss:$16 sps:$4 sm:$0xff]   ;;  %v3608_v15 = vld [vmem:[%s5094_s1 + $0x108] ss:$16 sps:$4 sm:$0xff]  }
  0x86   :  { %1888 = vmatprep.mubr.bf16.mxu1 %v4066_v3  ;;  %v3536_v3 = vld [vmem:[%s5094_s1 + $0x88] ss:$16 sps:$4 sm:$0xff]   ;;  %v3613_v14 = vld [vmem:[%s5094_s1 + $0x30c] ss:$16 sps:$4 sm:$0xff]  }
  0x87   :  { %1818 = vmatpush1.bf16.msra.mxu0 %v3524_v39  ;;  %v3611_v39 = vld [vmem:[%s5094_s1 + $0x308] ss:$16 sps:$4 sm:$0xff]  }
  0x88   :  { %1859 = vmatpush1.bf16.msra.mxu1 %v3527_v40  ;;  %1819 = vmatprep.subr.bf16.mxu0 %v3532_v41  ;;  %v3616_v40 = vld [vmem:[%s5094_s1 + $0x4ec] ss:$16 sps:$4 sm:$0xff]  }
  0x89   :  { %1860 = vmatprep.subr.bf16.mxu1 %v3535_v42  ;;  %v3619_v41 = vld [vmem:[%s5094_s1 + $0x6ec] ss:$16 sps:$4 sm:$0xff]   ;;  %v3614_v42 = vld [vmem:[%s5094_s1 + $0x4e8] ss:$16 sps:$4 sm:$0xff]  }
  0x8b   :  { %1820 = vmatpush1.bf16.msra.mxu0 %v3530_v44  ;;  %v3617_v44 = vld [vmem:[%s5094_s1 + $0x6e8] ss:$16 sps:$4 sm:$0xff]  }
  0x8c   :  { %1861 = vmatpush1.bf16.msra.mxu1 %v3533_v45  ;;  %1821 = vmatprep.subr.bf16.mxu0 %v3538_v46  ;;  %v3622_v45 = vld [vmem:[%s5094_s1 + $0x4cc] ss:$16 sps:$4 sm:$0xff]  }
  0x8d   :  { %1862 = vmatprep.subr.bf16.mxu1 %v3541_v61  ;;  %v3625_v46 = vld [vmem:[%s5094_s1 + $0x6cc] ss:$16 sps:$4 sm:$0xff]   ;;  %v3620_v61 = vld [vmem:[%s5094_s1 + $0x4c8] ss:$16 sps:$4 sm:$0xff]  }
  0x8f   :  { %1822 = vmatpush1.bf16.msra.mxu0 %v3536_v3  ;;  %v3623_v3 = vld [vmem:[%s5094_s1 + $0x6c8] ss:$16 sps:$4 sm:$0xff]  }
  0x90   :  { %1863 = vmatpush1.bf16.msra.mxu1 %v3539_v47  ;;  %1823 = vmatprep.subr.bf16.mxu0 %v3544_v48  ;;  %v3628_v47 = vld [vmem:[%s5094_s1 + $0x4ac] ss:$16 sps:$4 sm:$0xff]   ;;  %v3629_v48 = vld [vmem:[%s5094_s1 + $0x6a8] ss:$16 sps:$4 sm:$0xff]  }
  0x91   :  { %1864 = vmatprep.subr.bf16.mxu1 %v3547_v49  ;;  %v3634_v49 = vld [vmem:[%s5094_s1 + $0x48c] ss:$16 sps:$4 sm:$0xff]  }
  0x93   :  { %1824 = vmatpush1.bf16.msra.mxu0 %v3542_v50  ;;  %v3635_v50 = vld [vmem:[%s5094_s1 + $0x688] ss:$16 sps:$4 sm:$0xff]  }
  0x94   :  { %1865 = vmatpush1.bf16.msra.mxu1 %v3545_v51  ;;  %1825 = vmatprep.subr.bf16.mxu0 %v3550_v52  ;;  %v3640_v51 = vld [vmem:[%s5094_s1 + $0x46c] ss:$16 sps:$4 sm:$0xff]  }
  0x95   :  { %1866 = vmatprep.subr.bf16.mxu1 %v3553_v53  ;;  %v3643_v52 = vld [vmem:[%s5094_s1 + $0x66c] ss:$16 sps:$4 sm:$0xff]   ;;  %v3638_v53 = vld [vmem:[%s5094_s1 + $0x468] ss:$16 sps:$4 sm:$0xff]  }
  0x97   :  { %1826 = vmatpush1.bf16.msra.mxu0 %v3548_v54  ;;  %v3641_v54 = vld [vmem:[%s5094_s1 + $0x668] ss:$16 sps:$4 sm:$0xff]  }
  0x98   :  { %1867 = vmatpush1.bf16.msra.mxu1 %v3551_v55  ;;  %1827 = vmatprep.subr.bf16.mxu0 %v3556_v56  ;;  %v3646_v55 = vld [vmem:[%s5094_s1 + $0x44c] ss:$16 sps:$4 sm:$0xff]  }
  0x99   :  { %1868 = vmatprep.subr.bf16.mxu1 %v3559_v57  ;;  %v3649_v56 = vld [vmem:[%s5094_s1 + $0x64c] ss:$16 sps:$4 sm:$0xff]   ;;  %v3644_v57 = vld [vmem:[%s5094_s1 + $0x448] ss:$16 sps:$4 sm:$0xff]  }
  0x9b   :  { %1828 = vmatpush1.bf16.msra.mxu0 %v3554_v58  ;;  %v3647_v58 = vld [vmem:[%s5094_s1 + $0x648] ss:$16 sps:$4 sm:$0xff]  }
  0x9c   :  { %1869 = vmatpush1.bf16.msra.mxu1 %v3557_v59  ;;  %1829 = vmatprep.subr.bf16.mxu0 %v3562_v60  ;;  %v3652_v59 = vld [vmem:[%s5094_s1 + $0x42c] ss:$16 sps:$4 sm:$0xff]  }
  0x9d   :  { %1870 = vmatprep.subr.bf16.mxu1 %v3565_v62  ;;  %v3655_v60 = vld [vmem:[%s5094_s1 + $0x62c] ss:$16 sps:$4 sm:$0xff]   ;;  %v3650_v62 = vld [vmem:[%s5094_s1 + $0x428] ss:$16 sps:$4 sm:$0xff]  }
  0x9f   :  { %1830 = vmatpush1.bf16.msra.mxu0 %v3560_v63  ;;  %v3653_v63 = vld [vmem:[%s5094_s1 + $0x628] ss:$16 sps:$4 sm:$0xff]  }
  0xa0   :  { %1871 = vmatpush1.bf16.msra.mxu1 %v3563_v0  ;;  %1831 = vmatprep.subr.bf16.mxu0 %v3568_v1  ;;  %v3658_v0 = vld [vmem:[%s5094_s1 + $0x40c] ss:$16 sps:$4 sm:$0xff]  }
  0xa1   :  { %1872 = vmatprep.subr.bf16.mxu1 %v3571_v2  ;;  %v3661_v1 = vld [vmem:[%s5094_s1 + $0x60c] ss:$16 sps:$4 sm:$0xff]   ;;  %v3656_v2 = vld [vmem:[%s5094_s1 + $0x408] ss:$16 sps:$4 sm:$0xff]  }
  0xa3   :  { %1832 = vmatpush2.bf16.msra.mxu0 %v3566_v4  ;;  %v3659_v4 = vld [vmem:[%s5094_s1 + $0x608] ss:$16 sps:$4 sm:$0xff]  }
  0xa4   :  { %1873 = vmatpush2.bf16.msra.mxu1 %v3569_v5  ;;  %1833 = vmatprep.subr.bf16.mxu0 %v3574_v6  ;;  %v3664_v5 = vld [vmem:[%s5094_s1 + $0x5ec] ss:$16 sps:$4 sm:$0xff]  }
  0xa5   :  { %1874 = vmatprep.subr.bf16.mxu1 %v3577_v7  ;;  %v3667_v6 = vld [vmem:[%s5094_s1 + $0x7ec] ss:$16 sps:$4 sm:$0xff]   ;;  %v3662_v7 = vld [vmem:[%s5094_s1 + $0x5e8] ss:$16 sps:$4 sm:$0xff]  }
  0xa7   :  { %1834 = vmatpush2.bf16.msra.mxu0 %v3572_v8  ;;  %v3665_v8 = vld [vmem:[%s5094_s1 + $0x7e8] ss:$16 sps:$4 sm:$0xff]  }
  0xa8   :  { %1875 = vmatpush2.bf16.msra.mxu1 %v3575_v9  ;;  %1835 = vmatprep.subr.bf16.mxu0 %v3580_v10  ;;  %v3670_v9 = vld [vmem:[%s5094_s1 + $0x5cc] ss:$16 sps:$4 sm:$0xff]  }
  0xa9   :  { %1876 = vmatprep.subr.bf16.mxu1 %v3583_v11  ;;  %v3673_v10 = vld [vmem:[%s5094_s1 + $0x7cc] ss:$16 sps:$4 sm:$0xff]   ;;  %v3668_v11 = vld [vmem:[%s5094_s1 + $0x5c8] ss:$16 sps:$4 sm:$0xff]  }
  0xab   :  { %1836 = vmatpush2.bf16.msra.mxu0 %v3578_v12  ;;  %v3671_v12 = vld [vmem:[%s5094_s1 + $0x7c8] ss:$16 sps:$4 sm:$0xff]  }
  0xac   :  { %1877 = vmatpush2.bf16.msra.mxu1 %v3581_v13  ;;  %1837 = vmatprep.subr.bf16.mxu0 %v3586_v16  ;;  %v3676_v13 = vld [vmem:[%s5094_s1 + $0x5ac] ss:$16 sps:$4 sm:$0xff]  }
  0xad   :  { %1878 = vmatprep.subr.bf16.mxu1 %v3589_v17  ;;  %v3679_v16 = vld [vmem:[%s5094_s1 + $0x7ac] ss:$16 sps:$4 sm:$0xff]   ;;  %v3674_v17 = vld [vmem:[%s5094_s1 + $0x5a8] ss:$16 sps:$4 sm:$0xff]  }
  0xaf   :  { %1838 = vmatpush2.bf16.msra.mxu0 %v3584_v18  ;;  %v3677_v18 = vld [vmem:[%s5094_s1 + $0x7a8] ss:$16 sps:$4 sm:$0xff]  }
  0xb0   :  { %1879 = vmatpush2.bf16.msra.mxu1 %v3587_v19  ;;  %1839 = vmatprep.subr.bf16.mxu0 %v3592_v20  ;;  %v3682_v19 = vld [vmem:[%s5094_s1 + $0x58c] ss:$16 sps:$4 sm:$0xff]  }
  0xb1   :  { %1880 = vmatprep.subr.bf16.mxu1 %v3595_v21  ;;  %v3685_v20 = vld [vmem:[%s5094_s1 + $0x78c] ss:$16 sps:$4 sm:$0xff]   ;;  %v3680_v21 = vld [vmem:[%s5094_s1 + $0x588] ss:$16 sps:$4 sm:$0xff]  }
  0xb3   :  { %1840 = vmatpush2.bf16.msra.mxu0 %v3590_v24  ;;  %v3683_v24 = vld [vmem:[%s5094_s1 + $0x788] ss:$16 sps:$4 sm:$0xff]  }
  0xb4   :  { %1881 = vmatpush2.bf16.msra.mxu1 %v3593_v25  ;;  %1841 = vmatprep.subr.bf16.mxu0 %v3598_v26  ;;  %v3688_v25 = vld [vmem:[%s5094_s1 + $0x56c] ss:$16 sps:$4 sm:$0xff]  }
  0xb5   :  { %1882 = vmatprep.subr.bf16.mxu1 %v3601_v27  ;;  %v3691_v26 = vld [vmem:[%s5094_s1 + $0x76c] ss:$16 sps:$4 sm:$0xff]   ;;  %v3686_v27 = vld [vmem:[%s5094_s1 + $0x568] ss:$16 sps:$4 sm:$0xff]  }
  0xb7   :  { %1842 = vmatpush2.bf16.msra.mxu0 %v3596_v30  ;;  %v3689_v30 = vld [vmem:[%s5094_s1 + $0x768] ss:$16 sps:$4 sm:$0xff]  }
  0xb8   :  { %1883 = vmatpush2.bf16.msra.mxu1 %v3599_v31  ;;  %1843 = vmatprep.subr.bf16.mxu0 %v3604_v32  ;;  %v3694_v31 = vld [vmem:[%s5094_s1 + $0x54c] ss:$16 sps:$4 sm:$0xff]  }
  0xb9   :  { %1884 = vmatprep.subr.bf16.mxu1 %v3607_v33  ;;  %v3697_v32 = vld [vmem:[%s5094_s1 + $0x74c] ss:$16 sps:$4 sm:$0xff]   ;;  %v3692_v33 = vld [vmem:[%s5094_s1 + $0x548] ss:$16 sps:$4 sm:$0xff]  }
  0xbb   :  { %1844 = vmatpush2.bf16.msra.mxu0 %v3602_v34  ;;  %v3695_v34 = vld [vmem:[%s5094_s1 + $0x748] ss:$16 sps:$4 sm:$0xff]  }
  0xbc   :  { %1885 = vmatpush2.bf16.msra.mxu1 %v3605_v37  ;;  %1845 = vmatprep.subr.bf16.mxu0 %v3610_v38  ;;  %v3700_v37 = vld [vmem:[%s5094_s1 + $0x52c] ss:$16 sps:$4 sm:$0xff]  }
  0xbd   :  { %1886 = vmatprep.subr.bf16.mxu1 %v3613_v14  ;;  %v3703_v38 = vld [vmem:[%s5094_s1 + $0x72c] ss:$16 sps:$4 sm:$0xff]   ;;  %v3698_v14 = vld [vmem:[%s5094_s1 + $0x528] ss:$16 sps:$4 sm:$0xff]  }
  0xbf   :  { %1846 = vmatpush2.bf16.msra.mxu0 %v3608_v15  ;;  %v3701_v15 = vld [vmem:[%s5094_s1 + $0x728] ss:$16 sps:$4 sm:$0xff]  }
  0xc0   :  { %1887 = vmatpush2.bf16.msra.mxu1 %v3611_v39  ;;  %1897 = vmatprep.subr.bf16.mxu0 %v3616_v40  ;;  %v3706_v39 = vld [vmem:[%s5094_s1 + $0x50c] ss:$16 sps:$4 sm:$0xff]  }
  0xc1   :  { %1938 = vmatprep.subr.bf16.mxu1 %v3619_v41  ;;  %v3709_v40 = vld [vmem:[%s5094_s1 + $0x70c] ss:$16 sps:$4 sm:$0xff]   ;;  %v3704_v41 = vld [vmem:[%s5094_s1 + $0x508] ss:$16 sps:$4 sm:$0xff]  }
  0xc2   :  { %1848 = vmatmul.mubr.bf16.vlgmr.msra.gmra.mxu0 %v4117_v22  ;;  %v3631_v22 = vld [vmem:[%s5094_s1 + $0x6ac] ss:$16 sps:$4 sm:$0xff]  }
  0xc3   :  { %1889 = vmatmul.mubr.bf16.vlgmr.msra.gmra.mxu1 %v4119_v23  ;;  %1898 = vmatpush1.bf16.msra.mxu0 %v3614_v42  ;;  %v3626_v23 = vld [vmem:[%s5094_s1 + $0x4a8] ss:$16 sps:$4 sm:$0xff]  }
  0xc4   :  { %1939 = vmatpush1.bf16.msra.mxu1 %v3617_v44  ;;  %1899 = vmatprep.subr.bf16.mxu0 %v3622_v45  ;;  %v3707_v42 = vld [vmem:[%s5094_s1 + $0x708] ss:$16 sps:$4 sm:$0xff]   ;;  %v4716_v44 = vsub.s32 0, %v4013_v43  ;;  %v4721_v45 = vld [vmem:[%s5096_s2] sm:$0xf] }
  0xc5   :  { %1940 = vmatprep.subr.bf16.mxu1 %v3625_v46  ;;  %1929 = vmatprep.mubr.bf16.mxu0 %v4133_v28  ;;  %v3637_v28 = vld [vmem:[%s5094_s1 + $0x68c] ss:$16 sps:$4 sm:$0xff]   ;;  %v4724_v46 = vsub.s32 1, %v4013_v43 }
  0xc6   :  { %1970 = vmatprep.mubr.bf16.mxu1 %v4135_v29  ;;  %v3632_v29 = vld [vmem:[%s5094_s1 + $0x488] ss:$16 sps:$4 sm:$0xff]  }
  0xc7   :  { %1900 = vmatpush1.bf16.msra.mxu0 %v3620_v61  ;;  %v354_v61 = vrot.slane %v4721_v45, %v4716_v44 }
  0xc8   :  { %1941 = vmatpush1.bf16.msra.mxu1 %v3623_v3  ;;  %1901 = vmatprep.subr.bf16.mxu0 %v3628_v47  ;;  %v358_v3 = vrot.slane %v4721_v45, %v4724_v46 }
  0xc9   :  { %1942 = vmatprep.subr.bf16.mxu1 %v3631_v22 }
  0xcb   :  { %1902 = vmatpush1.bf16.msra.mxu0 %v3626_v23 }
  0xcc   :  { %1943 = vmatpush1.bf16.msra.mxu1 %v3629_v48  ;;  %1903 = vmatprep.subr.bf16.mxu0 %v3634_v49 }
  0xcd   :  { %1944 = vmatprep.subr.bf16.mxu1 %v3637_v28 }
  0xcf   :  { %1904 = vmatpush1.bf16.msra.mxu0 %v3632_v29 }
  0xd0   :  { %1945 = vmatpush1.bf16.msra.mxu1 %v3635_v50  ;;  %1905 = vmatprep.subr.bf16.mxu0 %v3640_v51 }
  0xd1   :  { %1946 = vmatprep.subr.bf16.mxu1 %v3643_v52 }
  0xd3   :  { %1906 = vmatpush1.bf16.msra.mxu0 %v3638_v53 }
  0xd4   :  { %1947 = vmatpush1.bf16.msra.mxu1 %v3641_v54  ;;  %1907 = vmatprep.subr.bf16.mxu0 %v3646_v55 }
  0xd5   :  { %1948 = vmatprep.subr.bf16.mxu1 %v3649_v56 }
  0xd7   :  { %1908 = vmatpush1.bf16.msra.mxu0 %v3644_v57 }
  0xd8   :  { %1949 = vmatpush1.bf16.msra.mxu1 %v3647_v58  ;;  %1909 = vmatprep.subr.bf16.mxu0 %v3652_v59  ;;  %v3712_v58 = vld [vmem:[%s5097_s5 + $0x74] ss:$8 sps:$4 sm:$0xff]   ;;  %v3710_v59 = vld [vmem:[%s5097_s5 + $0x70] ss:$8 sps:$4 sm:$0xff]  }
  0xd9   :  { %1950 = vmatprep.subr.bf16.mxu1 %v3655_v60 }
  0xdb   :  { %1910 = vmatpush1.bf16.msra.mxu0 %v3650_v62 }
  0xdc   :  { %1951 = vmatpush1.bf16.msra.mxu1 %v3653_v63  ;;  %1911 = vmatprep.subr.bf16.mxu0 %v3658_v0  ;;  %v3713_v63 = vld [vmem:[%s5097_s5 + $0x170] ss:$8 sps:$4 sm:$0xff]   ;;  %v3715_v0 = vld [vmem:[%s5097_s5 + $0x174] ss:$8 sps:$4 sm:$0xff]  }
  0xdd   :  { %1952 = vmatprep.subr.bf16.mxu1 %v3661_v1 }
  0xdf   :  { %1912 = vmatpush1.bf16.msra.mxu0 %v3656_v2 }
  0xe0   :  { %1953 = vmatpush1.bf16.msra.mxu1 %v3659_v4  ;;  %1913 = vmatprep.subr.bf16.mxu0 %v3664_v5 }
  0xe1   :  { %1954 = vmatprep.subr.bf16.mxu1 %v3667_v6 }
  0xe3   :  { %1914 = vmatpush2.bf16.msra.mxu0 %v3662_v7  ;;  %v3718_v7 = vld [vmem:[%s5097_s5 + $0x64] ss:$8 sps:$4 sm:$0xff]  }
  0xe4   :  { %1955 = vmatpush2.bf16.msra.mxu1 %v3665_v8  ;;  %1915 = vmatprep.subr.bf16.mxu0 %v3670_v9  ;;  %v3721_v8 = vld [vmem:[%s5097_s5 + $0x164] ss:$8 sps:$4 sm:$0xff]  }
  0xe5   :  { %1956 = vmatprep.subr.bf16.mxu1 %v3673_v10 }
  0xe7   :  { %1916 = vmatpush2.bf16.msra.mxu0 %v3668_v11 }
  0xe8   :  { %1957 = vmatpush2.bf16.msra.mxu1 %v3671_v12  ;;  %1917 = vmatprep.subr.bf16.mxu0 %v3676_v13  ;;  %v3716_v12 = vld [vmem:[%s5097_s5 + $0x60] ss:$8 sps:$4 sm:$0xff]  }
  0xe9   :  { %1958 = vmatprep.subr.bf16.mxu1 %v3679_v16  ;;  %v3719_v13 = vld [vmem:[%s5097_s5 + $0x160] ss:$8 sps:$4 sm:$0xff]  }
  0xeb   :  { %1918 = vmatpush2.bf16.msra.mxu0 %v3674_v17 }
  0xec   :  { %1959 = vmatpush2.bf16.msra.mxu1 %v3677_v18  ;;  %1919 = vmatprep.subr.bf16.mxu0 %v3682_v19 }
  0xed   :  { %1960 = vmatprep.subr.bf16.mxu1 %v3685_v20 }
  0xef   :  { %1920 = vmatpush2.bf16.msra.mxu0 %v3680_v21 }
  0xf0   :  { %1961 = vmatpush2.bf16.msra.mxu1 %v3683_v24  ;;  %1921 = vmatprep.subr.bf16.mxu0 %v3688_v25  ;;  %v3724_v25 = vld [vmem:[%s5097_s5 + $0x54] ss:$8 sps:$4 sm:$0xff]  }
  0xf1   :  { %1962 = vmatprep.subr.bf16.mxu1 %v3691_v26  ;;  %v3727_v26 = vld [vmem:[%s5097_s5 + $0x154] ss:$8 sps:$4 sm:$0xff]  }
  0xf3   :  { %1922 = vmatpush2.bf16.msra.mxu0 %v3686_v27 }
  0xf4   :  { %1963 = vmatpush2.bf16.msra.mxu1 %v3689_v30  ;;  %1923 = vmatprep.subr.bf16.mxu0 %v3694_v31 }
  0xf5   :  { %1964 = vmatprep.subr.bf16.mxu1 %v3697_v32 }
  0xf7   :  { %1924 = vmatpush2.bf16.msra.mxu0 %v3692_v33  ;;  %v3722_v33 = vld [vmem:[%s5097_s5 + $0x50] ss:$8 sps:$4 sm:$0xff]  }
  0xf8   :  { %1965 = vmatpush2.bf16.msra.mxu1 %v3695_v34  ;;  %1925 = vmatprep.subr.bf16.mxu0 %v3700_v37  ;;  %v3725_v34 = vld [vmem:[%s5097_s5 + $0x150] ss:$8 sps:$4 sm:$0xff]  }
  0xf9   :  { %1966 = vmatprep.subr.bf16.mxu1 %v3703_v38 }
  0xfb   :  { %1926 = vmatpush2.bf16.msra.mxu0 %v3698_v14 }
  0xfc   :  { %1967 = vmatpush2.bf16.msra.mxu1 %v3701_v15  ;;  %1927 = vmatprep.subr.bf16.mxu0 %v3706_v39  ;;  %v3730_v39 = vld [vmem:[%s5097_s5 + $0x44] ss:$8 sps:$4 sm:$0xff]  }
  0xfd   :  { %1968 = vmatprep.subr.bf16.mxu1 %v3709_v40  ;;  %v3733_v40 = vld [vmem:[%s5097_s5 + $0x144] ss:$8 sps:$4 sm:$0xff]  }
  0xff   :  { %1928 = vmatpush2.bf16.msra.mxu0 %v3704_v41 }
 0x100   :  { %1969 = vmatpush2.bf16.msra.mxu1 %v3707_v42  ;;  %2585 = vmatprep.subr.bf16.mxu0 %v3712_v58 }
 0x101   :  { %2626 = vmatprep.subr.bf16.mxu1 %v3715_v0 }
 0x102   :  { %v1685_v47 = vpop.f32.mrf.mxu0  ;;  %1930 = vmatmul.mubr.bf16.vlgmr.msra.gmra.mxu0 %v4323_v35 }
 0x103   :  { %v1726_v22 = vpop.f32.mrf.mxu1  ;;  %1971 = vmatmul.mubr.bf16.vlgmr.msra.gmra.mxu1 %v4327_v36  ;;  %v1686_v23 = vadd.f32 %v1685_v47, %v354_v61  ;;  %2586 = vmatpush1.bf16.msra.mxu0 %v3710_v59  ;;  %v3728_v47 = vld [vmem:[%s5097_s5 + $0x40] ss:$8 sps:$4 sm:$0xff]   ;;  %v3742_v59 = vld [vmem:[%s5097_s5 + $0x24] ss:$8 sps:$4 sm:$0xff]  }
 0x104   :  { %v1687_v48 = vpop.f32.mrf.mxu0  ;;  %2627 = vmatpush1.bf16.msra.mxu1 %v3713_v63  ;;  %2587 = vmatprep.subr.bf16.mxu0 %v3718_v7 }
 0x105   :  { %v1728_v49 = vpop.f32.mrf.mxu1  ;;  %v1727_v28 = vadd.f32 %v1726_v22, %v1686_v23  ;;  %v1688_v29 = vadd.f32 %v1687_v48, %v358_v3  ;;  %2628 = vmatprep.subr.bf16.mxu1 %v3721_v8  ;;  %v3731_v22 = vld [vmem:[%s5097_s5 + $0x140] ss:$8 sps:$4 sm:$0xff]  }
 0x106   :  { %v1689_v50 = vpop.f32.mrf.mxu0 }
 0x107   :  { %v1730_v51 = vpop.f32.mrf.mxu1  ;;  %v1729_v52 = vadd.f32 %v1728_v49, %v1688_v29  ;;  %2588 = vmatpush1.bf16.msra.mxu0 %v3716_v12  ;;  %v3736_v29 = vld [vmem:[%s5097_s5 + $0x34] ss:$8 sps:$4 sm:$0xff]  }
 0x108   :  { %v1690_v53 = vpop.f32.mrf.mxu0  ;;  %2629 = vmatpush1.bf16.msra.mxu1 %v3719_v13  ;;  %2589 = vmatprep.subr.bf16.mxu0 %v3724_v25  ;;  %v3739_v50 = vld [vmem:[%s5097_s5 + $0x134] ss:$8 sps:$4 sm:$0xff]   ;;  %v3746_v13 = vld [vmem:[%s5097_s5 + $0x10] ss:$8 sps:$4 sm:$0xff]  }
 0x109   :  { %v1731_v54 = vpop.f32.mrf.mxu1  ;;  %2630 = vmatprep.subr.bf16.mxu1 %v3727_v26  ;;  %v3763_v25 = vld [vmem:[%s5097_s5 + $0x1f4] ss:$8 sps:$4 sm:$0xff]   ;;  %v3758_v26 = vld [vmem:[%s5097_s5 + $0xf0] ss:$8 sps:$4 sm:$0xff]  }
 0x10b   :  { %2590 = vmatpush1.bf16.msra.mxu0 %v3722_v33  ;;  %v3767_v33 = vld [vmem:[%s5097_s5 + $0x1e0] ss:$8 sps:$4 sm:$0xff]  }
 0x10c   :  { %2631 = vmatpush1.bf16.msra.mxu1 %v3725_v34  ;;  %2591 = vmatprep.subr.bf16.mxu0 %v3730_v39  ;;  %v3772_v34 = vld [vmem:[%s5097_s5 + $0xd4] ss:$8 sps:$4 sm:$0xff]  }
 0x10d   :  { %2632 = vmatprep.subr.bf16.mxu1 %v3733_v40 }
 0x10f   :  { %2592 = vmatpush1.bf16.msra.mxu0 %v3728_v47  ;;  %v3784_v47 = vld [vmem:[%s5097_s5 + $0xb4] ss:$8 sps:$4 sm:$0xff]  }
 0x110   :  { %2633 = vmatpush1.bf16.msra.mxu1 %v3731_v22  ;;  %2593 = vmatprep.subr.bf16.mxu0 %v3736_v29  ;;  %v3787_v22 = vld [vmem:[%s5097_s5 + $0x1b4] ss:$8 sps:$4 sm:$0xff]   ;;  %v3788_v29 = vld [vmem:[%s5097_s5 + $0xa0] ss:$8 sps:$4 sm:$0xff]  }
 0x111   :  { %2634 = vmatprep.subr.bf16.mxu1 %v3739_v50  ;;  %v3791_v50 = vld [vmem:[%s5097_s5 + $0x1a0] ss:$8 sps:$4 sm:$0xff]  }
 0x142   :  { %v1767_v55 = vpop.f32.mrf.mxu0 }
 0x143   :  { %v1808_v56 = vpop.f32.mrf.mxu1  ;;  %v1768_v57 = vadd.f32 %v1767_v55, %v1727_v28  ;;  %v3734_v55 = vld [vmem:[%s5097_s5 + $0x30] ss:$8 sps:$4 sm:$0xff]  }
 0x144   :  { %v1769_v35 = vpop.f32.mrf.mxu0  ;;  %2594 = vmatpush1.bf16.msra.mxu0 %v3734_v55  ;;  %v3802_v55 = vld [vmem:[%s5097_s5 + $0x84] ss:$8 sps:$4 sm:$0xff]  }
 0x145   :  { %v1810_v36 = vpop.f32.mrf.mxu1  ;;  %v4738_v60 = vadd.f32 %v1808_v56, %v1768_v57  ;;  %v1770_v62 = vadd.f32 %v1769_v35, %v1729_v52  ;;  %v3737_v56 = vld [vmem:[%s5097_s5 + $0x130] ss:$8 sps:$4 sm:$0xff]   ;;  %2595 = vmatprep.subr.bf16.mxu0 %v3742_v59 }
 0x146   :  { %v1771_v1 = vpop.f32.mrf.mxu0  ;;  %2635 = vmatpush1.bf16.msra.mxu1 %v3737_v56  ;;  %v3797_v56 = vld [vmem:[%s5097_s5 + $0x190] ss:$8 sps:$4 sm:$0xff]  }
 0x147   :  { %v1812_v2 = vpop.f32.mrf.mxu1  ;;  %v1980_v4 = vsel %vm1979_vm0, %v4738_v60, 0.0  ;;  %v2012_v5 = vmul.f32 %v4738_v60, %v4738_v60  ;;  %v4750_v6 = vadd.f32 %v1810_v36, %v1770_v62  ;;  %v3745_v62 = vld [vmem:[%s5097_s5 + $0x124] ss:$8 sps:$4 sm:$0xff]  }
 0x148   :  { %v1981_v9 = vrot.slane %v1980_v4, 4  ;;  %v1772_v10 = vpop.f32.mrf.mxu0  ;;  %2636 = vmatprep.subr.bf16.mxu1 %v3745_v62 }
 0x149   :  { %v1813_v11 = vpop.f32.mrf.mxu1  ;;  %v2016_v16 = vsel %vm1979_vm0, %v2012_v5, 0.0  ;;  %v1987_v17 = vsel %vm1979_vm0, %v4750_v6, 0.0  ;;  %v2013_v18 = vmul.f32 %v4750_v6, %v4750_v6  ;;  %v3743_v5 = vld [vmem:[%s5097_s5 + $0x120] ss:$8 sps:$4 sm:$0xff]   ;;  %v3751_v10 = vld [vmem:[%s5097_s5 + $0x114] ss:$8 sps:$4 sm:$0xff]  }
 0x14a   :  { %v1982_v19 = vadd.f32 %v1981_v9, %v1980_v4  ;;  %v2017_v20 = vrot.slane %v2016_v16, 4  ;;  %v1988_v21 = vrot.slane %v1987_v17, 4  ;;  %v3740_v4 = vld [vmem:[%s5097_s5 + $0x20] ss:$8 sps:$4 sm:$0xff]   ;;  %v3748_v9 = vld [vmem:[%s5097_s5 + $0x14] ss:$8 sps:$4 sm:$0xff]   ;;  %2637 = vmatpush1.bf16.msra.mxu1 %v3743_v5 }
 0x14b   :  { %v2023_v24 = vsel %vm1979_vm0, %v2013_v18, 0.0  ;;  %2596 = vmatpush1.bf16.msra.mxu0 %v3740_v4  ;;  %2638 = vmatprep.subr.bf16.mxu1 %v3751_v10  ;;  %v3754_v18 = vld [vmem:[%s5097_s5 + $0x4] ss:$8 sps:$4 sm:$0xff]  }
 0x14c   :  { %v1983_v27 = vrot.slane %v1982_v19, 2  ;;  %v2018_v30 = vadd.f32 %v2017_v20, %v2016_v16  ;;  %v1989_v31 = vadd.f32 %v1988_v21, %v1987_v17  ;;  %v2024_v32 = vrot.slane %v2023_v24, 4  ;;  %2597 = vmatprep.subr.bf16.mxu0 %v3748_v9  ;;  %v3749_v16 = vld [vmem:[%s5097_s5 + $0x110] ss:$8 sps:$4 sm:$0xff]   ;;  %v3752_v20 = vld [vmem:[%s5097_s5] ss:$8 sps:$4 sm:$0xff]  }
 0x14d   :  { %v3755_v21 = vld [vmem:[%s5097_s5 + $0x100] ss:$8 sps:$4 sm:$0xff]   ;;  %v4958_v9 = vsub.s32 3, %v4013_v43 }
 0x14e   :  { %v1984_v37 = vadd.f32 %v1983_v27, %v1982_v19  ;;  %v2019_v38 = vrot.slane %v2018_v30, 2  ;;  %v1990_v14 = vrot.slane %v1989_v31, 2  ;;  %v2025_v15 = vadd.f32 %v2024_v32, %v2023_v24  ;;  %v3757_v19 = vld [vmem:[%s5097_s5 + $0x104] ss:$8 sps:$4 sm:$0xff]   ;;  %2639 = vmatpush1.bf16.msra.mxu1 %v3749_v16  ;;  %v3760_v24 = vld [vmem:[%s5097_s5 + $0xf4] ss:$8 sps:$4 sm:$0xff]  }
 0x14f   :  { %2598 = vmatpush1.bf16.msra.mxu0 %v3746_v13  ;;  %2640 = vmatprep.subr.bf16.mxu1 %v3757_v19  ;;  %v3761_v27 = vld [vmem:[%s5097_s5 + $0x1f0] ss:$8 sps:$4 sm:$0xff]   ;;  %v3764_v32 = vld [vmem:[%s5097_s5 + $0xe0] ss:$8 sps:$4 sm:$0xff]  }
 0x150   :  { %v1985_v41 = vrot.slane %v1984_v37, 1  ;;  %v2020_v42 = vadd.f32 %v2019_v38, %v2018_v30  ;;  %v1991_v61 = vadd.f32 %v1990_v14, %v1989_v31  ;;  %v2026_v3 = vrot.slane %v2025_v15, 2  ;;  %2599 = vmatprep.subr.bf16.mxu0 %v3754_v18  ;;  %v3766_v30 = vld [vmem:[%s5097_s5 + $0xe4] ss:$8 sps:$4 sm:$0xff]   ;;  %v3770_v14 = vld [vmem:[%s5097_s5 + $0xd0] ss:$8 sps:$4 sm:$0xff]  }
 0x151   :  { %v3769_v31 = vld [vmem:[%s5097_s5 + $0x1e4] ss:$8 sps:$4 sm:$0xff]  }
 0x152   :  { %v1986_v23 = vadd.f32 %v1985_v41, %v1984_v37  ;;  %v2021_v48 = vrot.slane %v2020_v42, 1  ;;  %v1992_v49 = vrot.slane %v1991_v61, 1  ;;  %v2027_v28 = vadd.f32 %v2026_v3, %v2025_v15  ;;  %2641 = vmatpush1.bf16.msra.mxu1 %v3755_v21  ;;  %v3775_v37 = vld [vmem:[%s5097_s5 + $0x1d4] ss:$8 sps:$4 sm:$0xff]   ;;  %v3773_v15 = vld [vmem:[%s5097_s5 + $0x1d0] ss:$8 sps:$4 sm:$0xff]  }
 0x153   :  { %2600 = vmatpush1.bf16.msra.mxu0 %v3752_v20  ;;  %2642 = vmatprep.subr.bf16.mxu1 %v3763_v25  ;;  %v3778_v41 = vld [vmem:[%s5097_s5 + $0xc4] ss:$8 sps:$4 sm:$0xff]   ;;  %v3779_v3 = vld [vmem:[%s5097_s5 + $0x1c0] ss:$8 sps:$4 sm:$0xff]  }
 0x154   :  { %v4800_v51 = vmul.f32 0.5, %v1986_v23  ;;  %v2022_v52 = vadd.f32 %v2021_v48, %v2020_v42  ;;  %v1993_v53 = vadd.f32 %v1992_v49, %v1991_v61  ;;  %v2028_v54 = vrot.slane %v2027_v28, 1  ;;  %2601 = vmatprep.subr.bf16.mxu0 %v3760_v24  ;;  %v3781_v42 = vld [vmem:[%s5097_s5 + $0x1c4] ss:$8 sps:$4 sm:$0xff]   ;;  %v3776_v61 = vld [vmem:[%s5097_s5 + $0xc0] ss:$8 sps:$4 sm:$0xff]  }
 0x155   :  { %v3782_v23 = vld [vmem:[%s5097_s5 + $0xb0] ss:$8 sps:$4 sm:$0xff]   ;;  %v3790_v49 = vld [vmem:[%s5097_s5 + $0xa4] ss:$8 sps:$4 sm:$0xff]  }
 0x156   :  { %v2044_v57 = vmul.f32 0.5, %v2022_v52  ;;  %v2048_v58 = vmul.f32 %v4800_v51, %v4800_v51  ;;  %v4810_v35 = vmul.f32 0.5, %v1993_v53  ;;  %v2029_v36 = vadd.f32 %v2028_v54, %v2027_v28  ;;  %2643 = vmatpush2.bf16.msra.mxu1 %v3761_v27  ;;  %v3785_v48 = vld [vmem:[%s5097_s5 + $0x1b0] ss:$8 sps:$4 sm:$0xff]   ;;  %v3793_v28 = vld [vmem:[%s5097_s5 + $0x1a4] ss:$8 sps:$4 sm:$0xff]  }
 0x157   :  { %2602 = vmatpush2.bf16.msra.mxu0 %v3758_v26  ;;  %2644 = vmatprep.subr.bf16.mxu1 %v3769_v31  ;;  %v3794_v52 = vld [vmem:[%s5097_s5 + $0x90] ss:$8 sps:$4 sm:$0xff]   ;;  %v3796_v53 = vld [vmem:[%s5097_s5 + $0x94] ss:$8 sps:$4 sm:$0xff]  }
 0x158   :  { %v2052_v63 = vsub.f32 %v2044_v57, %v2048_v58  ;;  %v2045_v0 = vmul.f32 0.5, %v2029_v36  ;;  %v2049_v1 = vmul.f32 %v4810_v35, %v4810_v35  ;;  %v2129_v2 = vcombine.low %v4800_v51, %v4810_v35  ;;  %2603 = vmatprep.subr.bf16.mxu0 %v3766_v30  ;;  %v3799_v54 = vld [vmem:[%s5097_s5 + $0x194] ss:$8 sps:$4 sm:$0xff]   ;;  %v3805_v57 = vld [vmem:[%s5097_s5 + $0x184] ss:$8 sps:$4 sm:$0xff]  }
 0x159   :  { %v3800_v58 = vld [vmem:[%s5097_s5 + $0x80] ss:$8 sps:$4 sm:$0xff]  }
 0x15a   :  { %v2056_v7 = vmax.f32 %v2052_v63, 0.0  ;;  %v2053_v8 = vsub.f32 %v2045_v0, %v2049_v1  ;;  %2645 = vmatpush2.bf16.msra.mxu1 %v3767_v33  ;;  %v3803_v36 = vld [vmem:[%s5097_s5 + $0x180] ss:$8 sps:$4 sm:$0xff]  }
 0x15b   :  { %2604 = vmatpush2.bf16.msra.mxu0 %v3764_v32  ;;  %2646 = vmatprep.subr.bf16.mxu1 %v3775_v37 }
 0x15c   :  { %v2061_v11 = vadd.f32 1e-05, %v2056_v7  ;;  %v2057_v12 = vmax.f32 %v2053_v8, 0.0  ;;  %2605 = vmatprep.subr.bf16.mxu0 %v3772_v34  ;;  %v4955_v8 = vsub.s32 2, %v4013_v43 }
 0x15e   :  { %v2062_v17 = vadd.f32 1e-05, %v2057_v12  ;;  %3822 = vrsqrt.f32 %v2061_v11  ;;  %2647 = vmatpush2.bf16.msra.mxu1 %v3773_v15  ;;  %v362_v10 = vrot.slane %v4721_v45, %v4955_v8  ;;  %v366_v11 = vrot.slane %v4721_v45, %v4958_v9 }
 0x15f   :  { %2606 = vmatpush2.bf16.msra.mxu0 %v3770_v14  ;;  %2648 = vmatprep.subr.bf16.mxu1 %v3781_v42 }
 0x160   :  { %3824 = vrsqrt.f32 %v2062_v17  ;;  %2607 = vmatprep.subr.bf16.mxu0 %v3778_v41 }
 0x162   :  { %2649 = vmatpush2.bf16.msra.mxu1 %v3779_v3 }
 0x163   :  { %2608 = vmatpush2.bf16.msra.mxu0 %v3776_v61  ;;  %2650 = vmatprep.subr.bf16.mxu1 %v3787_v22 }
 0x164   :  { %2609 = vmatprep.subr.bf16.mxu0 %v3784_v47 }
 0x166   :  { %2651 = vmatpush2.bf16.msra.mxu1 %v3785_v48 }
 0x167   :  { %2610 = vmatpush2.bf16.msra.mxu0 %v3782_v23  ;;  %2652 = vmatprep.subr.bf16.mxu1 %v3793_v28  ;;  %v3835_v28 = vmov 1966171168  }
 0x168   :  { %2611 = vmatprep.subr.bf16.mxu0 %v3790_v49 }
 0x16a   :  { %2653 = vmatpush2.bf16.msra.mxu1 %v3791_v50 }
 0x16b   :  { %v4882_v38 = vpop.eup %3822  ;;  %2612 = vmatpush2.bf16.msra.mxu0 %v3788_v29  ;;  %2654 = vmatprep.subr.bf16.mxu1 %v3799_v54  ;;  %v2076_v29 = vunpack.c.l.s4 %v3835_v28 }
 0x16c   :  { %2613 = vmatprep.subr.bf16.mxu0 %v3796_v53 }
 0x16d   :  { %v4890_v39 = vpop.eup %3824 }
 0x16e   :  { %v2073_v40 = vcombine.low %v4882_v38, %v4890_v39  ;;  %2655 = vmatpush2.bf16.msra.mxu1 %v3797_v56 }
 0x16f   :  { %2614 = vmatpush2.bf16.msra.mxu0 %v3794_v52  ;;  %2656 = vmatprep.subr.bf16.mxu1 %v3805_v57 }
 0x170   :  { %2615 = vmatprep.subr.bf16.mxu0 %v3802_v55 }
 0x172   :  { %2657 = vmatpush2.bf16.msra.mxu1 %v3803_v36  ;;  %v2077_v36 = vunpack.c.0.s8 %v2076_v29 }
 0x173   :  { %2616 = vmatpush2.bf16.msra.mxu0 %v3800_v58 }
 0x182   :  { %v1849_v59 = vpop.f32.mrf.mxu0 }
 0x183   :  { %v1890_v62 = vpop.f32.mrf.mxu1  ;;  %v1850_v12 = vadd.f32 %v1849_v59, %v362_v10  ;;  %v4979_v10 = vsub.s32 %v2077_v36, %v4013_v43 }
 0x184   :  { %v1851_v63 = vpop.f32.mrf.mxu0 }
 0x185   :  { %v1892_v0 = vpop.f32.mrf.mxu1  ;;  %v1852_v13 = vadd.f32 %v1851_v63, %v366_v11  ;;  %v1891_v16 = vadd.f32 %v1890_v62, %v1850_v12 }
 0x186   :  { %v1853_v1 = vpop.f32.mrf.mxu0 }
 0x187   :  { %v1894_v4 = vpop.f32.mrf.mxu1  ;;  %v1893_v19 = vadd.f32 %v1892_v0, %v1852_v13 }
 0x188   :  { %v1854_v5 = vpop.f32.mrf.mxu0 }
 0x189   :  { %v1895_v7 = vpop.f32.mrf.mxu1 }
 0x1c2   :  { %v1931_v17 = vpop.f32.mrf.mxu0 }
 0x1c3   :  { %v1972_v18 = vpop.f32.mrf.mxu1  ;;  %v1932_v20 = vadd.f32 %v1931_v17, %v1891_v16 }
 0x1c4   :  { %v1933_v21 = vpop.f32.mrf.mxu0 }
 0x1c5   :  { %v1974_v24 = vpop.f32.mrf.mxu1  ;;  %v4964_v25 = vadd.f32 %v1972_v18, %v1932_v20  ;;  %v1934_v26 = vadd.f32 %v1933_v21, %v1893_v19  ;;  %v2137_v21 = vrot.slane %v2129_v2, %v4979_v10  ;;  %v2060_v2 = vld [vmem:[%s5098_s3] sm:$0xf] }
 0x1c6   :  { %v1935_v27 = vpop.f32.mrf.mxu0 }
 0x1c7   :  { %v1976_v30 = vpop.f32.mrf.mxu1  ;;  %v1994_v31 = vsel %vm1979_vm0, %v4964_v25, 0.0  ;;  %v2014_v45 = vmul.f32 %v4964_v25, %v4964_v25  ;;  %v4970_v32 = vadd.f32 %v1974_v24, %v1934_v26 }
 0x1c8   :  { %v1995_v33 = vrot.slane %v1994_v31, 4  ;;  %v1936_v34 = vpop.f32.mrf.mxu0 }
 0x1c9   :  { %v1977_v37 = vpop.f32.mrf.mxu1  ;;  %v2030_v14 = vsel %vm1979_vm0, %v2014_v45, 0.0  ;;  %v2001_v15 = vsel %vm1979_vm0, %v4970_v32, 0.0  ;;  %v2015_v41 = vmul.f32 %v4970_v32, %v4970_v32 }
 0x1ca   :  { %v1996_v42 = vadd.f32 %v1995_v33, %v1994_v31  ;;  %v2031_v61 = vrot.slane %v2030_v14, 4  ;;  %v2002_v3 = vrot.slane %v2001_v15, 4 }
 0x1cb   :  { %v2037_v47 = vsel %vm1979_vm0, %v2015_v41, 0.0 }
 0x1cc   :  { %v1997_v22 = vrot.slane %v1996_v42, 2  ;;  %v2032_v23 = vadd.f32 %v2031_v61, %v2030_v14  ;;  %v2003_v48 = vadd.f32 %v2002_v3, %v2001_v15  ;;  %v2038_v49 = vrot.slane %v2037_v47, 4  ;;  %v2124_v61 = vld [vmem:[%s5099_s4] sm:$0xf] }
 0x1cd   :  { %v2081_v14 = vrot.slane %v2073_v40, %v4979_v10 }
 0x1ce   :  { %v1998_v50 = vadd.f32 %v1997_v22, %v1996_v42  ;;  %v2033_v52 = vrot.slane %v2032_v23, 2  ;;  %v2004_v53 = vrot.slane %v2003_v48, 2  ;;  %v2039_v54 = vadd.f32 %v2038_v49, %v2037_v47 }
 0x1d0   :  { %v1999_v55 = vrot.slane %v1998_v50, 1  ;;  %v2034_v56 = vadd.f32 %v2033_v52, %v2032_v23  ;;  %v2005_v57 = vadd.f32 %v2004_v53, %v2003_v48  ;;  %v2040_v58 = vrot.slane %v2039_v54, 2 }
 0x1d2   :  { %v2000_v59 = vadd.f32 %v1999_v55, %v1998_v50  ;;  %v2035_v62 = vrot.slane %v2034_v56, 1  ;;  %v2006_v63 = vrot.slane %v2005_v57, 1  ;;  %v2041_v0 = vadd.f32 %v2040_v58, %v2039_v54 }
 0x1d4   :  { %v2010_v1 = vmul.f32 0.5, %v2000_v59  ;;  %v2036_v4 = vadd.f32 %v2035_v62, %v2034_v56  ;;  %v2007_v5 = vadd.f32 %v2006_v63, %v2005_v57  ;;  %v2042_v7 = vrot.slane %v2041_v0, 1  ;;  %v3808_v63 = vld [vmem:[%s5100_s9 + $0x70] sm:$0xff]  }
 0x1d6   :  { %v2046_v11 = vmul.f32 0.5, %v2036_v4  ;;  %v2050_v12 = vmul.f32 %v2010_v1, %v2010_v1  ;;  %v2011_v13 = vmul.f32 0.5, %v2007_v5  ;;  %v2043_v16 = vadd.f32 %v2042_v7, %v2041_v0  ;;  %v3809_v0 = vld [vmem:[%s5100_s9 + $0x30] sm:$0xff]   ;;  %v3811_v4 = vld [vmem:[%s5100_s9 + $0x28] sm:$0xff]   ;;  %v3812_v5 = vld [vmem:[%s5100_s9 + $0x60] sm:$0xff]  }
 0x1d7   :  { %v3813_v7 = vld [vmem:[%s5100_s9 + $0x20] sm:$0xff]  }
 0x1d8   :  { %v2054_v17 = vsub.f32 %v2046_v11, %v2050_v12  ;;  %v2047_v18 = vmul.f32 0.5, %v2043_v16  ;;  %v2051_v19 = vmul.f32 %v2011_v13, %v2011_v13  ;;  %v2130_v20 = vcombine.low %v2010_v1, %v2011_v13  ;;  %v3810_v1 = vld [vmem:[%s5100_s9 + $0x68] sm:$0xff]   ;;  %v3814_v11 = vld [vmem:[%s5100_s9 + $0x58] sm:$0xff]   ;;  %v3816_v13 = vld [vmem:[%s5100_s9 + $0x50] sm:$0xff]  }
 0x1d9   :  { %v3815_v12 = vld [vmem:[%s5100_s9 + $0x18] sm:$0xff]   ;;  %v3817_v16 = vld [vmem:[%s5100_s9 + $0x10] sm:$0xff]  }
 0x1da   :  { %v2058_v24 = vmax.f32 %v2054_v17, 0.0  ;;  %v2055_v26 = vsub.f32 %v2047_v18, %v2051_v19  ;;  %v2144_v27 = vrot.slane %v2130_v20, %v4979_v10  ;;  %v3818_v17 = vld [vmem:[%s5100_s9 + $0x48] sm:$0xff]   ;;  %v3820_v19 = vld [vmem:[%s5100_s9 + $0x40] sm:$0xff]  }
 0x1db   :  { %v3819_v18 = vld [vmem:[%s5100_s9 + $0x8] sm:$0xff]   ;;  %v3821_v20 = vld [vmem:[%s5100_s9] sm:$0xff]  }
 0x1dc   :  { %v2063_v30 = vadd.f32 1e-05, %v2058_v24  ;;  %v2059_v43 = vmax.f32 %v2055_v26, 0.0  ;;  %v2145_v31 = vcombine.low %v2137_v21, %v2144_v27  ;;  %v2253_v21 = vld [vmem:[%s5101_s6] sm:$0x3] }
 0x1dd   :  { %v2258_v24 = vrot.slane %v2253_v21, %v4716_v44  ;;  %v2262_v26 = vrot.slane %v2253_v21, %v4724_v46 }
 0x1de   :  { %v2064_v45 = vadd.f32 1e-05, %v2059_v43  ;;  %3826 = vrsqrt.f32 %v2063_v30  ;;  %v2152_v42 = vrot.slane %v2145_v31, %v4979_v10 }
 0x1e0   :  { %3828 = vrsqrt.f32 %v2064_v45 }
 0x1eb   :  { %v3827_v33 = vpop.eup %3826 }
 0x1ed   :  { %v3829_v34 = vpop.eup %3828 }
 0x1ee   :  { %v2074_v37 = vcombine.low %v3827_v33, %v3829_v34 }
 0x1f0   :  { %v2088_v51 = vrot.slane %v2074_v37, %v4979_v10 }
 0x1f2   :  { %v2089_v35 = vcombine.low %v2081_v14, %v2088_v51 }
 0x1f4   :  { %v2096_v15 = vrot.slane %v2089_v35, %v4979_v10 }
 0x1f6   :  { %v2098_v41 = vmul.f32 %v2096_v15, %v2060_v2 }
 0x1f8   :  { %v2115_v3 = vrot.slane %v2098_v41, %v4958_v9  ;;  %v2107_v38 = vrot.slane %v2098_v41, %v4724_v46  ;;  %v2154_v39 = vmul.f32 %v2152_v42, %v2098_v41  ;;  %v2103_v40 = vrot.slane %v2098_v41, %v4716_v44 }
 0x1f9   :  { %v2111_v47 = vrot.slane %v2098_v41, %v4955_v8 }
 0x1fa   :  { %v2121_v22 = vmul.f32 %v2107_v38, %v4750_v6  ;;  %v2155_v23 = vsub.f32 %v2124_v61, %v2154_v39  ;;  %v2120_v48 = vmul.f32 %v2103_v40, %v4738_v60  ;;  %v2123_v49 = vmul.f32 %v2115_v3, %v4970_v32 }
 0x1fb   :  { %v2122_v28 = vmul.f32 %v2111_v47, %v4964_v25 }
 0x1fc   :  { %v2164_v29 = vrot.slane %v2155_v23, %v4724_v46  ;;  %v2172_v50 = vrot.slane %v2155_v23, %v4958_v9  ;;  %v2160_v52 = vrot.slane %v2155_v23, %v4716_v44  ;;  %v2168_v53 = vrot.slane %v2155_v23, %v4955_v8  ;;  %v3806_v8 = vld [vmem:[%s5100_s9 + $0x78] sm:$0xff]  }
 0x1fd   :  { %v3807_v9 = vld [vmem:[%s5100_s9 + $0x38] sm:$0xff]   ;;  %3300 = vmatprep.subr.bf16.mxu0 %v3806_v8 }
 0x1fe   :  { %v2178_v54 = vadd.f32 %v2164_v29, %v2121_v22  ;;  %v2180_v55 = vadd.f32 %v2172_v50, %v2123_v49  ;;  %v2177_v56 = vadd.f32 %v2160_v52, %v2120_v48  ;;  %v2179_v57 = vadd.f32 %v2168_v53, %v2122_v28 }
 0x200   :  { %v2182_v6 = vmax.f32 %v2178_v54, 0.0  ;;  %v2184_v58 = vmax.f32 %v2180_v55, 0.0  ;;  %v2181_v36 = vmax.f32 %v2177_v56, 0.0  ;;  %v2183_v60 = vmax.f32 %v2179_v57, 0.0 }
 0x202   :  { %v2186_v59 = vpack.c.bf16 %v2182_v6, %v2182_v6  ;;  %v2188_v32 = vpack.c.bf16 %v2184_v58, %v2184_v58  ;;  %v2185_v62 = vpack.c.bf16 %v2181_v36, %v2181_v36  ;;  %v2187_v25 = vpack.c.bf16 %v2183_v60, %v2183_v60 }
 0x204   :  { %2617 = vmatprep.mubr.bf16.mxu0 %v2186_v59  ;;  %2658 = vmatprep.mubr.bf16.mxu1 %v2188_v32 }
 0x205   :  { %2618 = vmatmul.mubr.bf16.vlgmr.msra.gmra.mxu0 %v2185_v62  ;;  %2659 = vmatmul.mubr.bf16.vlgmr.msra.gmra.mxu1 %v2187_v25 }
 0x206   :  { %3301 = vmatpush3.bf16.msra.mxu0 %v3807_v9 }
 0x207   :  { %3302 = vmatprep.subr.bf16.mxu0 %v3808_v63 }
 0x20a   :  { %3303 = vmatpush3.bf16.msra.mxu0 %v3809_v0 }
 0x20b   :  { %3304 = vmatprep.subr.bf16.mxu0 %v3810_v1 }
 0x20e   :  { %3305 = vmatpush3.bf16.msra.mxu0 %v3811_v4 }
 0x20f   :  { %3306 = vmatprep.subr.bf16.mxu0 %v3812_v5 }
 0x212   :  { %3307 = vmatpush3.bf16.msra.mxu0 %v3813_v7 }
 0x213   :  { %3308 = vmatprep.subr.bf16.mxu0 %v3814_v11 }
 0x216   :  { %3309 = vmatpush3.bf16.msra.mxu0 %v3815_v12 }
 0x217   :  { %3310 = vmatprep.subr.bf16.mxu0 %v3816_v13 }
 0x21a   :  { %3311 = vmatpush3.bf16.msra.mxu0 %v3817_v16 }
 0x21b   :  { %3312 = vmatprep.subr.bf16.mxu0 %v3818_v17 }
 0x21e   :  { %3313 = vmatpush3.bf16.msra.mxu0 %v3819_v18 }
 0x21f   :  { %3314 = vmatprep.subr.bf16.mxu0 %v3820_v19 }
 0x222   :  { %3315 = vmatpush3.bf16.msra.mxu0 %v3821_v20 }
 0x2c5   :  { %v2619_v27 = vpop.f32.mrf.mxu0  ;;  %v2660_v30 = vpop.f32.mrf.mxu1 }
 0x2c6   :  { %v2620_v43 = vadd.f32 %v2619_v27, %v2258_v24 }
 0x2c7   :  { %v2621_v31 = vpop.f32.mrf.mxu0  ;;  %v2662_v45 = vpop.f32.mrf.mxu1 }
 0x2c8   :  { %v5064_v33 = vadd.f32 %v2660_v30, %v2620_v43  ;;  %v2622_v34 = vadd.f32 %v2621_v31, %v2262_v26  ;;  %v2707_v26 = vld [vmem:[%s5102_s7] sm:$0x3] }
 0x2c9   :  { %v2623_v37 = vpop.f32.mrf.mxu0  ;;  %v2664_v14 = vpop.f32.mrf.mxu1  ;;  %v2744_v31 = vld [vmem:[%s5103_s8] sm:$0x3] }
 0x2ca   :  { %v2667_v51 = vsel %vm1979_vm0, %v5064_v33, 0.0  ;;  %v2683_v35 = vmul.f32 %v5064_v33, %v5064_v33  ;;  %v2663_v2 = vadd.f32 %v2662_v45, %v2622_v34 }
 0x2cb   :  { %v2668_v15 = vrot.slane %v2667_v51, 4  ;;  %v2624_v41 = vpop.f32.mrf.mxu0  ;;  %v2665_v42 = vpop.f32.mrf.mxu1 }
 0x2cc   :  { %v2685_v61 = vsel %vm1979_vm0, %v2683_v35, 0.0  ;;  %v2674_v3 = vsel %vm1979_vm0, %v2663_v2, 0.0  ;;  %v2684_v38 = vmul.f32 %v2663_v2, %v2663_v2 }
 0x2cd   :  { %v2669_v39 = vadd.f32 %v2668_v15, %v2667_v51  ;;  %v2686_v40 = vrot.slane %v2685_v61, 4  ;;  %v2675_v47 = vrot.slane %v2674_v3, 4 }
 0x2ce   :  { %v2692_v22 = vsel %vm1979_vm0, %v2684_v38, 0.0 }
 0x2cf   :  { %v2670_v23 = vrot.slane %v2669_v39, 2  ;;  %v2687_v48 = vadd.f32 %v2686_v40, %v2685_v61  ;;  %v2676_v49 = vadd.f32 %v2675_v47, %v2674_v3  ;;  %v2693_v28 = vrot.slane %v2692_v22, 4  ;;  %v3283_v47 = vld [vmem:[%s5104_s10] ss:$0 sm:$0xff] }
 0x2d1   :  { %v2671_v29 = vadd.f32 %v2670_v23, %v2669_v39  ;;  %v2688_v50 = vrot.slane %v2687_v48, 2  ;;  %v2677_v52 = vrot.slane %v2676_v49, 2  ;;  %v2694_v53 = vadd.f32 %v2693_v28, %v2692_v22 }
 0x2d3   :  { %v2672_v54 = vrot.slane %v2671_v29, 1  ;;  %v2689_v55 = vadd.f32 %v2688_v50, %v2687_v48  ;;  %v2678_v56 = vadd.f32 %v2677_v52, %v2676_v49  ;;  %v2695_v57 = vrot.slane %v2694_v53, 2 }
 0x2d5   :  { %v2673_v6 = vadd.f32 %v2672_v54, %v2671_v29  ;;  %v2690_v58 = vrot.slane %v2689_v55, 1  ;;  %v2679_v36 = vrot.slane %v2678_v56, 1  ;;  %v2696_v60 = vadd.f32 %v2695_v57, %v2694_v53 }
 0x2d7   :  { %v2681_v59 = vmul.f32 0.5, %v2673_v6  ;;  %v2691_v32 = vadd.f32 %v2690_v58, %v2689_v55  ;;  %v2680_v62 = vadd.f32 %v2679_v36, %v2678_v56  ;;  %v2697_v25 = vrot.slane %v2696_v60, 1 }
 0x2d9   :  { %v2699_v8 = vmul.f32 0.5, %v2691_v32  ;;  %v2701_v9 = vmul.f32 %v2681_v59, %v2681_v59  ;;  %v2682_v63 = vmul.f32 0.5, %v2680_v62  ;;  %v2698_v0 = vadd.f32 %v2697_v25, %v2696_v60 }
 0x2db   :  { %v2703_v1 = vsub.f32 %v2699_v8, %v2701_v9  ;;  %v2700_v4 = vmul.f32 0.5, %v2698_v0  ;;  %v2702_v5 = vmul.f32 %v2682_v63, %v2682_v63  ;;  %v2747_v18 = vcombine.low %v2681_v59, %v2682_v63 }
 0x2dd   :  { %v2705_v7 = vmax.f32 %v2703_v1, 0.0  ;;  %v2704_v11 = vsub.f32 %v2700_v4, %v2702_v5  ;;  %v2754_v24 = vrot.slane %v2747_v18, %v4979_v10 }
 0x2df   :  { %v2708_v12 = vadd.f32 1e-05, %v2705_v7  ;;  %v2706_v13 = vmax.f32 %v2704_v11, 0.0  ;;  %v2761_v43 = vrot.slane %v2754_v24, %v4979_v10 }
 0x2e1   :  { %v2709_v16 = vadd.f32 1e-05, %v2706_v13  ;;  %3830 = vrsqrt.f32 %v2708_v12 }
 0x2e3   :  { %3832 = vrsqrt.f32 %v2709_v16 }
 0x2ee   :  { %v3831_v17 = vpop.eup %3830 }
 0x2f0   :  { %v3833_v19 = vpop.eup %3832 }
 0x2f1   :  { %v2714_v20 = vcombine.low %v3831_v17, %v3833_v19 }
 0x2f3   :  { %v2721_v21 = vrot.slane %v2714_v20, %v4979_v10 }
 0x2f5   :  { %v2728_v27 = vrot.slane %v2721_v21, %v4979_v10 }
 0x2f7   :  { %v2730_v30 = vmul.f32 %v2728_v27, %v2707_v26 }
 0x2f9   :  { %v2739_v45 = vrot.slane %v2730_v30, %v4724_v46  ;;  %v2763_v34 = vmul.f32 %v2761_v43, %v2730_v30  ;;  %v2735_v37 = vrot.slane %v2730_v30, %v4716_v44 }
 0x2fb   :  { %v2764_v14 = vsub.f32 %v2744_v31, %v2763_v34  ;;  %v2743_v51 = vmul.f32 %v2739_v45, %v2663_v2  ;;  %v2742_v15 = vmul.f32 %v2735_v37, %v5064_v33 }
 0x2fd   :  { %v2773_v35 = vrot.slane %v2764_v14, %v4724_v46  ;;  %v2769_v41 = vrot.slane %v2764_v14, %v4716_v44 }
 0x2ff   :  { %v2777_v42 = vadd.f32 %v2773_v35, %v2743_v51  ;;  %v2776_v61 = vadd.f32 %v2769_v41, %v2742_v15 }
 0x301   :  { %v2779_v10 = vmax.f32 %v2777_v42, 0.0  ;;  %v2778_v3 = vmax.f32 %v2776_v61, 0.0 }
 0x303   :  { %v2781_v38 = vpack.c.bf16 %v2779_v10, %v2779_v10  ;;  %v2780_v39 = vpack.c.bf16 %v2778_v3, %v2778_v3 }
 0x305   :  { %2949 = vmatprep.mubr.bf16.mxu0 %v2781_v38 }
 0x306   :  { %2950 = vmatmul.mubr.bf16.vlgmr.msra.gmra.mxu0 %v2780_v39 }
 0x3c6   :  { %v3316_v40 = vpop.f32.mrf.mxu0 }
 0x3c8   :  { %v3317_v2 = vpop.f32.mrf.mxu0 }
 0x3c9   :  { %v3318_v22 = vadd.f32 %v3317_v2, %v3316_v40 }
 0x3ca   :  { %v3319_v46 = vpop.f32.mrf.mxu0 }
 0x3cb   :  { %v2952_v33 = vadd.f32 %v3318_v22, %v3283_v47 }
 0x3cc   :  { %v3320_v23 = vpop.f32.mrf.mxu0 }
 0x3cd   :  { %2958 = vst.msk [vmem:[%s5105_s11] sm:$0x3] %vm2957_vm1, %v2952_v33 }

</bundles_post_ra>
